<compile_context>
chip_gen: v7x
topology: tpu7x:2x2x1
jax: 0.10.0
libtpu: 0.0.40
codegen_flags: <defaults>
</compile_context>

<pallas_src>
import functools

import jax
import jax.numpy as jnp
import numpy as np
from jax import lax
from jax.experimental import pallas as pl
from jax.experimental.pallas import tpu as pltpu

CP = 128   # channel width padded to one full lane width (lane-dense everywhere)


# ----------------------------------------------------------------------------
# Fused Pallas kernel: the entire head for `nb` batch elements per grid step.
# Inputs:
#   xtap   (nb, OH, OW, 9*CP)  bf16  9 stride-2 taps stacked on the lane axis
#   w_sb1  (9*CP, 2*CP)        bf16  [s1 | b1] dense (block-diag) weights, K-flat
#   w_s2 / w_b2 / w_b4 (CP,CP) bf16  dense 1x1 (pointwise) weights
#   w_b3   (9*CP, CP)          bf16  dense 3x3 stride-1 weights, K-flat
#   ep     (15, 2*CP)          f32   per-layer [scale, bias, alpha] rows
# Output:
#   o      (nb, OH, OW, CP)    f32
# Scratch:
#   pad    (nb, OH+2, OW+2, CP) bf16  VMEM zero-halo buffer for the b3 conv
# ----------------------------------------------------------------------------
def _head_kernel(nb, OH, OW, Cp,
                 xtap_ref, w_sb1_ref, w_s2_ref, w_b2_ref, w_b3_ref, w_b4_ref,
                 ep_ref, o_ref, pad_ref):
    f32 = jnp.float32
    bf16 = jnp.bfloat16
    M = nb * OH * OW

    def affine(acc, li, width):            # folded BatchNorm (inference)
        scale = ep_ref[3 * li + 0:3 * li + 1, :width]
        bias = ep_ref[3 * li + 1:3 * li + 2, :width]
        return acc * scale + bias

    def prelu(y, li, width):
        alpha = ep_ref[3 * li + 2:3 * li + 3, :width]
        return jnp.where(y >= 0.0, y, y * alpha)

    # --- s1 & b1: both stride-2 3x3 grouped convs read the same 9 taps, so the
    #     weights are concatenated on the output axis and the taps are already
    #     stacked on K -> one (M, 9*Cp) x (9*Cp, 2*Cp) MXU matmul.
    patches = xtap_ref[...].reshape(M, 9 * Cp)                    # bf16
    acc = jnp.dot(patches, w_sb1_ref[...], preferred_element_type=f32)
    y = prelu(affine(acc, 0, 2 * Cp), 0, 2 * Cp)   # VarGConv always has PReLU
    a_s1 = y[:, :Cp]          # short-branch activation (lane-aligned split)
    a_b1 = y[:, Cp:]          # block-branch activation

    # --- short: s2 = PointConv (1x1 grouped) + BN, no PReLU
    short = affine(jnp.dot(a_s1.astype(bf16), w_s2_ref[...],
                           preferred_element_type=f32), 1, Cp)

    # --- block: b2 = PointConv + BN + PReLU
    a_b2 = prelu(affine(jnp.dot(a_b1.astype(bf16), w_b2_ref[...],
                                preferred_element_type=f32), 2, Cp), 2, Cp)

    # --- block: b3 = VarGConv 3x3 stride-1; "same" padding lives in a bf16
    #     VMEM scratch.  Only the halo is zeroed (interior fully overwritten).
    zrow = jnp.zeros((nb, 1, OW + 2, Cp), bf16)
    zcol = jnp.zeros((nb, OH, 1, Cp), bf16)
    pad_ref[:, 0:1, :, :] = zrow
    pad_ref[:, OH + 1:OH + 2, :, :] = zrow
    pad_ref[:, 1:OH + 1, 0:1, :] = zcol
    pad_ref[:, 1:OH + 1, OW + 1:OW + 2, :] = zcol
    pad_ref[:, 1:OH + 1, 1:OW + 1, :] = a_b2.reshape(nb, OH, OW, Cp).astype(bf16)

    # 9 shifted windows stacked on the lane axis -> one big-K matmul.
    # TODO(synk): a pltpu.roll + mask formulation would avoid the non-tile-
    # aligned window copies entirely (XLU is idle here); kept the proven
    # pad-scratch path for robustness at these tiny shapes.
    b3_patches = jnp.concatenate(
        [pad_ref[:, kh:kh + OH, kw:kw + OW, :].reshape(M, Cp)
         for kh in range(3) for kw in range(3)], axis=-1)          # (M, 9*Cp)
    a_b3 = prelu(affine(jnp.dot(b3_patches, w_b3_ref[...],
                                preferred_element_type=f32), 3, Cp), 3, Cp)

    # --- block: b4 = PointConv + BN (no PReLU), fused residual add with short
    y_b4 = affine(jnp.dot(a_b3.astype(bf16), w_b4_ref[...],
                          preferred_element_type=f32), 4, Cp)
    o_ref[...] = (short + y_b4).reshape(nb, OH, OW, Cp).astype(o_ref.dtype)


# ----------------------------------------------------------------------------
# Host-side parameter packing (deterministic, done once).
# ----------------------------------------------------------------------------
def fold_bn(gamma, beta, mean, var, eps=1e-5):
    scale = gamma / jnp.sqrt(var + eps)
    bias = beta - mean * scale
    return scale, bias


def dense_padded_weight(w, groups, cp=CP):
    """PyTorch grouped weight (Cout, Cin//groups, k, k) -> dense (k,k,cp,cp)."""
    w = np.asarray(w, np.float32)
    Cout, Cpg, k, _ = w.shape
    opg = Cout // groups
    dense = np.zeros((k, k, cp, cp), np.float32)
    for g in range(groups):
        wg = np.transpose(w[g * opg:(g + 1) * opg], (2, 3, 1, 0))  # (k,k,Cpg,opg)
        dense[:, :, g * Cpg:(g + 1) * Cpg, g * opg:(g + 1) * opg] = wg
    return dense


def folded_affine(layer, cp=CP):
    scale, bias = fold_bn(layer['gamma'], layer['beta'],
                          layer['mean'], layer['var'])
    scale = np.asarray(scale, np.float32)
    bias = np.asarray(bias, np.float32)
    c = scale.shape[0]
    s = np.zeros(cp, np.float32); s[:c] = scale      # padded channels: scale=0
    b = np.zeros(cp, np.float32); b[:c] = bias       # padded channels: bias=0
    a = np.full(cp, float(layer['alpha']), np.float32)
    return s, b, a


def pack_head_params(params, groups, cp=CP):
    d = {n: dense_padded_weight(params[n]['w'], groups, cp)
         for n in ('s1', 's2', 'b1', 'b2', 'b3', 'b4')}
    packed = {
        # [s1 | b1] concatenated on the output axis, 3x3 taps flattened into K
        # (row ordering (kh*3+kw)*cp + cin matches the wrapper's tap stacking).
        'w_sb1': jnp.asarray(
            np.concatenate([d['s1'], d['b1']], axis=-1).reshape(9 * cp, 2 * cp),
            jnp.bfloat16),
        'w_s2': jnp.asarray(d['s2'][0, 0], jnp.bfloat16),
        'w_b2': jnp.asarray(d['b2'][0, 0], jnp.bfloat16),
        'w_b3': jnp.asarray(d['b3'].reshape(9 * cp, cp), jnp.bfloat16),
        'w_b4': jnp.asarray(d['b4'][0, 0], jnp.bfloat16),
    }
    ep = np.zeros((15, 2 * cp), np.float32)
    s1 = folded_affine(params['s1'], cp)
    b1 = folded_affine(params['b1'], cp)
    ep[0] = np.concatenate([s1[0], b1[0]])
    ep[1] = np.concatenate([s1[1], b1[1]])
    ep[2] = np.concatenate([s1[2], b1[2]])
    for li, name in ((1, 's2'), (2, 'b2'), (3, 'b3'), (4, 'b4')):
        s, b, a = folded_affine(params[name], cp)
        ep[3 * li + 0, :cp] = s
        ep[3 * li + 1, :cp] = b
        ep[3 * li + 2, :cp] = a
    packed['ep'] = jnp.asarray(ep)
    return packed


# ----------------------------------------------------------------------------
# Batch-blocking heuristic: amortize per-grid-step overhead / fill MXU rows
# when N grows, while keeping >=2 grid steps so both v7x cores get work.
# ----------------------------------------------------------------------------
def _pick_nb(N, OH, OW, target_rows=256, max_rows=2048):
    nb = 1
    for cand in range(1, N + 1):
        if N % cand:
            continue
        if N >= 2 and N // cand < 2:
            break                      # keep the grid length >= 2 (megacore)
        if cand * OH * OW > max_rows:
            break                      # VMEM guard for xtap block + pad scratch
        nb = cand
        if cand * OH * OW >= target_rows:
            break
    return nb


# ----------------------------------------------------------------------------
# Forward: one fused pallas_call for the whole head.
# ----------------------------------------------------------------------------
@jax.jit
def head_setting_forward(x, packed):
    N, H, W, C = x.shape
    assert H % 2 == 0 and W % 2 == 0 and C <= CP
    cp = CP
    OH, OW = H // 2, W // 2
    nb = _pick_nb(N, OH, OW)

    # bf16 pad (spatial +1 halo, channels -> cp), then one plane per 3x3 tap of
    # the stride-2 convs, stacked on the LANE axis so the kernel's s1/b1 matmul
    # has K = 9*cp:  xtap[n,oh,ow,(3*kh+kw)*cp + c] = xpad[n, 2*oh+kh, 2*ow+kw, c]
    xpad = jnp.pad(x.astype(jnp.bfloat16),
                   ((0, 0), (1, 1), (1, 1), (0, cp - C)))
    xtap = jnp.concatenate(
        [xpad[:, kh:kh + 2 * OH:2, kw:kw + 2 * OW:2, :]
         for kh in range(3) for kw in range(3)], axis=-1)   # (N,OH,OW,9*cp) bf16

    kernel = functools.partial(_head_kernel, nb, OH, OW, cp)
    out = pl.pallas_call(
        kernel,
        out_shape=jax.ShapeDtypeStruct((N, OH, OW, cp), jnp.float32),
        grid_spec=pltpu.PrefetchScalarGridSpec(
            num_scalar_prefetch=0,
            grid=(N // nb,),
            in_specs=[
                pl.BlockSpec((nb, OH, OW, 9 * cp), lambda n: (n, 0, 0, 0)),
                pl.BlockSpec((9 * cp, 2 * cp), lambda n: (0, 0)),
                pl.BlockSpec((cp, cp), lambda n: (0, 0)),
                pl.BlockSpec((cp, cp), lambda n: (0, 0)),
                pl.BlockSpec((9 * cp, cp), lambda n: (0, 0)),
                pl.BlockSpec((cp, cp), lambda n: (0, 0)),
                pl.BlockSpec((15, 2 * cp), lambda n: (0, 0)),
            ],
            out_specs=pl.BlockSpec((nb, OH, OW, cp), lambda n: (n, 0, 0, 0)),
            scratch_shapes=[
                pltpu.VMEM((nb, OH + 2, OW + 2, cp), jnp.bfloat16)],
        ),
        compiler_params=pltpu.CompilerParams(
            dimension_semantics=("parallel",)),
    )(xtap, packed['w_sb1'], packed['w_s2'], packed['w_b2'],
      packed['w_b3'], packed['w_b4'], packed['ep'])
    # f32 output + [..., :C] slice kept so the demo compares directly against
    # the reference; a real consumer could take the lane-padded slab as-is.
    return out[..., :C]


# ----------------------------------------------------------------------------
# Synthetic parameters (deterministic).
# ----------------------------------------------------------------------------
def init_layer(key, Cin, Cout, k, groups):
    kw_, kg, kb, km, kv = jax.random.split(key, 5)
    return dict(
        w=0.1 * jax.random.normal(kw_, (Cout, Cin // groups, k, k), jnp.float32),
        gamma=1.0 + 0.1 * jax.random.normal(kg, (Cout,), jnp.float32),
        beta=0.1 * jax.random.normal(kb, (Cout,), jnp.float32),
        mean=0.1 * jax.random.normal(km, (Cout,), jnp.float32),
        var=1.0 + 0.1 * jnp.abs(jax.random.normal(kv, (Cout,), jnp.float32)),
        alpha=jnp.float32(0.25),   # nn.PReLU() default
    )


# ----------------------------------------------------------------------------
# Pure-JAX reference (same layer structure; conv operands cast to bf16 to
# mirror the kernel's bf16-operand / f32-accumulate precision).
# ----------------------------------------------------------------------------
def ref_layer(x, layer, groups, *, stride, prelu):
    k = layer['w'].shape[-1]
    p = k // 2
    w_hwio = jnp.transpose(layer['w'], (2, 3, 1, 0))
    w_hwio = w_hwio.astype(jnp.bfloat16).astype(jnp.float32)
    xc = x.astype(jnp.bfloat16).astype(jnp.float32)
    y = lax.conv_general_dilated(
        xc, w_hwio, (stride, stride), [(p, p), (p, p)],
        dimension_numbers=('NHWC', 'HWIO', 'NHWC'),
        feature_group_count=groups, precision=lax.Precision.HIGHEST)
    scale, bias = fold_bn(layer['gamma'], layer['beta'],
                          layer['mean'], layer['var'])
    y = y * scale + bias
    if prelu:
        y = jnp.where(y >= 0, y, layer['alpha'] * y)
    return y


def head_setting_ref(x, params, groups):
    sh = ref_layer(x, params['s1'], groups, stride=2, prelu=True)
    sh = ref_layer(sh, params['s2'], groups, stride=1, prelu=False)
    b = ref_layer(x, params['b1'], groups, stride=2, prelu=True)
    b = ref_layer(b, params['b2'], groups, stride=1, prelu=True)
    b = ref_layer(b, params['b3'], groups, stride=1, prelu=True)
    b = ref_layer(b, params['b4'], groups, stride=1, prelu=False)
    return sh + b


if __name__ == "__main__":
    key = jax.random.PRNGKey(0)
    N, H, W, C = 2, 16, 16, 16          # small shapes; in_channels=16, NHWC
    S = 8
    groups = C // S                      # = 2

    kx, *lkeys = jax.random.split(key, 7)
    x = jax.random.normal(kx, (N, H, W, C), jnp.float32)

    layer_ks = {'b1': 3, 'b2': 1, 'b3': 3, 'b4': 1, 's1': 3, 's2': 1}
    params = {name: init_layer(lk, C, C, layer_ks[name], groups)
              for name, lk in zip(layer_ks, lkeys)}

    packed = pack_head_params(params, groups)
    out = head_setting_forward(x, packed)
    out = jax.block_until_ready(out)

    ref = head_setting_ref(x, params, groups)
    np.testing.assert_allclose(np.asarray(out), np.asarray(ref),
                               rtol=2e-2, atol=2e-2)
    print("KERNEL_OK")
</pallas_src>

<mosaic_0001>
module attributes {stable_mosaic.version = 11 : i64} {
  func.func @_head_kernel(%arg0: i32, %arg1: memref<1x8x8x1152xbf16, #tpu.memory_space<vmem>>, %arg2: memref<1152x256xbf16, #tpu.memory_space<vmem>>, %arg3: memref<128x128xbf16, #tpu.memory_space<vmem>>, %arg4: memref<128x128xbf16, #tpu.memory_space<vmem>>, %arg5: memref<1152x128xbf16, #tpu.memory_space<vmem>>, %arg6: memref<128x128xbf16, #tpu.memory_space<vmem>>, %arg7: memref<15x256xf32, #tpu.memory_space<vmem>>, %arg8: memref<1x8x8x128xf32, #tpu.memory_space<vmem>>, %arg9: memref<1x10x10x128xbf16, #tpu.memory_space<vmem>>) attributes {dimension_semantics = [#tpu.dimension_semantics<parallel>], iteration_bounds = array<i64: 2>, scalar_prefetch = 0 : i64, scratch_operands = 1 : i64, tpu.core_type = #tpu.core_type<tc>, window_params = [{transform_indices = @transform_0, window_bounds = array<i64: 1, 8, 8, 1152>}, {pipeline_mode = #tpu.pipeline_mode<synchronous>, transform_indices = @transform_1, window_bounds = array<i64: 1152, 256>}, {pipeline_mode = #tpu.pipeline_mode<synchronous>, transform_indices = @transform_2, window_bounds = array<i64: 128, 128>}, {pipeline_mode = #tpu.pipeline_mode<synchronous>, transform_indices = @transform_3, window_bounds = array<i64: 128, 128>}, {pipeline_mode = #tpu.pipeline_mode<synchronous>, transform_indices = @transform_4, window_bounds = array<i64: 1152, 128>}, {pipeline_mode = #tpu.pipeline_mode<synchronous>, transform_indices = @transform_5, window_bounds = array<i64: 128, 128>}, {pipeline_mode = #tpu.pipeline_mode<synchronous>, transform_indices = @transform_6, window_bounds = array<i64: 15, 256>}, {transform_indices = @transform_7, window_bounds = array<i64: 1, 8, 8, 128>}]} {
    %c0 = arith.constant 0 : index
    %c0_0 = arith.constant 0 : index
    %c0_1 = arith.constant 0 : index
    %c0_2 = arith.constant 0 : index
    %0 = vector.load %arg1[%c0, %c0_0, %c0_1, %c0_2] : memref<1x8x8x1152xbf16, #tpu.memory_space<vmem>>, vector<1x8x8x1152xbf16>
    %1 = vector.shape_cast %0 : vector<1x8x8x1152xbf16> to vector<64x1152xbf16>
    %c0_3 = arith.constant 0 : index
    %c0_4 = arith.constant 0 : index
    %2 = vector.load %arg2[%c0_3, %c0_4] : memref<1152x256xbf16, #tpu.memory_space<vmem>>, vector<1152x256xbf16>
    %cst = arith.constant dense<0.000000e+00> : vector<64x256xf32>
    %3 = tpu.matmul %1, %2, %cst {dimension_numbers = #tpu.dot_dimension_numbers<[1], [0], [0], [1], [0, 0, 1, 1], [], []>} : vector<64x1152xbf16>, vector<1152x256xbf16>, vector<64x256xf32> -> vector<64x256xf32>
    %c0_5 = arith.constant 0 : index
    %c0_6 = arith.constant 0 : index
    %4 = vector.load %arg7[%c0_5, %c0_6] : memref<15x256xf32, #tpu.memory_space<vmem>>, vector<1x256xf32>
    %c1 = arith.constant 1 : index
    %c0_7 = arith.constant 0 : index
    %5 = vector.load %arg7[%c1, %c0_7] : memref<15x256xf32, #tpu.memory_space<vmem>>, vector<1x256xf32>
    %6 = vector.broadcast %4 : vector<1x256xf32> to vector<64x256xf32>
    %7 = arith.mulf %3, %6 : vector<64x256xf32>
    %8 = vector.broadcast %5 : vector<1x256xf32> to vector<64x256xf32>
    %9 = arith.addf %7, %8 : vector<64x256xf32>
    %c2 = arith.constant 2 : index
    %c0_8 = arith.constant 0 : index
    %10 = vector.load %arg7[%c2, %c0_8] : memref<15x256xf32, #tpu.memory_space<vmem>>, vector<1x256xf32>
    %cst_9 = arith.constant 0.000000e+00 : f32
    %11 = vector.broadcast %cst_9 : f32 to vector<64x256xf32>
    %12 = arith.cmpf oge, %9, %11 : vector<64x256xf32>
    %13 = vector.broadcast %10 : vector<1x256xf32> to vector<64x256xf32>
    %14 = arith.mulf %9, %13 : vector<64x256xf32>
    %15 = arith.select %12, %9, %14 : vector<64x256xi1>, vector<64x256xf32>
    %16 = vector.extract_strided_slice %15 {offsets = [0, 0], sizes = [64, 128], strides = [1, 1]} : vector<64x256xf32> to vector<64x128xf32>
    %17 = vector.extract_strided_slice %15 {offsets = [0, 128], sizes = [64, 128], strides = [1, 1]} : vector<64x256xf32> to vector<64x128xf32>
    %18 = arith.truncf %16 : vector<64x128xf32> to vector<64x128xbf16>
    %c0_10 = arith.constant 0 : index
    %c0_11 = arith.constant 0 : index
    %19 = vector.load %arg3[%c0_10, %c0_11] : memref<128x128xbf16, #tpu.memory_space<vmem>>, vector<128x128xbf16>
    %cst_12 = arith.constant dense<0.000000e+00> : vector<64x128xf32>
    %20 = tpu.matmul %18, %19, %cst_12 {dimension_numbers = #tpu.dot_dimension_numbers<[1], [0], [0], [1], [0, 0, 1, 1], [], []>} : vector<64x128xbf16>, vector<128x128xbf16>, vector<64x128xf32> -> vector<64x128xf32>
    %c3 = arith.constant 3 : index
    %c0_13 = arith.constant 0 : index
    %21 = vector.load %arg7[%c3, %c0_13] : memref<15x256xf32, #tpu.memory_space<vmem>>, vector<1x128xf32>
    %c4 = arith.constant 4 : index
    %c0_14 = arith.constant 0 : index
    %22 = vector.load %arg7[%c4, %c0_14] : memref<15x256xf32, #tpu.memory_space<vmem>>, vector<1x128xf32>
    %23 = vector.broadcast %21 : vector<1x128xf32> to vector<64x128xf32>
    %24 = arith.mulf %20, %23 : vector<64x128xf32>
    %25 = vector.broadcast %22 : vector<1x128xf32> to vector<64x128xf32>
    %26 = arith.addf %24, %25 : vector<64x128xf32>
    %27 = arith.truncf %17 : vector<64x128xf32> to vector<64x128xbf16>
    %c0_15 = arith.constant 0 : index
    %c0_16 = arith.constant 0 : index
    %28 = vector.load %arg4[%c0_15, %c0_16] : memref<128x128xbf16, #tpu.memory_space<vmem>>, vector<128x128xbf16>
    %cst_17 = arith.constant dense<0.000000e+00> : vector<64x128xf32>
    %29 = tpu.matmul %27, %28, %cst_17 {dimension_numbers = #tpu.dot_dimension_numbers<[1], [0], [0], [1], [0, 0, 1, 1], [], []>} : vector<64x128xbf16>, vector<128x128xbf16>, vector<64x128xf32> -> vector<64x128xf32>
    %c6 = arith.constant 6 : index
    %c0_18 = arith.constant 0 : index
    %30 = vector.load %arg7[%c6, %c0_18] : memref<15x256xf32, #tpu.memory_space<vmem>>, vector<1x128xf32>
    %c7 = arith.constant 7 : index
    %c0_19 = arith.constant 0 : index
    %31 = vector.load %arg7[%c7, %c0_19] : memref<15x256xf32, #tpu.memory_space<vmem>>, vector<1x128xf32>
    %32 = vector.broadcast %30 : vector<1x128xf32> to vector<64x128xf32>
    %33 = arith.mulf %29, %32 : vector<64x128xf32>
    %34 = vector.broadcast %31 : vector<1x128xf32> to vector<64x128xf32>
    %35 = arith.addf %33, %34 : vector<64x128xf32>
    %c8 = arith.constant 8 : index
    %c0_20 = arith.constant 0 : index
    %36 = vector.load %arg7[%c8, %c0_20] : memref<15x256xf32, #tpu.memory_space<vmem>>, vector<1x128xf32>
    %cst_21 = arith.constant 0.000000e+00 : f32
    %37 = vector.broadcast %cst_21 : f32 to vector<64x128xf32>
    %38 = arith.cmpf oge, %35, %37 : vector<64x128xf32>
    %39 = vector.broadcast %36 : vector<1x128xf32> to vector<64x128xf32>
    %40 = arith.mulf %35, %39 : vector<64x128xf32>
    %41 = arith.select %38, %35, %40 : vector<64x128xi1>, vector<64x128xf32>
    %cst_22 = arith.constant 0.000000e+00 : bf16
    %42 = vector.broadcast %cst_22 : bf16 to vector<1x1x10x128xbf16>
    %cst_23 = arith.constant 0.000000e+00 : bf16
    %43 = vector.broadcast %cst_23 : bf16 to vector<1x8x1x128xbf16>
    %c0_24 = arith.constant 0 : index
    %c0_25 = arith.constant 0 : index
    %c0_26 = arith.constant 0 : index
    %c0_27 = arith.constant 0 : index
    %44 = vector.load %arg9[%c0_24, %c0_25, %c0_26, %c0_27] : memref<1x10x10x128xbf16, #tpu.memory_space<vmem>>, vector<1x1x10x128xbf16>
    tpu.vector_store %arg9[%c0_24, %c0_25, %c0_26, %c0_27], %42 {strides = array<i32>} : memref<1x10x10x128xbf16, #tpu.memory_space<vmem>>, vector<1x1x10x128xbf16>,
    %c0_28 = arith.constant 0 : index
    %c9 = arith.constant 9 : index
    %c0_29 = arith.constant 0 : index
    %c0_30 = arith.constant 0 : index
    %45 = vector.load %arg9[%c0_28, %c9, %c0_29, %c0_30] : memref<1x10x10x128xbf16, #tpu.memory_space<vmem>>, vector<1x1x10x128xbf16>
    tpu.vector_store %arg9[%c0_28, %c9, %c0_29, %c0_30], %42 {strides = array<i32>} : memref<1x10x10x128xbf16, #tpu.memory_space<vmem>>, vector<1x1x10x128xbf16>,
    %c0_31 = arith.constant 0 : index
    %c1_32 = arith.constant 1 : index
    %c0_33 = arith.constant 0 : index
    %c0_34 = arith.constant 0 : index
    %46 = vector.load %arg9[%c0_31, %c1_32, %c0_33, %c0_34] : memref<1x10x10x128xbf16, #tpu.memory_space<vmem>>, vector<1x8x1x128xbf16>
    tpu.vector_store %arg9[%c0_31, %c1_32, %c0_33, %c0_34], %43 {strides = array<i32>} : memref<1x10x10x128xbf16, #tpu.memory_space<vmem>>, vector<1x8x1x128xbf16>,
    %c0_35 = arith.constant 0 : index
    %c1_36 = arith.constant 1 : index
    %c9_37 = arith.constant 9 : index
    %c0_38 = arith.constant 0 : index
    %47 = vector.load %arg9[%c0_35, %c1_36, %c9_37, %c0_38] : memref<1x10x10x128xbf16, #tpu.memory_space<vmem>>, vector<1x8x1x128xbf16>
    tpu.vector_store %arg9[%c0_35, %c1_36, %c9_37, %c0_38], %43 {strides = array<i32>} : memref<1x10x10x128xbf16, #tpu.memory_space<vmem>>, vector<1x8x1x128xbf16>,
    %48 = vector.shape_cast %41 : vector<64x128xf32> to vector<1x8x8x128xf32>
    %49 = arith.truncf %48 : vector<1x8x8x128xf32> to vector<1x8x8x128xbf16>
    %c0_39 = arith.constant 0 : index
    %c1_40 = arith.constant 1 : index
    %c1_41 = arith.constant 1 : index
    %c0_42 = arith.constant 0 : index
    %50 = vector.load %arg9[%c0_39, %c1_40, %c1_41, %c0_42] : memref<1x10x10x128xbf16, #tpu.memory_space<vmem>>, vector<1x8x8x128xbf16>
    tpu.vector_store %arg9[%c0_39, %c1_40, %c1_41, %c0_42], %49 {strides = array<i32>} : memref<1x10x10x128xbf16, #tpu.memory_space<vmem>>, vector<1x8x8x128xbf16>,
    %c0_43 = arith.constant 0 : index
    %c0_44 = arith.constant 0 : index
    %c0_45 = arith.constant 0 : index
    %c0_46 = arith.constant 0 : index
    %51 = vector.load %arg9[%c0_43, %c0_44, %c0_45, %c0_46] : memref<1x10x10x128xbf16, #tpu.memory_space<vmem>>, vector<1x8x8x128xbf16>
    %52 = vector.shape_cast %51 : vector<1x8x8x128xbf16> to vector<64x128xbf16>
    %c0_47 = arith.constant 0 : index
    %c0_48 = arith.constant 0 : index
    %c1_49 = arith.constant 1 : index
    %c0_50 = arith.constant 0 : index
    %53 = vector.load %arg9[%c0_47, %c0_48, %c1_49, %c0_50] : memref<1x10x10x128xbf16, #tpu.memory_space<vmem>>, vector<1x8x8x128xbf16>
    %54 = vector.shape_cast %53 : vector<1x8x8x128xbf16> to vector<64x128xbf16>
    %c0_51 = arith.constant 0 : index
    %c0_52 = arith.constant 0 : index
    %c2_53 = arith.constant 2 : index
    %c0_54 = arith.constant 0 : index
    %55 = vector.load %arg9[%c0_51, %c0_52, %c2_53, %c0_54] : memref<1x10x10x128xbf16, #tpu.memory_space<vmem>>, vector<1x8x8x128xbf16>
    %56 = vector.shape_cast %55 : vector<1x8x8x128xbf16> to vector<64x128xbf16>
    %c0_55 = arith.constant 0 : index
    %c1_56 = arith.constant 1 : index
    %c0_57 = arith.constant 0 : index
    %c0_58 = arith.constant 0 : index
    %57 = vector.load %arg9[%c0_55, %c1_56, %c0_57, %c0_58] : memref<1x10x10x128xbf16, #tpu.memory_space<vmem>>, vector<1x8x8x128xbf16>
    %58 = vector.shape_cast %57 : vector<1x8x8x128xbf16> to vector<64x128xbf16>
    %c0_59 = arith.constant 0 : index
    %c1_60 = arith.constant 1 : index
    %c1_61 = arith.constant 1 : index
    %c0_62 = arith.constant 0 : index
    %59 = vector.load %arg9[%c0_59, %c1_60, %c1_61, %c0_62] : memref<1x10x10x128xbf16, #tpu.memory_space<vmem>>, vector<1x8x8x128xbf16>
    %60 = vector.shape_cast %59 : vector<1x8x8x128xbf16> to vector<64x128xbf16>
    %c0_63 = arith.constant 0 : index
    %c1_64 = arith.constant 1 : index
    %c2_65 = arith.constant 2 : index
    %c0_66 = arith.constant 0 : index
    %61 = vector.load %arg9[%c0_63, %c1_64, %c2_65, %c0_66] : memref<1x10x10x128xbf16, #tpu.memory_space<vmem>>, vector<1x8x8x128xbf16>
    %62 = vector.shape_cast %61 : vector<1x8x8x128xbf16> to vector<64x128xbf16>
    %c0_67 = arith.constant 0 : index
    %c2_68 = arith.constant 2 : index
    %c0_69 = arith.constant 0 : index
    %c0_70 = arith.constant 0 : index
    %63 = vector.load %arg9[%c0_67, %c2_68, %c0_69, %c0_70] : memref<1x10x10x128xbf16, #tpu.memory_space<vmem>>, vector<1x8x8x128xbf16>
    %64 = vector.shape_cast %63 : vector<1x8x8x128xbf16> to vector<64x128xbf16>
    %c0_71 = arith.constant 0 : index
    %c2_72 = arith.constant 2 : index
    %c1_73 = arith.constant 1 : index
    %c0_74 = arith.constant 0 : index
    %65 = vector.load %arg9[%c0_71, %c2_72, %c1_73, %c0_74] : memref<1x10x10x128xbf16, #tpu.memory_space<vmem>>, vector<1x8x8x128xbf16>
    %66 = vector.shape_cast %65 : vector<1x8x8x128xbf16> to vector<64x128xbf16>
    %c0_75 = arith.constant 0 : index
    %c2_76 = arith.constant 2 : index
    %c2_77 = arith.constant 2 : index
    %c0_78 = arith.constant 0 : index
    %67 = vector.load %arg9[%c0_75, %c2_76, %c2_77, %c0_78] : memref<1x10x10x128xbf16, #tpu.memory_space<vmem>>, vector<1x8x8x128xbf16>
    %68 = vector.shape_cast %67 : vector<1x8x8x128xbf16> to vector<64x128xbf16>
    %69 = tpu.concatenate %52, %54, %56, %58, %60, %62, %64, %66, %68 in 1 : vector<64x128xbf16>, vector<64x128xbf16>, vector<64x128xbf16>, vector<64x128xbf16>, vector<64x128xbf16>, vector<64x128xbf16>, vector<64x128xbf16>, vector<64x128xbf16>, vector<64x128xbf16> -> vector<64x1152xbf16>
    %c0_79 = arith.constant 0 : index
    %c0_80 = arith.constant 0 : index
    %70 = vector.load %arg5[%c0_79, %c0_80] : memref<1152x128xbf16, #tpu.memory_space<vmem>>, vector<1152x128xbf16>
    %cst_81 = arith.constant dense<0.000000e+00> : vector<64x128xf32>
    %71 = tpu.matmul %69, %70, %cst_81 {dimension_numbers = #tpu.dot_dimension_numbers<[1], [0], [0], [1], [0, 0, 1, 1], [], []>} : vector<64x1152xbf16>, vector<1152x128xbf16>, vector<64x128xf32> -> vector<64x128xf32>
    %c9_82 = arith.constant 9 : index
    %c0_83 = arith.constant 0 : index
    %72 = vector.load %arg7[%c9_82, %c0_83] : memref<15x256xf32, #tpu.memory_space<vmem>>, vector<1x128xf32>
    %c10 = arith.constant 10 : index
    %c0_84 = arith.constant 0 : index
    %73 = vector.load %arg7[%c10, %c0_84] : memref<15x256xf32, #tpu.memory_space<vmem>>, vector<1x128xf32>
    %74 = vector.broadcast %72 : vector<1x128xf32> to vector<64x128xf32>
    %75 = arith.mulf %71, %74 : vector<64x128xf32>
    %76 = vector.broadcast %73 : vector<1x128xf32> to vector<64x128xf32>
    %77 = arith.addf %75, %76 : vector<64x128xf32>
    %c11 = arith.constant 11 : index
    %c0_85 = arith.constant 0 : index
    %78 = vector.load %arg7[%c11, %c0_85] : memref<15x256xf32, #tpu.memory_space<vmem>>, vector<1x128xf32>
    %cst_86 = arith.constant 0.000000e+00 : f32
    %79 = vector.broadcast %cst_86 : f32 to vector<64x128xf32>
    %80 = arith.cmpf oge, %77, %79 : vector<64x128xf32>
    %81 = vector.broadcast %78 : vector<1x128xf32> to vector<64x128xf32>
    %82 = arith.mulf %77, %81 : vector<64x128xf32>
    %83 = arith.select %80, %77, %82 : vector<64x128xi1>, vector<64x128xf32>
    %84 = arith.truncf %83 : vector<64x128xf32> to vector<64x128xbf16>
    %c0_87 = arith.constant 0 : index
    %c0_88 = arith.constant 0 : index
    %85 = vector.load %arg6[%c0_87, %c0_88] : memref<128x128xbf16, #tpu.memory_space<vmem>>, vector<128x128xbf16>
    %cst_89 = arith.constant dense<0.000000e+00> : vector<64x128xf32>
    %86 = tpu.matmul %84, %85, %cst_89 {dimension_numbers = #tpu.dot_dimension_numbers<[1], [0], [0], [1], [0, 0, 1, 1], [], []>} : vector<64x128xbf16>, vector<128x128xbf16>, vector<64x128xf32> -> vector<64x128xf32>
    %c12 = arith.constant 12 : index
    %c0_90 = arith.constant 0 : index
    %87 = vector.load %arg7[%c12, %c0_90] : memref<15x256xf32, #tpu.memory_space<vmem>>, vector<1x128xf32>
    %c13 = arith.constant 13 : index
    %c0_91 = arith.constant 0 : index
    %88 = vector.load %arg7[%c13, %c0_91] : memref<15x256xf32, #tpu.memory_space<vmem>>, vector<1x128xf32>
    %89 = vector.broadcast %87 : vector<1x128xf32> to vector<64x128xf32>
    %90 = arith.mulf %86, %89 : vector<64x128xf32>
    %91 = vector.broadcast %88 : vector<1x128xf32> to vector<64x128xf32>
    %92 = arith.addf %90, %91 : vector<64x128xf32>
    %93 = arith.addf %26, %92 : vector<64x128xf32>
    %94 = vector.shape_cast %93 : vector<64x128xf32> to vector<1x8x8x128xf32>
    %c0_92 = arith.constant 0 : index
    %c0_93 = arith.constant 0 : index
    %c0_94 = arith.constant 0 : index
    %c0_95 = arith.constant 0 : index
    %95 = vector.load %arg8[%c0_92, %c0_93, %c0_94, %c0_95] : memref<1x8x8x128xf32, #tpu.memory_space<vmem>>, vector<1x8x8x128xf32>
    tpu.vector_store %arg8[%c0_92, %c0_93, %c0_94, %c0_95], %94 {strides = array<i32>} : memref<1x8x8x128xf32, #tpu.memory_space<vmem>>, vector<1x8x8x128xf32>,
    return
  }
  func.func @transform_0(%arg0: i32) -> (i32, i32, i32, i32) {
    %c0_i32 = arith.constant 0 : i32
    %c0_i32_0 = arith.constant 0 : i32
    %c0_i32_1 = arith.constant 0 : i32
    %c0_i32_2 = arith.constant 0 : i32
    return %arg0, %c0_i32, %c0_i32_0, %c0_i32_1 : i32, i32, i32, i32
  }
  func.func @transform_1(%arg0: i32) -> (i32, i32) {
    %c0_i32 = arith.constant 0 : i32
    %c0_i32_0 = arith.constant 0 : i32
    %c0_i32_1 = arith.constant 0 : i32
    return %c0_i32, %c0_i32_0 : i32, i32
  }
  func.func @transform_2(%arg0: i32) -> (i32, i32) {
    %c0_i32 = arith.constant 0 : i32
    %c0_i32_0 = arith.constant 0 : i32
    %c0_i32_1 = arith.constant 0 : i32
    return %c0_i32, %c0_i32_0 : i32, i32
  }
  func.func @transform_3(%arg0: i32) -> (i32, i32) {
    %c0_i32 = arith.constant 0 : i32
    %c0_i32_0 = arith.constant 0 : i32
    %c0_i32_1 = arith.constant 0 : i32
    return %c0_i32, %c0_i32_0 : i32, i32
  }
  func.func @transform_4(%arg0: i32) -> (i32, i32) {
    %c0_i32 = arith.constant 0 : i32
    %c0_i32_0 = arith.constant 0 : i32
    %c0_i32_1 = arith.constant 0 : i32
    return %c0_i32, %c0_i32_0 : i32, i32
  }
  func.func @transform_5(%arg0: i32) -> (i32, i32) {
    %c0_i32 = arith.constant 0 : i32
    %c0_i32_0 = arith.constant 0 : i32
    %c0_i32_1 = arith.constant 0 : i32
    return %c0_i32, %c0_i32_0 : i32, i32
  }
  func.func @transform_6(%arg0: i32) -> (i32, i32) {
    %c0_i32 = arith.constant 0 : i32
    %c0_i32_0 = arith.constant 0 : i32
    %c0_i32_1 = arith.constant 0 : i32
    return %c0_i32, %c0_i32_0 : i32, i32
  }
  func.func @transform_7(%arg0: i32) -> (i32, i32, i32, i32) {
    %c0_i32 = arith.constant 0 : i32
    %c0_i32_0 = arith.constant 0 : i32
    %c0_i32_1 = arith.constant 0 : i32
    %c0_i32_2 = arith.constant 0 : i32
    return %arg0, %c0_i32, %c0_i32_0, %c0_i32_1 : i32, i32, i32, i32
  }
}

</mosaic_0001>

<bundles_post_ra>
// kernel: head_setting_forward.1
= control target key start
LH: loop header
LB: loop body
LE: loop exit
PB: predicated region body
PF: predicated region fallthrough
CT: control target
= control target key end

     0   :  { %12 = vsyncpa [#allocation4], 0  ;;  %s7078_s0 = inlined_call_operand.vmem [shape: bf16[2,8,8,1152], index: 0, kind: input, shape index: {}]   ;;  %s7079_s1 = inlined_call_operand.vmem [shape: bf16[1152,256], index: 1, kind: input, shape index: {}]   ;;  %s7080_s2 = inlined_call_operand.vmem [shape: bf16[128,128], index: 2, kind: input, shape index: {}]   ;;  %s7081_s3 = inlined_call_operand.vmem [shape: bf16[128,128], index: 3, kind: input, shape index: {}]   ;;  %s7082_s4 = inlined_call_operand.vmem [shape: bf16[1152,128], index: 4, kind: input, shape index: {}]   ;;  %s7083_s5 = inlined_call_operand.vmem [shape: bf16[128,128], index: 5, kind: input, shape index: {}]   ;;  %s7084_s6 = inlined_call_operand.vmem [shape: f32[15,256], index: 6, kind: input, shape index: {}]   ;;  %s7085_s7 = inlined_call_operand.hbm [shape: f32[2,8,8,128], index: 7, kind: output, shape index: {}]  }
   0x1   :  { %14 = vsyncpa [#allocation4 + $0x1], 0  ;;  %s5588_s24 = smov 0   ;;  %s5590_s25 = smov 0  }
   0x2   :  { %s5592_s26 = smov 0   ;;  %s5594_s27 = smov 0  }
   0x3 LB: > { %s5609_s28 = sadd.s32 4294967295, %s5542_s27   ;;  %s4311_s29 = sadd.s32 4294967294, %s5542_s27   ;;  %s5542_s27 = sphi %s5594_s27, %s7101_s27   ;;  %s5538_s26 = sphi %s5592_s26, %s7100_s26   ;;  %s5534_s25 = sphi %s5590_s25, %s7099_s25   ;;  %s5530_s24 = sphi %s5588_s24, %s7098_s24  }
   0x4   : > { %s5613_s30 = sadd.s32 1, %s5542_s27   ;;  %s179_s8 = sadd.s32 1, %s5538_s26 }
   0x5   : > { %s176_s9 = ssub.s32 %s5542_s27, %s5613_s30  ;;  %p189_p0 = scmp.ne.s32.totalorder %s5538_s26, %s5534_s25 }
   0x6   : > { %p177_p1 = scmp.eq.s32.totalorder %s176_s9, 0  ;;  %p190_p2 = scmp.eq.s32.totalorder %s5609_s28, 1 }
   0x7   : > { %p195_p3 = scmp.ne.s32.totalorder %s5534_s25, %s5530_s24  ;;  %p196_p4 = scmp.eq.s32.totalorder %s4311_s29, 1 }
   0x8   : > { %s5624_s10 = scalar_select %p177_p1, %s5538_s26, %s179_s8  }
   0x9   : > { %p5626_p5 = por %p190_p2, %p189_p0  ;;  %p5630_p6 = por %p196_p4, %p195_p3 }
   0xa   : > { %p4314_p7 = scmp.ge.s32.totalorder %s5542_s27, 1  ;;  %p240_p8 = scmp.lt.s32.totalorder %s5542_s27, 3 }
   0xc   : > { %p241_p9 = pnand %p4314_p7, %p240_p8 }
   0xd   : > { %v5104_v0 = vld [vmem:[%s7079_s1 + $0x4] ss:$8 sps:$4 sm:$0xff] (!%p241_p9)   ;;  %v5106_v1 = vld [vmem:[%s7079_s1] ss:$8 sps:$4 sm:$0xff] (!%p241_p9)   ;;  %v5107_v2 = vld [vmem:[%s7079_s1 + $0x14] ss:$8 sps:$4 sm:$0xff] (!%p241_p9)  }
   0xe   : > { %244 = sbr.rel (%p241_p9) target bundleno = 1386 (0x56a), region = 48  ;;  %1366 = vmatprep.subr.bf16.mxu0 (!%p241_p9), %v5104_v0  ;;  %v5109_v3 = vld [vmem:[%s7079_s1 + $0x10] ss:$8 sps:$4 sm:$0xff] (!%p241_p9)   ;;  %v5110_v4 = vld [vmem:[%s7079_s1 + $0x24] ss:$8 sps:$4 sm:$0xff] (!%p241_p9)   ;;  %p272_p10 = scmp.lt.s32.totalorder (!%p241_p9), %s5609_s28, 1 }
   0xf   : > { %1367 = vmatpush1.bf16.msra.mxu0 (!%p241_p9), %v5106_v1  ;;  %v5112_v5 = vld [vmem:[%s7079_s1 + $0x20] ss:$8 sps:$4 sm:$0xff] (!%p241_p9)   ;;  %v5113_v6 = vld [vmem:[%s7079_s1 + $0x34] ss:$8 sps:$4 sm:$0xff] (!%p241_p9)   ;;  %v5115_v7 = vld [vmem:[%s7079_s1 + $0x30] ss:$8 sps:$4 sm:$0xff] (!%p241_p9)  }
  0x10   : > { %1368 = vmatprep.subr.bf16.mxu0 (!%p241_p9), %v5107_v2  ;;  %v5116_v8 = vld [vmem:[%s7079_s1 + $0x44] ss:$8 sps:$4 sm:$0xff] (!%p241_p9)   ;;  %v5118_v9 = vld [vmem:[%s7079_s1 + $0x40] ss:$8 sps:$4 sm:$0xff] (!%p241_p9)   ;;  %v5119_v10 = vld [vmem:[%s7079_s1 + $0x54] ss:$8 sps:$4 sm:$0xff] (!%p241_p9)  }
  0x11   : > { %v5121_v11 = vld [vmem:[%s7079_s1 + $0x50] ss:$8 sps:$4 sm:$0xff] (!%p241_p9)   ;;  %v5122_v12 = vld [vmem:[%s7079_s1 + $0x64] ss:$8 sps:$4 sm:$0xff] (!%p241_p9)   ;;  %v5124_v14 = vld [vmem:[%s7079_s1 + $0x60] ss:$8 sps:$4 sm:$0xff] (!%p241_p9)  }
  0x12   : > { %v5125_v15 = vld [vmem:[%s7079_s1 + $0x74] ss:$8 sps:$4 sm:$0xff] (!%p241_p9)   ;;  %v5127_v16 = vld [vmem:[%s7079_s1 + $0x70] ss:$8 sps:$4 sm:$0xff] (!%p241_p9)   ;;  %v5128_v17 = vld [vmem:[%s7079_s1 + $0x84] ss:$8 sps:$4 sm:$0xff] (!%p241_p9)  }
  0x13   : > { %1369 = vmatpush1.bf16.msra.mxu0 (!%p241_p9), %v5109_v3  ;;  %v5130_v18 = vld [vmem:[%s7079_s1 + $0x80] ss:$8 sps:$4 sm:$0xff] (!%p241_p9)   ;;  %v5131_v19 = vld [vmem:[%s7079_s1 + $0x94] ss:$8 sps:$4 sm:$0xff] (!%p241_p9)   ;;  %v5133_v20 = vld [vmem:[%s7079_s1 + $0x90] ss:$8 sps:$4 sm:$0xff] (!%p241_p9)  }
  0x14   : > { %1370 = vmatprep.subr.bf16.mxu0 (!%p241_p9), %v5110_v4  ;;  %v5134_v21 = vld [vmem:[%s7079_s1 + $0xa4] ss:$8 sps:$4 sm:$0xff] (!%p241_p9)   ;;  %v5136_v22 = vld [vmem:[%s7079_s1 + $0xa0] ss:$8 sps:$4 sm:$0xff] (!%p241_p9)   ;;  %v5137_v23 = vld [vmem:[%s7079_s1 + $0xb4] ss:$8 sps:$4 sm:$0xff] (!%p241_p9)  }
  0x15   : > { %s273_s15 = scalar_select %p272_p10, %s5609_s28, 1  ;;  %v5139_v24 = vld [vmem:[%s7079_s1 + $0xb0] ss:$8 sps:$4 sm:$0xff]   ;;  %v5140_v25 = vld [vmem:[%s7079_s1 + $0xc4] ss:$8 sps:$4 sm:$0xff]  }
  0x16   : > { %v5142_v26 = vld [vmem:[%s7079_s1 + $0xc0] ss:$8 sps:$4 sm:$0xff]   ;;  %v5143_v27 = vld [vmem:[%s7079_s1 + $0xd4] ss:$8 sps:$4 sm:$0xff]   ;;  %v5145_v28 = vld [vmem:[%s7079_s1 + $0xd0] ss:$8 sps:$4 sm:$0xff]  }
  0x17   : > { %1371 = vmatpush1.bf16.msra.mxu0 %v5112_v5  ;;  %s5061_s20 = smul.u32 288, %s273_s15  ;;  %v5146_v29 = vld [vmem:[%s7079_s1 + $0xe4] ss:$8 sps:$4 sm:$0xff]   ;;  %v5148_v30 = vld [vmem:[%s7079_s1 + $0xe0] ss:$8 sps:$4 sm:$0xff]   ;;  %s4676_s16 = sshll.u32 %s5609_s28, 10 }
  0x18   : > { %1372 = vmatprep.subr.bf16.mxu0 %v5113_v6  ;;  %v5149_v31 = vld [vmem:[%s7079_s1 + $0xf4] ss:$8 sps:$4 sm:$0xff]   ;;  %v5151_v32 = vld [vmem:[%s7079_s1 + $0xf0] ss:$8 sps:$4 sm:$0xff]   ;;  %v5157_v33 = vld [vmem:[%s7079_s1 + $0x104] ss:$8 sps:$4 sm:$0xff]   ;;  %s7028_s19 = scalar_lea.hbm %s7085_s7, %s4676_s16 }
  0x19   : > { %s5677_s13 = scalar_lea.vmem %s7078_s0, %s5061_s20  ;;  %v5155_v35 = vld [vmem:[%s7079_s1 + $0x100] ss:$8 sps:$4 sm:$0xff]   ;;  %v5160_v37 = vld [vmem:[%s7079_s1 + $0x114] ss:$8 sps:$4 sm:$0xff]   ;;  %v5158_v38 = vld [vmem:[%s7079_s1 + $0x110] ss:$8 sps:$4 sm:$0xff]  }
  0x1a   : > { %v5154_v13 = vld [vmem:[%s5677_s13 + $0x4] ss:$36 sps:$4 sm:$0xff]   ;;  %v5185_v36 = vld [vmem:[%s5677_s13 + $0x4c] ss:$36 sps:$4 sm:$0xff]   ;;  %v5194_v42 = vld [vmem:[%s5677_s13 + $0x94] ss:$36 sps:$4 sm:$0xff]  }
  0x1b   : > { %1373 = vmatpush1.bf16.msra.mxu0 %v5115_v7  ;;  %1398 = vmatprep.mubr.bf16.mxu0 %v5154_v13  ;;  %v5152_v34 = vld [vmem:[%s5677_s13] ss:$36 sps:$4 sm:$0xff]   ;;  %v5190_v41 = vld [vmem:[%s5677_s13 + $0x48] ss:$36 sps:$4 sm:$0xff]   ;;  %v5166_v43 = vld [vmem:[%s7079_s1 + $0x134] ss:$8 sps:$4 sm:$0xff]  }
  0x1c   : > { %1374 = vmatprep.subr.bf16.mxu0 %v5116_v8  ;;  %v5163_v39 = vld [vmem:[%s7079_s1 + $0x124] ss:$8 sps:$4 sm:$0xff]   ;;  %v5161_v40 = vld [vmem:[%s7079_s1 + $0x120] ss:$8 sps:$4 sm:$0xff]   ;;  %v5164_v44 = vld [vmem:[%s7079_s1 + $0x130] ss:$8 sps:$4 sm:$0xff]  }
  0x1d   : > { %v5169_v45 = vld [vmem:[%s7079_s1 + $0x144] ss:$8 sps:$4 sm:$0xff]   ;;  %v5199_v46 = vld [vmem:[%s5677_s13 + $0x90] ss:$36 sps:$4 sm:$0xff]   ;;  %v5167_v47 = vld [vmem:[%s7079_s1 + $0x140] ss:$8 sps:$4 sm:$0xff]  }
  0x1e   : > { %v5203_v48 = vld [vmem:[%s5677_s13 + $0xdc] ss:$36 sps:$4 sm:$0xff]   ;;  %v5170_v50 = vld [vmem:[%s7079_s1 + $0x150] ss:$8 sps:$4 sm:$0xff]   ;;  %v5175_v51 = vld [vmem:[%s7079_s1 + $0x164] ss:$8 sps:$4 sm:$0xff]  }
  0x1f   : > { %1375 = vmatpush1.bf16.msra.mxu0 %v5118_v9  ;;  %v5172_v49 = vld [vmem:[%s7079_s1 + $0x154] ss:$8 sps:$4 sm:$0xff]   ;;  %v5173_v53 = vld [vmem:[%s7079_s1 + $0x160] ss:$8 sps:$4 sm:$0xff]   ;;  %v5214_v55 = vld [vmem:[%s5677_s13 + $0xc] ss:$36 sps:$4 sm:$0xff]  }
  0x20   : > { %1376 = vmatprep.subr.bf16.mxu0 %v5119_v10  ;;  %v5208_v52 = vld [vmem:[%s5677_s13 + $0xd8] ss:$36 sps:$4 sm:$0xff]   ;;  %v5181_v57 = vld [vmem:[%s7079_s1 + $0x184] ss:$8 sps:$4 sm:$0xff]   ;;  %v5301_v59 = vld [vmem:[%s7079_s1 + $0x400] ss:$8 sps:$4 sm:$0xff]  }
  0x21   : > { %v5178_v54 = vld [vmem:[%s7079_s1 + $0x174] ss:$8 sps:$4 sm:$0xff]   ;;  %v5176_v56 = vld [vmem:[%s7079_s1 + $0x170] ss:$8 sps:$4 sm:$0xff]   ;;  %v5299_v58 = vld [vmem:[%s7079_s1 + $0x404] ss:$8 sps:$4 sm:$0xff]  }
  0x22   : > { %v5179_v60 = vld [vmem:[%s7079_s1 + $0x180] ss:$8 sps:$4 sm:$0xff]   ;;  %v5184_v61 = vld [vmem:[%s7079_s1 + $0x194] ss:$8 sps:$4 sm:$0xff]   ;;  %1658 = vmatprep.subr.bf16.mxu1 %v5299_v58  ;;  %v5307_v63 = vld [vmem:[%s7079_s1 + $0x410] ss:$8 sps:$4 sm:$0xff]  }
  0x23   : > { %1377 = vmatpush1.bf16.msra.mxu0 %v5121_v11  ;;  %1659 = vmatpush1.bf16.msra.mxu1 %v5301_v59  ;;  %v5305_v62 = vld [vmem:[%s7079_s1 + $0x414] ss:$8 sps:$4 sm:$0xff]   ;;  %v5182_v0 = vld [vmem:[%s7079_s1 + $0x190] ss:$8 sps:$4 sm:$0xff]   ;;  %v5189_v1 = vld [vmem:[%s7079_s1 + $0x1a4] ss:$8 sps:$4 sm:$0xff]  }
  0x24   : > { %1378 = vmatprep.subr.bf16.mxu0 %v5122_v12  ;;  %1660 = vmatprep.subr.bf16.mxu1 %v5305_v62  ;;  %v5311_v2 = vld [vmem:[%s7079_s1 + $0x424] ss:$8 sps:$4 sm:$0xff]   ;;  %v5313_v3 = vld [vmem:[%s7079_s1 + $0x420] ss:$8 sps:$4 sm:$0xff]   ;;  %v5193_v5 = vld [vmem:[%s7079_s1 + $0x1b4] ss:$8 sps:$4 sm:$0xff]  }
  0x25   : > { %v5187_v4 = vld [vmem:[%s7079_s1 + $0x1a0] ss:$8 sps:$4 sm:$0xff]   ;;  %v5320_v6 = vld [vmem:[%s7079_s1 + $0x434] ss:$8 sps:$4 sm:$0xff]   ;;  %v5322_v7 = vld [vmem:[%s7079_s1 + $0x430] ss:$8 sps:$4 sm:$0xff]  }
  0x26   : > { %v5191_v8 = vld [vmem:[%s7079_s1 + $0x1b0] ss:$8 sps:$4 sm:$0xff]   ;;  %v5198_v9 = vld [vmem:[%s7079_s1 + $0x1c4] ss:$8 sps:$4 sm:$0xff]   ;;  %v5328_v11 = vld [vmem:[%s7079_s1 + $0x440] ss:$8 sps:$4 sm:$0xff]  }
  0x27   : > { %1379 = vmatpush1.bf16.msra.mxu0 %v5124_v14  ;;  %1661 = vmatpush1.bf16.msra.mxu1 %v5307_v63  ;;  %v5326_v10 = vld [vmem:[%s7079_s1 + $0x444] ss:$8 sps:$4 sm:$0xff]   ;;  %v5196_v12 = vld [vmem:[%s7079_s1 + $0x1c0] ss:$8 sps:$4 sm:$0xff]   ;;  %v5202_v13 = vld [vmem:[%s7079_s1 + $0x1d4] ss:$8 sps:$4 sm:$0xff]  }
  0x28   : > { %1380 = vmatprep.subr.bf16.mxu0 %v5125_v15  ;;  %1662 = vmatprep.subr.bf16.mxu1 %v5311_v2  ;;  %v5335_v14 = vld [vmem:[%s7079_s1 + $0x454] ss:$8 sps:$4 sm:$0xff]   ;;  %v5337_v15 = vld [vmem:[%s7079_s1 + $0x450] ss:$8 sps:$4 sm:$0xff]   ;;  %s269_s20 = sand.u32 1, %s5534_s25   ;;  %s5545_s22 = smov [#allocation3]  }
  0x29   : > { %v5244_v58 = vld [vmem:[%s7079_s1 + $0x294] ss:$8 sps:$4 sm:$0xff]   ;;  %v5242_v59 = vld [vmem:[%s7079_s1 + $0x290] ss:$8 sps:$4 sm:$0xff]   ;;  %s4315_s14 = sshll.u32 %s269_s20, 6  ;;  %s7037_s28 = scalar_lea.sflag [#allocation4], %s269_s20 }
  0x2a   : > { %v5253_v62 = vld [vmem:[%s7079_s1 + $0x2b4] ss:$8 sps:$4 sm:$0xff]   ;;  %v5251_v63 = vld [vmem:[%s7079_s1 + $0x2b0] ss:$8 sps:$4 sm:$0xff]   ;;  %s5484_s23 = sshll.u32 %s5545_s22, 4  ;;  %s5485_s23 = int_to_ptr.vmem [resolvable:$false] %s5484_s23 }
  0x2b   : > { %1381 = vmatpush1.bf16.msra.mxu0 %v5127_v16  ;;  %1663 = vmatpush1.bf16.msra.mxu1 %v5313_v3  ;;  %v5200_v16 = vld [vmem:[%s7079_s1 + $0x1d0] ss:$8 sps:$4 sm:$0xff]   ;;  %v5262_v2 = vld [vmem:[%s7079_s1 + $0x2d4] ss:$8 sps:$4 sm:$0xff]   ;;  %s5486_s29 = scalar_lea.vmem %s5485_s23, 2048 }
  0x2c   : > { %1382 = vmatprep.subr.bf16.mxu0 %v5128_v17  ;;  %1664 = vmatprep.subr.bf16.mxu1 %v5320_v6  ;;  %v5207_v17 = vld [vmem:[%s7079_s1 + $0x1e4] ss:$8 sps:$4 sm:$0xff]   ;;  %v5260_v3 = vld [vmem:[%s7079_s1 + $0x2d0] ss:$8 sps:$4 sm:$0xff]   ;;  %v5271_v6 = vld [vmem:[%s7079_s1 + $0x2f4] ss:$8 sps:$4 sm:$0xff]  }
  0x2f   : > { %1383 = vmatpush1.bf16.msra.mxu0 %v5130_v18  ;;  %1665 = vmatpush1.bf16.msra.mxu1 %v5322_v7  ;;  %v5341_v18 = vld [vmem:[%s7079_s1 + $0x464] ss:$8 sps:$4 sm:$0xff]   ;;  %v5269_v7 = vld [vmem:[%s7079_s1 + $0x2f0] ss:$8 sps:$4 sm:$0xff]  }
  0x30   : > { %1384 = vmatprep.subr.bf16.mxu0 %v5131_v19  ;;  %1666 = vmatprep.subr.bf16.mxu1 %v5326_v10  ;;  %v5343_v19 = vld [vmem:[%s7079_s1 + $0x460] ss:$8 sps:$4 sm:$0xff]  }
  0x31   : > { %v5275_v10 = vld [vmem:[%s7079_s1 + $0x300] ss:$8 sps:$4 sm:$0xff]  }
  0x33   : > { %1385 = vmatpush1.bf16.msra.mxu0 %v5133_v20  ;;  %1667 = vmatpush1.bf16.msra.mxu1 %v5328_v11  ;;  %v5205_v20 = vld [vmem:[%s7079_s1 + $0x1e0] ss:$8 sps:$4 sm:$0xff]  }
  0x34   : > { %1386 = vmatprep.subr.bf16.mxu0 %v5134_v21  ;;  %1668 = vmatprep.subr.bf16.mxu1 %v5335_v14  ;;  %v5211_v21 = vld [vmem:[%s7079_s1 + $0x1f4] ss:$8 sps:$4 sm:$0xff]   ;;  %v5283_v14 = vld [vmem:[%s7079_s1 + $0x324] ss:$8 sps:$4 sm:$0xff]  }
  0x35   : > { %v5314_v11 = vld [vmem:[%s5677_s13 + $0x5c] ss:$36 sps:$4 sm:$0xff]  }
  0x37   : > { %1387 = vmatpush1.bf16.msra.mxu0 %v5136_v22  ;;  %1669 = vmatpush1.bf16.msra.mxu1 %v5337_v15  ;;  %v5350_v22 = vld [vmem:[%s7079_s1 + $0x474] ss:$8 sps:$4 sm:$0xff]  }
  0x38   : > { %1388 = vmatprep.subr.bf16.mxu0 %v5137_v23  ;;  %1670 = vmatprep.subr.bf16.mxu1 %v5341_v18  ;;  %v5352_v23 = vld [vmem:[%s7079_s1 + $0x470] ss:$8 sps:$4 sm:$0xff]   ;;  %v5286_v18 = vld [vmem:[%s7079_s1 + $0x334] ss:$8 sps:$4 sm:$0xff]  }
  0x39   : > { %v5316_v15 = vld [vmem:[%s5677_s13 + $0x58] ss:$36 sps:$4 sm:$0xff]  }
  0x3b   : > { %1389 = vmatpush1.bf16.msra.mxu0 %v5139_v24  ;;  %1671 = vmatpush1.bf16.msra.mxu1 %v5343_v19  ;;  %v5209_v24 = vld [vmem:[%s7079_s1 + $0x1f0] ss:$8 sps:$4 sm:$0xff]  }
  0x3c   : > { %1390 = vmatprep.subr.bf16.mxu0 %v5140_v25  ;;  %v5217_v25 = vld [vmem:[%s7079_s1 + $0x204] ss:$8 sps:$4 sm:$0xff]   ;;  %1672 = vmatprep.subr.bf16.mxu1 %v5350_v22  ;;  %v5284_v19 = vld [vmem:[%s7079_s1 + $0x330] ss:$8 sps:$4 sm:$0xff]   ;;  %v5287_v22 = vld [vmem:[%s7079_s1 + $0x340] ss:$8 sps:$4 sm:$0xff]  }
  0x3f   : > { %1391 = vmatpush1.bf16.msra.mxu0 %v5142_v26  ;;  %v5212_v26 = vld [vmem:[%s5677_s13 + $0x8] ss:$36 sps:$4 sm:$0xff]   ;;  %1673 = vmatpush1.bf16.msra.mxu1 %v5352_v23 }
  0x40   : > { %1392 = vmatprep.subr.bf16.mxu0 %v5143_v27  ;;  %v5215_v27 = vld [vmem:[%s7079_s1 + $0x200] ss:$8 sps:$4 sm:$0xff]   ;;  %v5344_v23 = vld [vmem:[%s5677_s13 + $0xec] ss:$36 sps:$4 sm:$0xff]  }
  0x43   : > { %1393 = vmatpush1.bf16.msra.mxu0 %v5145_v28  ;;  %v5544_v28 = vmov 0  }
  0x44   : > { %1394 = vmatprep.subr.bf16.mxu0 %v5146_v29  ;;  %1690 = vmatprep.mubr.bf16.mxu1 %v5544_v28  ;;  %2176 = vst [vmem:[#allocation2] sm:$0xf] %v5544_v28  ;;  %2177 = vst [vmem:[#allocation2 + $0x4] sm:$0x1] %v5544_v28  ;;  %v5356_v29 = vld [vmem:[%s5677_s13 + $0x20] ss:$36 sps:$4 sm:$0xff]  }
  0x45   : > { %2179 = vst [vmem:[#allocation2 + $0x48] sm:$0xf] %v5544_v28  ;;  %2180 = vst [vmem:[#allocation2 + $0x4c] sm:$0x1] %v5544_v28  ;;  %1691 = vmatmul.mubr.bf16.vlgmr.msra.gmra.mrb[0].mxu1 %v5356_v29  ;;  %v5293_v29 = vld [vmem:[%s7079_s1 + $0x360] ss:$8 sps:$4 sm:$0xff]  }
  0x46   : > { %1700 = vmatprep.mubr.bf16.mxu1 %v5544_v28 }
  0x47   : > { %1395 = vmatpush1.bf16.msra.mxu0 %v5148_v30  ;;  %v5220_v30 = vld [vmem:[%s7079_s1 + $0x214] ss:$8 sps:$4 sm:$0xff]  }
  0x48   : > { %1396 = vmatprep.subr.bf16.mxu0 %v5149_v31  ;;  %v5245_v31 = vld [vmem:[%s5677_s13 + $0x54] ss:$36 sps:$4 sm:$0xff]  }
  0x4b   : > { %1397 = vmatpush1.bf16.msra.mxu0 %v5151_v32  ;;  %v5218_v32 = vld [vmem:[%s7079_s1 + $0x210] ss:$8 sps:$4 sm:$0xff]  }
  0x4c   : > { %1439 = vmatprep.subr.bf16.mxu0 %v5157_v33  ;;  %v5223_v33 = vld [vmem:[%s7079_s1 + $0x224] ss:$8 sps:$4 sm:$0xff]  }
  0x4e   : > { %1399 = vmatmul.mubr.bf16.vlgmr.msra.gmra.mrb[0].mxu0 %v5152_v34  ;;  %v5360_v34 = vld [vmem:[%s5677_s13 + $0x68] ss:$36 sps:$4 sm:$0xff]  }
  0x4f   : > { %1440 = vmatpush1.bf16.msra.mxu0 %v5155_v35  ;;  %1408 = vmatprep.mubr.bf16.mxu0 %v5185_v36  ;;  %v5250_v35 = vld [vmem:[%s5677_s13 + $0x50] ss:$36 sps:$4 sm:$0xff]   ;;  %v5221_v36 = vld [vmem:[%s7079_s1 + $0x220] ss:$8 sps:$4 sm:$0xff]  }
  0x50   : > { %1441 = vmatprep.subr.bf16.mxu0 %v5160_v37  ;;  %v5254_v37 = vld [vmem:[%s5677_s13 + $0x9c] ss:$36 sps:$4 sm:$0xff]   ;;  %1701 = vmatmul.mubr.bf16.gmra.mrb[4].mxu1 %v5360_v34 }
  0x51   : > { %1710 = vmatprep.mubr.bf16.mxu1 %v5544_v28  ;;  %v5302_v34 = vld [vmem:[%s7079_s1 + $0x380] ss:$8 sps:$4 sm:$0xff]  }
  0x53   : > { %1442 = vmatpush1.bf16.msra.mxu0 %v5158_v38  ;;  %v5226_v38 = vld [vmem:[%s7079_s1 + $0x234] ss:$8 sps:$4 sm:$0xff]  }
  0x54   : > { %1443 = vmatprep.subr.bf16.mxu0 %v5163_v39  ;;  %v5224_v39 = vld [vmem:[%s7079_s1 + $0x230] ss:$8 sps:$4 sm:$0xff]  }
  0x56   : > { %1409 = vmatmul.mubr.bf16.gmra.mrb[4].mxu0 %v5190_v41  ;;  %v5259_v41 = vld [vmem:[%s5677_s13 + $0x98] ss:$36 sps:$4 sm:$0xff]  }
  0x57   : > { %1444 = vmatpush1.bf16.msra.mxu0 %v5161_v40  ;;  %1418 = vmatprep.mubr.bf16.mxu0 %v5194_v42  ;;  %v5229_v40 = vld [vmem:[%s7079_s1 + $0x244] ss:$8 sps:$4 sm:$0xff]   ;;  %v5227_v42 = vld [vmem:[%s7079_s1 + $0x240] ss:$8 sps:$4 sm:$0xff]  }
  0x58   : > { %1445 = vmatprep.subr.bf16.mxu0 %v5166_v43  ;;  %v5263_v43 = vld [vmem:[%s5677_s13 + $0xe4] ss:$36 sps:$4 sm:$0xff]  }
  0x5b   : > { %1446 = vmatpush1.bf16.msra.mxu0 %v5164_v44  ;;  %v5232_v44 = vld [vmem:[%s7079_s1 + $0x254] ss:$8 sps:$4 sm:$0xff]  }
  0x5c   : > { %1447 = vmatprep.subr.bf16.mxu0 %v5169_v45  ;;  %v5367_v45 = vld [vmem:[%s5677_s13 + $0xb0] ss:$36 sps:$4 sm:$0xff]  }
  0x5d   : > { %1711 = vmatmul.mubr.bf16.gmra.mrb[8].mxu1 %v5367_v45  ;;  %v5349_v45 = vld [vmem:[%s7079_s1 + $0x3e4] ss:$8 sps:$4 sm:$0xff]  }
  0x5e   : > { %1419 = vmatmul.mubr.bf16.gmra.mrb[8].mxu0 %v5199_v46  ;;  %v5230_v46 = vld [vmem:[%s7079_s1 + $0x250] ss:$8 sps:$4 sm:$0xff]   ;;  %1720 = vmatprep.mubr.bf16.mxu1 %v5544_v28  ;;  %v5346_v28 = vld [vmem:[%s5677_s13 + $0xe8] ss:$36 sps:$4 sm:$0xff]  }
  0x5f   : > { %1448 = vmatpush1.bf16.msra.mxu0 %v5167_v47  ;;  %1428 = vmatprep.mubr.bf16.mxu0 %v5203_v48  ;;  %v5235_v47 = vld [vmem:[%s7079_s1 + $0x264] ss:$8 sps:$4 sm:$0xff]  }
  0x60   : > { %1449 = vmatprep.subr.bf16.mxu0 %v5172_v49  ;;  %v5268_v48 = vld [vmem:[%s5677_s13 + $0xe0] ss:$36 sps:$4 sm:$0xff]  }
  0x61   : > { %v5233_v49 = vld [vmem:[%s7079_s1 + $0x260] ss:$8 sps:$4 sm:$0xff]  }
  0x63   : > { %1450 = vmatpush1.bf16.msra.mxu0 %v5170_v50  ;;  %v5274_v50 = vld [vmem:[%s5677_s13 + $0x14] ss:$36 sps:$4 sm:$0xff]  }
  0x64   : > { %1451 = vmatprep.subr.bf16.mxu0 %v5175_v51  ;;  %v5238_v51 = vld [vmem:[%s7079_s1 + $0x274] ss:$8 sps:$4 sm:$0xff]  }
  0x66   : > { %1429 = vmatmul.mubr.bf16.gmra.mrb[12].mxu0 %v5208_v52  ;;  %v5371_v52 = vld [vmem:[%s5677_s13 + $0xf8] ss:$36 sps:$4 sm:$0xff]  }
  0x67   : > { %1452 = vmatpush1.bf16.msra.mxu0 %v5173_v53  ;;  %1471 = vmatprep.mubr.bf16.mxu0 %v5214_v55  ;;  %v5236_v53 = vld [vmem:[%s7079_s1 + $0x270] ss:$8 sps:$4 sm:$0xff]   ;;  %v5372_v55 = vld [vmem:[%s7080_s2] sm:$0xff]  }
  0x68   : > { %1453 = vmatprep.subr.bf16.mxu0 %v5178_v54  ;;  %v5241_v54 = vld [vmem:[%s7079_s1 + $0x284] ss:$8 sps:$4 sm:$0xff]   ;;  %1721 = vmatmul.mubr.bf16.gmra.mrb[12].mxu1 %v5371_v52 }
  0x69   : > { %4885 = vmatprep.subr.bf16.mxu1 %v5372_v55  ;;  %v5364_v52 = vld [vmem:[%s5677_s13 + $0xac] ss:$36 sps:$4 sm:$0xff]  }
  0x6a   : > { %4886 = vmatpush3.bf16.msra.mxu1 %v5372_v55  ;;  %v5370_v55 = vld [vmem:[%s5677_s13 + $0xf0] ss:$36 sps:$4 sm:$0xff]  }
  0x6b   : > { %1454 = vmatpush1.bf16.msra.mxu0 %v5176_v56  ;;  %v5373_v56 = vld [vmem:[%s7080_s2 + $0x8] sm:$0xff]  }
  0x6c   : > { %1455 = vmatprep.subr.bf16.mxu0 %v5181_v57  ;;  %v5239_v57 = vld [vmem:[%s7079_s1 + $0x280] ss:$8 sps:$4 sm:$0xff]   ;;  %4887 = vmatprep.subr.bf16.mxu1 %v5373_v56 }
  0x6e   : > { %4888 = vmatpush3.bf16.msra.mxu1 %v5373_v56 }
  0x6f   : > { %1456 = vmatpush1.bf16.msra.mxu0 %v5179_v60  ;;  %v5249_v60 = vld [vmem:[%s7079_s1 + $0x2a4] ss:$8 sps:$4 sm:$0xff]  }
  0x70   : > { %1457 = vmatprep.subr.bf16.mxu0 %v5184_v61  ;;  %v5247_v61 = vld [vmem:[%s7079_s1 + $0x2a0] ss:$8 sps:$4 sm:$0xff]  }
  0x73   : > { %1458 = vmatpush1.bf16.msra.mxu0 %v5182_v0  ;;  %v5258_v0 = vld [vmem:[%s7079_s1 + $0x2c4] ss:$8 sps:$4 sm:$0xff]  }
  0x74   : > { %1459 = vmatprep.subr.bf16.mxu0 %v5189_v1  ;;  %v5256_v1 = vld [vmem:[%s7079_s1 + $0x2c0] ss:$8 sps:$4 sm:$0xff]  }
  0x77   : > { %1460 = vmatpush1.bf16.msra.mxu0 %v5187_v4  ;;  %v5267_v4 = vld [vmem:[%s7079_s1 + $0x2e4] ss:$8 sps:$4 sm:$0xff]  }
  0x78   : > { %1461 = vmatprep.subr.bf16.mxu0 %v5193_v5  ;;  %v5265_v5 = vld [vmem:[%s7079_s1 + $0x2e0] ss:$8 sps:$4 sm:$0xff]  }
  0x7b   : > { %1462 = vmatpush1.bf16.msra.mxu0 %v5191_v8  ;;  %v5277_v8 = vld [vmem:[%s7079_s1 + $0x304] ss:$8 sps:$4 sm:$0xff]  }
  0x7c   : > { %1463 = vmatprep.subr.bf16.mxu0 %v5198_v9  ;;  %v5272_v9 = vld [vmem:[%s5677_s13 + $0x10] ss:$36 sps:$4 sm:$0xff]  }
  0x7f   : > { %1464 = vmatpush1.bf16.msra.mxu0 %v5196_v12  ;;  %v5280_v12 = vld [vmem:[%s7079_s1 + $0x314] ss:$8 sps:$4 sm:$0xff]  }
  0x80   : > { %1465 = vmatprep.subr.bf16.mxu0 %v5202_v13  ;;  %v5278_v13 = vld [vmem:[%s7079_s1 + $0x310] ss:$8 sps:$4 sm:$0xff]  }
  0x83   : > { %1466 = vmatpush1.bf16.msra.mxu0 %v5200_v16  ;;  %v5281_v16 = vld [vmem:[%s7079_s1 + $0x320] ss:$8 sps:$4 sm:$0xff]  }
  0x84   : > { %1467 = vmatprep.subr.bf16.mxu0 %v5207_v17  ;;  %v5329_v17 = vld [vmem:[%s5677_s13 + $0xa4] ss:$36 sps:$4 sm:$0xff]  }
  0x87   : > { %1468 = vmatpush1.bf16.msra.mxu0 %v5205_v20  ;;  %v5289_v20 = vld [vmem:[%s7079_s1 + $0x344] ss:$8 sps:$4 sm:$0xff]  }
  0x88   : > { %1469 = vmatprep.subr.bf16.mxu0 %v5211_v21  ;;  %v5331_v21 = vld [vmem:[%s5677_s13 + $0xa0] ss:$36 sps:$4 sm:$0xff]  }
  0x8b   : > { %1470 = vmatpush1.bf16.msra.mxu0 %v5209_v24  ;;  %v5292_v24 = vld [vmem:[%s7079_s1 + $0x354] ss:$8 sps:$4 sm:$0xff]  }
  0x8c   : > { %1512 = vmatprep.subr.bf16.mxu0 %v5217_v25  ;;  %v5374_v25 = vld [vmem:[%s7080_s2 + $0x10] sm:$0xff]  }
  0x8d   : > { %4889 = vmatprep.subr.bf16.mxu1 %v5374_v25 }
  0x8e   : > { %1472 = vmatmul.mubr.bf16.vlgmr.msra.gmra.mrb[0].mxu0 %v5212_v26  ;;  %v5290_v26 = vld [vmem:[%s7079_s1 + $0x350] ss:$8 sps:$4 sm:$0xff]   ;;  %4890 = vmatpush3.bf16.msra.mxu1 %v5374_v25 }
  0x8f   : > { %1513 = vmatpush1.bf16.msra.mxu0 %v5215_v27  ;;  %1481 = vmatprep.mubr.bf16.mxu0 %v5245_v31  ;;  %v5295_v27 = vld [vmem:[%s7079_s1 + $0x364] ss:$8 sps:$4 sm:$0xff]   ;;  %v5298_v31 = vld [vmem:[%s7079_s1 + $0x374] ss:$8 sps:$4 sm:$0xff]  }
  0x90   : > { %1514 = vmatprep.subr.bf16.mxu0 %v5220_v30  ;;  %v5359_v30 = vld [vmem:[%s5677_s13 + $0x1c] ss:$36 sps:$4 sm:$0xff]  }
  0x93   : > { %1515 = vmatpush1.bf16.msra.mxu0 %v5218_v32  ;;  %v5296_v32 = vld [vmem:[%s7079_s1 + $0x370] ss:$8 sps:$4 sm:$0xff]  }
  0x94   : > { %1516 = vmatprep.subr.bf16.mxu0 %v5223_v33  ;;  %v5304_v33 = vld [vmem:[%s7079_s1 + $0x384] ss:$8 sps:$4 sm:$0xff]  }
  0x96   : > { %1482 = vmatmul.mubr.bf16.gmra.mrb[4].mxu0 %v5250_v35  ;;  %v5310_v35 = vld [vmem:[%s7079_s1 + $0x394] ss:$8 sps:$4 sm:$0xff]  }
  0x97   : > { %1517 = vmatpush1.bf16.msra.mxu0 %v5221_v36  ;;  %1491 = vmatprep.mubr.bf16.mxu0 %v5254_v37  ;;  %v5308_v36 = vld [vmem:[%s7079_s1 + $0x390] ss:$8 sps:$4 sm:$0xff]   ;;  %v5319_v37 = vld [vmem:[%s7079_s1 + $0x3a4] ss:$8 sps:$4 sm:$0xff]  }
  0x98   : > { %1518 = vmatprep.subr.bf16.mxu0 %v5226_v38  ;;  %v5317_v38 = vld [vmem:[%s7079_s1 + $0x3a0] ss:$8 sps:$4 sm:$0xff]  }
  0x9b   : > { %1519 = vmatpush1.bf16.msra.mxu0 %v5224_v39  ;;  %v5325_v39 = vld [vmem:[%s7079_s1 + $0x3b4] ss:$8 sps:$4 sm:$0xff]  }
  0x9c   : > { %1520 = vmatprep.subr.bf16.mxu0 %v5229_v40  ;;  %v5323_v40 = vld [vmem:[%s7079_s1 + $0x3b0] ss:$8 sps:$4 sm:$0xff]  }
  0x9e   : > { %1492 = vmatmul.mubr.bf16.gmra.mrb[8].mxu0 %v5259_v41  ;;  %v5334_v41 = vld [vmem:[%s7079_s1 + $0x3c4] ss:$8 sps:$4 sm:$0xff]  }
  0x9f   : > { %1521 = vmatpush1.bf16.msra.mxu0 %v5227_v42  ;;  %1501 = vmatprep.mubr.bf16.mxu0 %v5263_v43  ;;  %v5332_v42 = vld [vmem:[%s7079_s1 + $0x3c0] ss:$8 sps:$4 sm:$0xff]   ;;  %v5340_v43 = vld [vmem:[%s7079_s1 + $0x3d4] ss:$8 sps:$4 sm:$0xff]  }
  0xa0   : > { %1522 = vmatprep.subr.bf16.mxu0 %v5232_v44  ;;  %v5338_v44 = vld [vmem:[%s7079_s1 + $0x3d0] ss:$8 sps:$4 sm:$0xff]  }
  0xa3   : > { %1523 = vmatpush1.bf16.msra.mxu0 %v5230_v46  ;;  %v5347_v46 = vld [vmem:[%s7079_s1 + $0x3e0] ss:$8 sps:$4 sm:$0xff]  }
  0xa4   : > { %1524 = vmatprep.subr.bf16.mxu0 %v5235_v47  ;;  %v5355_v47 = vld [vmem:[%s7079_s1 + $0x3f4] ss:$8 sps:$4 sm:$0xff]  }
  0xa6   : > { %1502 = vmatmul.mubr.bf16.gmra.mrb[12].mxu0 %v5268_v48  ;;  %v5353_v48 = vld [vmem:[%s7079_s1 + $0x3f0] ss:$8 sps:$4 sm:$0xff]  }
  0xa7   : > { %1525 = vmatpush1.bf16.msra.mxu0 %v5233_v49  ;;  %1544 = vmatprep.mubr.bf16.mxu0 %v5274_v50  ;;  %v5357_v49 = vld [vmem:[%s5677_s13 + $0x18] ss:$36 sps:$4 sm:$0xff]   ;;  %v5361_v50 = vld [vmem:[%s5677_s13 + $0x64] ss:$36 sps:$4 sm:$0xff]  }
  0xa8   : > { %1526 = vmatprep.subr.bf16.mxu0 %v5238_v51  ;;  %v5363_v51 = vld [vmem:[%s5677_s13 + $0x60] ss:$36 sps:$4 sm:$0xff]  }
  0xab   : > { %1527 = vmatpush1.bf16.msra.mxu0 %v5236_v53  ;;  %v5366_v53 = vld [vmem:[%s5677_s13 + $0xa8] ss:$36 sps:$4 sm:$0xff]  }
  0xac   : > { %1528 = vmatprep.subr.bf16.mxu0 %v5241_v54  ;;  %v5368_v54 = vld [vmem:[%s5677_s13 + $0xf4] ss:$36 sps:$4 sm:$0xff]   ;;  %s7013_s13 = scalar_lea.vmem [#allocation3], %s4315_s14 }
  0xad   : > { %s4249_s15 = sshll.u32 %s7013_s13, 4  ;;  %s7030_s15 = int_to_ptr.vmem [resolvable:$true] %s4249_s15 }
  0xae   : > { %s5480_s21 = scalar_lea.vmem %s7030_s15, 1024  ;;  %p5487_p0 = scmp.lt.s32.totalorder %s7030_s15, %s5485_s23 }
  0xaf   : > { %1529 = vmatpush1.bf16.msra.mxu0 %v5239_v57  ;;  %p5481_p11 = scmp.ne.s32.totalorder %s7030_s15, %s5480_s21  ;;  %p5488_p1 = scmp.lt.s32.totalorder %s5486_s29, %s5480_s21 }
  0xb0   : > { %1530 = vmatprep.subr.bf16.mxu0 %v5244_v58 }
  0xb1   : > { %p5482_p12 = pnand %p5481_p11, %p5626_p5  ;;  %p5489_p2 = por %p5488_p1, %p5487_p0 }
  0xb3   : > { %1531 = vmatpush1.bf16.msra.mxu0 %v5242_v59  ;;  %v5375_v59 = vld [vmem:[%s7080_s2 + $0x18] sm:$0xff]   ;;  %p5483_p13 = pneg %p5482_p12 }
  0xb4   : > { %1532 = vmatprep.subr.bf16.mxu0 %v5249_v60  ;;  %4891 = vmatprep.subr.bf16.mxu1 %v5375_v59 }
  0xb5   : > { %4892 = vmatpush3.bf16.msra.mxu1 %v5375_v59  ;;  %p5490_p3 = pnand %p5489_p2, %p5483_p13 }
  0xb7   : > { %1533 = vmatpush1.bf16.msra.mxu0 %v5247_v61  ;;  %v5376_v61 = vld [vmem:[%s7080_s2 + $0x20] sm:$0xff]  }
  0xb8   : > { %1534 = vmatprep.subr.bf16.mxu0 %v5253_v62  ;;  %4893 = vmatprep.subr.bf16.mxu1 %v5376_v61 }
  0xb9   : > { %4894 = vmatpush3.bf16.msra.mxu1 %v5376_v61 }
  0xbb   : > { %1535 = vmatpush1.bf16.msra.mxu0 %v5251_v63 }
  0xbc   : > { %1536 = vmatprep.subr.bf16.mxu0 %v5258_v0 }
  0xbf   : > { %1537 = vmatpush1.bf16.msra.mxu0 %v5256_v1  ;;  %v5377_v1 = vld [vmem:[%s7080_s2 + $0x28] sm:$0xff]  }
  0xc0   : > { %1538 = vmatprep.subr.bf16.mxu0 %v5262_v2  ;;  %4895 = vmatprep.subr.bf16.mxu1 %v5377_v1 }
  0xc1   : > { %4896 = vmatpush3.bf16.msra.mxu1 %v5377_v1 }
  0xc3   : > { %1539 = vmatpush1.bf16.msra.mxu0 %v5260_v3  ;;  %v5378_v3 = vld [vmem:[%s7080_s2 + $0x30] sm:$0xff]  }
  0xc4   : > { %1540 = vmatprep.subr.bf16.mxu0 %v5267_v4  ;;  %4897 = vmatprep.subr.bf16.mxu1 %v5378_v3  ;;  %v5379_v4 = vld [vmem:[%s7080_s2 + $0x38] sm:$0xff]  }
  0xc5   : > { %4898 = vmatpush3.bf16.msra.mxu1 %v5378_v3 }
  0xc6   : > { %4899 = vmatprep.subr.bf16.mxu1 %v5379_v4 }
  0xc7   : > { %1541 = vmatpush1.bf16.msra.mxu0 %v5265_v5 }
  0xc8   : > { %1542 = vmatprep.subr.bf16.mxu0 %v5271_v6 }
  0xc9   : > { %4900 = vmatpush3.bf16.msra.mxu1 %v5379_v4 }
  0xcb   : > { %1543 = vmatpush1.bf16.msra.mxu0 %v5269_v7 }
  0xcc   : > { %1585 = vmatprep.subr.bf16.mxu0 %v5277_v8 }
  0xce   : > { %1545 = vmatmul.mubr.bf16.vlgmr.msra.gmra.mrb[0].mxu0 %v5272_v9  ;;  %v6150_v9 = vld [vmem:[%s7081_s3] sm:$0xff]  }
  0xcf   : > { %1586 = vmatpush1.bf16.msra.mxu0 %v5275_v10  ;;  %1554 = vmatprep.mubr.bf16.mxu0 %v5314_v11 }
  0xd0   : > { %1587 = vmatprep.subr.bf16.mxu0 %v5280_v12  ;;  %4909 = vmatprep.subr.bf16.mxu1 %v6150_v9 }
  0xd3   : > { %1588 = vmatpush1.bf16.msra.mxu0 %v5278_v13 }
  0xd4   : > { %1589 = vmatprep.subr.bf16.mxu0 %v5283_v14  ;;  %v1735_v14 = vlaneseq }
  0xd6   : > { %1555 = vmatmul.mubr.bf16.gmra.mrb[4].mxu0 %v5316_v15  ;;  %v1736_v15 = vshrl.u32 %v1735_v14, 7 }
  0xd7   : > { %1590 = vmatpush1.bf16.msra.mxu0 %v5281_v16  ;;  %1564 = vmatprep.mubr.bf16.mxu0 %v5329_v17  ;;  %v1731_v17 = vld [vmem:[%s7084_s6] ss:$8 sm:$0x3] }
  0xd8   : > { %1591 = vmatprep.subr.bf16.mxu0 %v5286_v18  ;;  %v1737_v16 = vsub.s32 0, %v1736_v15  ;;  %v1741_v18 = vsub.s32 1, %v1736_v15 }
  0xdb   : > { %1592 = vmatpush1.bf16.msra.mxu0 %v5284_v19  ;;  %v4497_v19 = vld [vmem:[%s7084_s6 + $0x1] ss:$8 sm:$0x3] }
  0xdc   : > { %1593 = vmatprep.subr.bf16.mxu0 %v5289_v20  ;;  %v6167_v20 = vrot.slane %v1731_v17, %v1737_v16  ;;  %v6174_v25 = vrot.slane %v4497_v19, %v1737_v16 }
  0xde   : > { %1565 = vmatmul.mubr.bf16.gmra.mrb[8].mxu0 %v5331_v21 }
  0xdf   : > { %1594 = vmatpush1.bf16.msra.mxu0 %v5287_v22  ;;  %1574 = vmatprep.mubr.bf16.mxu0 %v5344_v23  ;;  %v4498_v22 = vld [vmem:[%s7084_s6 + $0x2] ss:$8 sm:$0x3]  ;;  %v6172_v23 = vrot.slane %v1731_v17, %v1741_v18 }
  0xe0   : > { %1595 = vmatprep.subr.bf16.mxu0 %v5292_v24 }
  0xe3   : > { %1596 = vmatpush1.bf16.msra.mxu0 %v5290_v26 }
  0xe4   : > { %1597 = vmatprep.subr.bf16.mxu0 %v5295_v27 }
  0xe6   : > { %1575 = vmatmul.mubr.bf16.gmra.mrb[12].mxu0 %v5346_v28  ;;  %v6176_v28 = vrot.slane %v4497_v19, %v1741_v18 }
  0xe7   : > { %1598 = vmatpush1.bf16.msra.mxu0 %v5293_v29  ;;  %1617 = vmatprep.mubr.bf16.mxu0 %v5359_v30 }
  0xe8   : > { %1599 = vmatprep.subr.bf16.mxu0 %v5298_v31  ;;  %v6179_v31 = vrot.slane %v4498_v22, %v1737_v16 }
  0xeb   : > { %1600 = vmatpush1.bf16.msra.mxu0 %v5296_v32 }
  0xec   : > { %1601 = vmatprep.subr.bf16.mxu0 %v5304_v33 }
  0xef   : > { %1602 = vmatpush1.bf16.msra.mxu0 %v5302_v34 }
  0xf0   : > { %1603 = vmatprep.subr.bf16.mxu0 %v5310_v35  ;;  %v6182_v35 = vrot.slane %v4498_v22, %v1741_v18 }
  0xf3   : > { %1604 = vmatpush1.bf16.msra.mxu0 %v5308_v36 }
  0xf4   : > { %1605 = vmatprep.subr.bf16.mxu0 %v5319_v37 }
  0xf7   : > { %1606 = vmatpush1.bf16.msra.mxu0 %v5317_v38 }
  0xf8   : > { %1607 = vmatprep.subr.bf16.mxu0 %v5325_v39 }
  0xfb   : > { %1608 = vmatpush1.bf16.msra.mxu0 %v5323_v40 }
  0xfc   : > { %1609 = vmatprep.subr.bf16.mxu0 %v5334_v41 }
  0xff   : > { %1610 = vmatpush1.bf16.msra.mxu0 %v5332_v42 }
 0x100   : > { %1611 = vmatprep.subr.bf16.mxu0 %v5340_v43 }
 0x103   : > { %1612 = vmatpush1.bf16.msra.mxu0 %v5338_v44 }
 0x104   : > { %1613 = vmatprep.subr.bf16.mxu0 %v5349_v45 }
 0x107   : > { %1614 = vmatpush1.bf16.msra.mxu0 %v5347_v46 }
 0x108   : > { %1615 = vmatprep.subr.bf16.mxu0 %v5355_v47 }
 0x10b   : > { %1616 = vmatpush1.bf16.msra.mxu0 %v5353_v48 }
 0x10e   : > { %1618 = vmatmul.mubr.bf16.vlgmr.msra.gmra.mrb[0].mxu0 %v5357_v49 }
 0x10f   : > { %1627 = vmatprep.mubr.bf16.mxu0 %v5361_v50 }
 0x116   : > { %1628 = vmatmul.mubr.bf16.gmra.mrb[4].mxu0 %v5363_v51 }
 0x117   : > { %1637 = vmatprep.mubr.bf16.mxu0 %v5364_v52 }
 0x118   : > { %v1692_v56 = vpop.f32.mrb[0].mxu1 }
 0x119   : > { %v1694_v57 = vpop.f32.mrb[1].mxu1 }
 0x11a   : > { %v1696_v58 = vpop.f32.mrb[2].mxu1 }
 0x11b   : > { %v1698_v60 = vpop.f32.mrb[3].mxu1 }
 0x11e   : > { %1638 = vmatmul.mubr.bf16.gmra.mrb[8].mxu0 %v5366_v53 }
 0x11f   : > { %1647 = vmatprep.mubr.bf16.mxu0 %v5368_v54 }
 0x123   : > { %v1702_v62 = vpop.f32.mrb[4].mxu1 }
 0x124   : > { %v1704_v63 = vpop.f32.mrb[5].mxu1 }
 0x125   : > { %v6126_v0 = vpop.f32.mrb[6].mxu1 }
 0x126   : > { %1648 = vmatmul.mubr.bf16.gmra.mrb[12].mxu0 %v5370_v55  ;;  %v6131_v2 = vpop.f32.mrb[7].mxu1 }
 0x130   : > { %v6139_v5 = vpop.f32.mrb[8].mxu1 }
 0x131   : > { %v6141_v6 = vpop.f32.mrb[9].mxu1 }
 0x132   : > { %v6143_v7 = vpop.f32.mrb[10].mxu1 }
 0x133   : > { %v6145_v8 = vpop.f32.mrb[11].mxu1 }
 0x13b   : > { %v6153_v10 = vpop.f32.mrb[12].mxu1 }
 0x13c   : > { %v6155_v11 = vpop.f32.mrb[13].mxu1 }
 0x13d   : > { %v6157_v12 = vpop.f32.mrb[14].mxu1 }
 0x13e   : > { %v6159_v13 = vpop.f32.mrb[15].mxu1 }
 0x1e1   : > { %v1619_v21 = vpop.f32.mrb[0].mxu0 }
 0x1e2   : > { %v4997_v24 = vadd.f32 %v1692_v56, %v1619_v21  ;;  %v1621_v26 = vpop.f32.mrb[1].mxu0 }
 0x1e3   : > { %v4998_v27 = vadd.f32 %v1694_v57, %v1621_v26  ;;  %v1623_v29 = vpop.f32.mrb[2].mxu0 }
 0x1e4   : > { %v1745_v30 = vmul.f32 %v4997_v24, %v6167_v20  ;;  %v4999_v32 = vadd.f32 %v1696_v58, %v1623_v29  ;;  %v1625_v33 = vpop.f32.mrb[3].mxu0 }
 0x1e5   : > { %v1746_v34 = vmul.f32 %v4998_v27, %v6172_v23  ;;  %v5000_v36 = vadd.f32 %v1698_v60, %v1625_v33 }
 0x1e6   : > { %v1772_v37 = vadd.f32 %v6174_v25, %v1745_v30  ;;  %v1747_v38 = vmul.f32 %v4999_v32, %v6167_v20 }
 0x1e7   : > { %v1773_v39 = vadd.f32 %v6176_v28, %v1746_v34  ;;  %v1748_v40 = vmul.f32 %v5000_v36, %v6172_v23 }
 0x1e8   : > { %v1817_v41 = vmul.f32 %v6179_v31, %v1772_v37  ;;  %v1774_v42 = vadd.f32 %v6174_v25, %v1747_v38  ;;  %vm1790_vm0 = vcmp.ge.f32.partialorder %v1772_v37, 0.0 }
 0x1e9   : > { %v1818_v43 = vmul.f32 %v6182_v35, %v1773_v39  ;;  %v1775_v44 = vadd.f32 %v6176_v28, %v1748_v40  ;;  %v1629_v45 = vpop.f32.mrb[4].mxu0  ;;  %vm1791_vm1 = vcmp.ge.f32.partialorder %v1773_v39, 0.0 }
 0x1ea   : > { %v1819_v46 = vmul.f32 %v6179_v31, %v1774_v42  ;;  %v5001_v47 = vadd.f32 %v1702_v62, %v1629_v45  ;;  %v1631_v48 = vpop.f32.mrb[5].mxu0  ;;  %vm1792_vm2 = vcmp.ge.f32.partialorder %v1774_v42, 0.0  ;;  %v1833_v52 = vsel %vm1790_vm0, %v1772_v37, %v1817_v41 }
 0x1eb   : > { %v1820_v49 = vmul.f32 %v6182_v35, %v1775_v44  ;;  %v5002_v50 = vadd.f32 %v1704_v63, %v1631_v48  ;;  %v1633_v51 = vpop.f32.mrb[6].mxu0  ;;  %vm1793_vm3 = vcmp.ge.f32.partialorder %v1775_v44, 0.0  ;;  %v6196_v57 = vsel %vm1791_vm1, %v1773_v39, %v1818_v43 }
 0x1ec   : > { %v1749_v53 = vmul.f32 %v5001_v47, %v6167_v20  ;;  %v5003_v54 = vadd.f32 %v6126_v0, %v1633_v51  ;;  %v1635_v55 = vpop.f32.mrb[7].mxu0  ;;  %v1835_v56 = vsel %vm1792_vm2, %v1774_v42, %v1819_v46  ;;  %v5382_v46 = vld [vmem:[%s7081_s3 + $0x10] sm:$0xff]   ;;  %vm2182_vm0 = vcmask 1040384  }
 0x1ed   : > { %v1750_v58 = vmul.f32 %v5002_v50, %v6172_v23  ;;  %v5004_v59 = vadd.f32 %v6131_v2, %v1635_v55  ;;  %v1849_v60 = vpack.c.bf16 %v1835_v56, %v1833_v52  ;;  %v6200_v61 = vsel %vm1793_vm3, %v1775_v44, %v1820_v49 }
 0x1ee   : > { %v1776_v62 = vadd.f32 %v6174_v25, %v1749_v53  ;;  %v1751_v63 = vmul.f32 %v5003_v54, %v6167_v20  ;;  %v2000_v1 = vpack.c.bf16 %v6200_v61, %v6196_v57  ;;  %v5388_v57 = vld [vmem:[%s7082_s4 + $0x40] sm:$0xff]   ;;  %vm2183_vm1 = vsmask.f32 256 }
 0x1ef   : > { %v1777_v0 = vadd.f32 %v6176_v28, %v1750_v58  ;;  %v1752_v3 = vmul.f32 %v5004_v59, %v6172_v23  ;;  %4901 = vmatprep.mubr.bf16.mxu1 %v1849_v60  ;;  %vm2209_vm2 = vsmask.f32 7938  ;;  %v5389_v61 = vld [vmem:[%s7082_s4] sm:$0xff]   ;;  %vm6286_vm3 = vmand %vm2182_vm0, %vm2183_vm1 }
 0x1f0   : > { %vm1794_vm4 = vcmp.ge.f32.partialorder %v1776_v62, 0.0  ;;  %v1821_v4 = vmul.f32 %v6179_v31, %v1776_v62  ;;  %v1778_v2 = vadd.f32 %v6174_v25, %v1751_v63 }
 0x1f1   : > { %vm1795_vm5 = vcmp.ge.f32.partialorder %v1777_v0, 0.0  ;;  %v1822_v14 = vmul.f32 %v6182_v35, %v1777_v0  ;;  %v1779_v15 = vadd.f32 %v6176_v28, %v1752_v3  ;;  %v1639_v16 = vpop.f32.mrb[8].mxu0 }
 0x1f2   : > { %vm1796_vm6 = vcmp.ge.f32.partialorder %v1778_v2, 0.0  ;;  %v1823_v17 = vmul.f32 %v6179_v31, %v1778_v2  ;;  %v5005_v18 = vadd.f32 %v6139_v5, %v1639_v16  ;;  %v1641_v19 = vpop.f32.mrb[9].mxu0  ;;  %v1837_v21 = vsel %vm1794_vm4, %v1776_v62, %v1821_v4  ;;  %vm6293_vm4 = vmand %vm2182_vm0, %vm2209_vm2 }
 0x1f3   : > { %vm1797_vm7 = vcmp.ge.f32.partialorder %v1779_v15, 0.0  ;;  %v1824_v22 = vmul.f32 %v6182_v35, %v1779_v15  ;;  %v5006_v24 = vadd.f32 %v6141_v6, %v1641_v19  ;;  %v1643_v26 = vpop.f32.mrb[10].mxu0  ;;  %v6216_v27 = vsel %vm1795_vm5, %v1777_v0, %v1822_v14  ;;  %v5381_v6 = vld [vmem:[%s7081_s3 + $0x8] sm:$0xff]  }
 0x1f4   : > { %v1839_v29 = vsel %vm1796_vm6, %v1778_v2, %v1823_v17  ;;  %v1753_v30 = vmul.f32 %v5005_v18, %v6167_v20  ;;  %v5007_v32 = vadd.f32 %v6143_v7, %v1643_v26  ;;  %v1645_v33 = vpop.f32.mrb[11].mxu0  ;;  %v2217_v26 = vld [vmem:[#allocation2 + $0x1c] sm:$0x1]  ;;  %vm2347_vm6 = vcmask 1043456  }
 0x1f5   : > { %v1850_v34 = vpack.c.bf16 %v1839_v29, %v1837_v21  ;;  %v6220_v36 = vsel %vm1797_vm7, %v1779_v15, %v1824_v22  ;;  %v1754_v5 = vmul.f32 %v5006_v24, %v6172_v23  ;;  %v5008_v37 = vadd.f32 %v6145_v8, %v1645_v33  ;;  %v2191_v24 = vld [vmem:[#allocation2 + $0x18] sm:$0x1] }
 0x1f6   : > { %v2001_v38 = vpack.c.bf16 %v6220_v36, %v6216_v27  ;;  %v1780_v39 = vadd.f32 %v6174_v25, %v1753_v30  ;;  %v1755_v40 = vmul.f32 %v5007_v32, %v6167_v20  ;;  %v2192_v27 = vsel %vm6286_vm3, 0, %v2191_v24  ;;  %v2185_v30 = vld [vmem:[#allocation2 + $0x8] sm:$0x1]  ;;  %v2211_v32 = vld [vmem:[#allocation2 + $0xc] sm:$0x1] }
 0x1f7   : > { %v1781_v7 = vadd.f32 %v6176_v28, %v1754_v5  ;;  %v1756_v41 = vmul.f32 %v5008_v37, %v6172_v23  ;;  %4902 = vmatmul.mubr.bf16.vlgmr.msra.gmra.mrb[16].mxu1 %v1850_v34  ;;  %2193 = vst [vmem:[#allocation2 + $0x18] sm:$0x1] %v2192_v27  ;;  %v2218_v33 = vsel %vm6293_vm4, 0, %v2217_v26  ;;  %v2186_v34 = vsel %vm6286_vm3, 0, %v2185_v30  ;;  %v2194_v5 = vld [vmem:[#allocation2 + $0x20] sm:$0x1] }
 0x1f8   : > { %v1825_v42 = vmul.f32 %v6179_v31, %v1780_v39  ;;  %v1782_v8 = vadd.f32 %v6174_v25, %v1755_v40  ;;  %4910 = vmatpush3.bf16.msra.mxu1 %v6150_v9  ;;  %vm1798_vm8 = vcmp.ge.f32.partialorder %v1780_v39, 0.0  ;;  %v2212_v36 = vsel %vm6293_vm4, 0, %v2211_v32  ;;  %2219 = vst [vmem:[#allocation2 + $0x1c] sm:$0x1] %v2218_v33  ;;  %2187 = vst [vmem:[#allocation2 + $0x8] sm:$0x1] %v2186_v34 }
 0x1f9   : > { %v1826_v43 = vmul.f32 %v6182_v35, %v1781_v7  ;;  %v1783_v44 = vadd.f32 %v6176_v28, %v1756_v41  ;;  %v1649_v45 = vpop.f32.mrb[12].mxu0  ;;  %4911 = vmatprep.subr.bf16.mxu1 %v5381_v6  ;;  %vm1799_vm9 = vcmp.ge.f32.partialorder %v1781_v7, 0.0  ;;  %2213 = vst [vmem:[#allocation2 + $0xc] sm:$0x1] %v2212_v36  ;;  %v2195_v37 = vsel %vm6286_vm3, 0, %v2194_v5 }
 0x1fa   : > { %v1827_v47 = vmul.f32 %v6179_v31, %v1782_v8  ;;  %v5009_v48 = vadd.f32 %v6153_v10, %v1649_v45  ;;  %v1651_v49 = vpop.f32.mrb[13].mxu0  ;;  %vm1800_vm10 = vcmp.ge.f32.partialorder %v1782_v8, 0.0  ;;  %v1841_v52 = vsel %vm1798_vm8, %v1780_v39, %v1825_v42  ;;  %2196 = vst [vmem:[#allocation2 + $0x20] sm:$0x1] %v2195_v37  ;;  %v5390_v42 = vld [vmem:[%s7082_s4 + $0x48] sm:$0xff]  }
 0x1fb   : > { %v1828_v9 = vmul.f32 %v6182_v35, %v1783_v44  ;;  %v5010_v50 = vadd.f32 %v6155_v11, %v1651_v49  ;;  %v1653_v51 = vpop.f32.mrb[14].mxu0  ;;  %vm1801_vm11 = vcmp.ge.f32.partialorder %v1783_v44, 0.0  ;;  %v1842_v58 = vsel %vm1799_vm9, %v1781_v7, %v1826_v43  ;;  %v5383_v11 = vld [vmem:[%s7081_s3 + $0x18] sm:$0xff]   ;;  %v2214_v7 = vld [vmem:[#allocation2 + $0x14] sm:$0x1] }
 0x1fc   : > { %v1757_v53 = vmul.f32 %v5009_v48, %v6167_v20  ;;  %v5011_v54 = vadd.f32 %v6157_v12, %v1653_v51  ;;  %4912 = vmatpush3.bf16.msra.mxu1 %v5381_v6  ;;  %v1655_v55 = vpop.f32.mrb[15].mxu0  ;;  %v1843_v56 = vsel %vm1800_vm10, %v1782_v8, %v1827_v47  ;;  %v2220_v6 = vld [vmem:[#allocation2 + $0x24] sm:$0x1]  ;;  %v2215_v41 = vsel %vm6293_vm4, 0, %v2214_v7  ;;  %v2203_v8 = vld [vmem:[#allocation2 + $0x38] sm:$0x1]  ;;  %vm6433_vm10 = vmand %vm2347_vm6, %vm2209_vm2 }
 0x1fd   : > { %v1758_v59 = vmul.f32 %v5010_v50, %v6172_v23  ;;  %v5012_v10 = vadd.f32 %v6159_v13, %v1655_v55  ;;  %4913 = vmatprep.subr.bf16.mxu1 %v5382_v46  ;;  %v1851_v60 = vpack.c.bf16 %v1843_v56, %v1841_v52  ;;  %v1844_v62 = vsel %vm1801_vm11, %v1783_v44, %v1828_v9  ;;  %v2229_v43 = vld [vmem:[#allocation2 + $0x3c] sm:$0x1]  ;;  %v2197_v47 = vld [vmem:[#allocation2 + $0x28] sm:$0x1]  ;;  %v2223_v48 = vld [vmem:[#allocation2 + $0x2c] sm:$0x1] }
 0x1fe   : > { %v1784_v63 = vadd.f32 %v6174_v25, %v1757_v53  ;;  %v1759_v0 = vmul.f32 %v5011_v54, %v6167_v20  ;;  %v2002_v12 = vpack.c.bf16 %v1844_v62, %v1842_v58  ;;  %v5384_v20 = vld [vmem:[%s7081_s3 + $0x20] sm:$0xff]   ;;  %v2221_v39 = vsel %vm6293_vm4, 0, %v2220_v6  ;;  %2216 = vst [vmem:[#allocation2 + $0x14] sm:$0x1] %v2215_v41  ;;  %v5392_v50 = vld [vmem:[%s7082_s4 + $0x50] sm:$0xff]   ;;  %v5394_v54 = vld [vmem:[%s7082_s4 + $0x58] sm:$0xff]  }
 0x1ff   : > { %v1785_v3 = vadd.f32 %v6176_v28, %v1758_v59  ;;  %v1760_v4 = vmul.f32 %v5012_v10, %v6172_v23  ;;  %4905 = vmatprep.mubr.bf16.mxu1 %v1851_v60  ;;  %2222 = vst [vmem:[#allocation2 + $0x24] sm:$0x1] %v2221_v39  ;;  %v2204_v44 = vsel %vm6286_vm3, 0, %v2203_v8  ;;  %v2230_v45 = vsel %vm6293_vm4, 0, %v2229_v43  ;;  %v5393_v51 = vld [vmem:[%s7082_s4 + $0x10] sm:$0xff]   ;;  %v5395_v10 = vld [vmem:[%s7082_s4 + $0x18] sm:$0xff]  }
 0x200   : > { %v1829_v2 = vmul.f32 %v6179_v31, %v1784_v63  ;;  %v1786_v13 = vadd.f32 %v6174_v25, %v1759_v0  ;;  %4914 = vmatpush3.bf16.msra.mxu1 %v5382_v46  ;;  %vm1802_vm12 = vcmp.ge.f32.partialorder %v1784_v63, 0.0  ;;  %2205 = vst [vmem:[#allocation2 + $0x38] sm:$0x1] %v2204_v44  ;;  %2231 = vst [vmem:[#allocation2 + $0x3c] sm:$0x1] %v2230_v45  ;;  %v5391_v46 = vld [vmem:[%s7082_s4 + $0x8] sm:$0xff]  }
 0x201   : > { %v1830_v14 = vmul.f32 %v6182_v35, %v1785_v3  ;;  %v1787_v15 = vadd.f32 %v6176_v28, %v1760_v4  ;;  %4915 = vmatprep.subr.bf16.mxu1 %v5383_v11  ;;  %vm1803_vm14 = vcmp.ge.f32.partialorder %v1785_v3, 0.0  ;;  %v5385_v28 = vld [vmem:[%s7081_s3 + $0x28] sm:$0xff]   ;;  %v2198_v49 = vsel %vm6286_vm3, 0, %v2197_v47  ;;  %v2206_v52 = vld [vmem:[#allocation2 + $0x40] sm:$0x1]  ;;  %v5401_v4 = vld [vmem:[%s7082_s4 + $0x30] sm:$0xff]  }
 0x202   : > { %v1831_v16 = vmul.f32 %v6179_v31, %v1786_v13  ;;  %vm1804_vm13 = vcmp.ge.f32.partialorder %v1786_v13, 0.0  ;;  %v1845_v25 = vsel %vm1802_vm12, %v1784_v63, %v1829_v2  ;;  %v5386_v31 = vld [vmem:[%s7081_s3 + $0x30] sm:$0xff]   ;;  %v2224_v9 = vsel %vm6293_vm4, 0, %v2223_v48  ;;  %2199 = vst [vmem:[#allocation2 + $0x28] sm:$0x1] %v2198_v49  ;;  %v5396_v62 = vld [vmem:[%s7082_s4 + $0x60] sm:$0xff]  }
 0x203   : > { %v1832_v23 = vmul.f32 %v6182_v35, %v1787_v15  ;;  %vm1805_vm15 = vcmp.ge.f32.partialorder %v1787_v15, 0.0  ;;  %v1846_v19 = vsel %vm1803_vm14, %v1785_v3, %v1830_v14  ;;  %v5387_v35 = vld [vmem:[%s7081_s3 + $0x38] sm:$0xff]   ;;  %2225 = vst [vmem:[#allocation2 + $0x2c] sm:$0x1] %v2224_v9  ;;  %v2232_v53 = vld [vmem:[#allocation2 + $0x44] sm:$0x1] }
 0x204   : > { %4916 = vmatpush3.bf16.msra.mxu1 %v5383_v11  ;;  %v1847_v17 = vsel %vm1804_vm13, %v1786_v13, %v1831_v16  ;;  %v2207_v55 = vsel %vm6286_vm3, 0, %v2206_v52  ;;  %v2233_v56 = vsel %vm6293_vm4, 0, %v2232_v53  ;;  %v2200_v58 = vld [vmem:[#allocation2 + $0x30] sm:$0x1]  ;;  %v2226_v59 = vld [vmem:[#allocation2 + $0x34] sm:$0x1] }
 0x205   : > { %4917 = vmatprep.subr.bf16.mxu1 %v5384_v20  ;;  %v1852_v18 = vpack.c.bf16 %v1847_v17, %v1845_v25  ;;  %v1848_v21 = vsel %vm1805_vm15, %v1787_v15, %v1832_v23  ;;  %2208 = vst [vmem:[#allocation2 + $0x40] sm:$0x1] %v2207_v55  ;;  %2234 = vst [vmem:[#allocation2 + $0x44] sm:$0x1] %v2233_v56  ;;  %v2201_v60 = vsel %vm6286_vm3, 0, %v2200_v58  ;;  %v2227_v11 = vsel %vm6293_vm4, 0, %v2226_v59 }
 0x206   : > { %v2003_v22 = vpack.c.bf16 %v1848_v21, %v1846_v19  ;;  %2202 = vst [vmem:[#allocation2 + $0x30] sm:$0x1] %v2201_v60  ;;  %2228 = vst [vmem:[#allocation2 + $0x34] sm:$0x1] %v2227_v11  ;;  %v5397_v63 = vld [vmem:[%s7082_s4 + $0x20] sm:$0xff]   ;;  %v5398_v0 = vld [vmem:[%s7082_s4 + $0x68] sm:$0xff]  }
 0x207   : > { %4906 = vmatmul.mubr.bf16.gmra.mrb[20].mxu1 %v1852_v18  ;;  %v5400_v3 = vld [vmem:[%s7082_s4 + $0x70] sm:$0xff]   ;;  %v5402_v2 = vld [vmem:[%s7082_s4 + $0x78] sm:$0xff]   ;;  %v5404_v14 = vld [vmem:[%s7082_s4 + $0xc0] sm:$0xff]   ;;  %vm2413_vm13 = vsmask.f32 3328  ;;  %vm2552_vm2 = vcmask 1042432  }
 0x208   : > { %4918 = vmatpush3.bf16.msra.mxu1 %v5384_v20  ;;  %4925 = vmatprep.mubr.bf16.mxu1 %v2000_v1  ;;  %v5403_v13 = vld [vmem:[%s7082_s4 + $0x38] sm:$0xff]   ;;  %v6388_v19 = vld [vmem:[#allocation2] sm:$0xf]  ;;  %v6393_v21 = vld [vmem:[%s7084_s6 + $0x6] ss:$0 sm:$0xff] }
 0x209   : > { %4919 = vmatprep.subr.bf16.mxu1 %v5385_v28  ;;  %v2420_v24 = vshll.u32 %v6388_v19, 16  ;;  %v6406_v26 = vld [vmem:[%s7084_s6 + $0x10] ss:$0 sm:$0xff]  ;;  %v6421_v7 = vld [vmem:[#allocation2 + $0x4] sm:$0x1]  ;;  %v5407_v1 = vld [vmem:[%s7082_s4 + $0xc8] sm:$0xff]  }
 0x20a   : > { %v2426_v8 = vshll.u32 %v6421_v7, 16  ;;  %vm2414_vm14 = vsmask.f32 7440 }
 0x20b   : > { %vm6484_vm1 = vmor %vm2413_vm13, %vm2414_vm14 }
 0x20c   : > { %4920 = vmatpush3.bf16.msra.mxu1 %v5385_v28 }
 0x20d   : > { %4921 = vmatprep.subr.bf16.mxu1 %v5386_v31 }
 0x210   : > { %4922 = vmatpush3.bf16.msra.mxu1 %v5386_v31  ;;  %v6398_v31 = vld [vmem:[%s7084_s6 + $0x7] ss:$0 sm:$0xff] }
 0x211   : > { %4923 = vmatprep.subr.bf16.mxu1 %v5387_v35 }
 0x214   : > { %4924 = vmatpush3.bf16.msra.mxu1 %v5387_v35  ;;  %v2417_v35 = vshrl.u32 %v6388_v19, 16 }
 0x215   : > { %4701 = vmatprep.subr.bf16.mxu1 %v5388_v57 }
 0x216   : > { %v6413_v5 = vrot.slane %v2417_v35, 4 }
 0x217   : > { %4926 = vmatmul.mubr.bf16.vlgmr.msra.gmra.mrb[24].mxu1 %v2001_v38  ;;  %v2188_v38 = vld [vmem:[#allocation2 + $0x10] sm:$0x1] }
 0x218   : > { %4929 = vmatprep.mubr.bf16.mxu1 %v2002_v12  ;;  %4702 = vmatpush3.bf16.msra.mxu1 %v5389_v61  ;;  %v2189_v40 = vsel %vm6286_vm3, 0, %v2188_v38  ;;  %v5399_v12 = vld [vmem:[%s7082_s4 + $0x28] sm:$0xff]   ;;  %v6417_v38 = vrot.slane %v2420_v24, 5 }
 0x219   : > { %2190 = vst [vmem:[#allocation2 + $0x10] sm:$0x1] %v2189_v40  ;;  %4703 = vmatprep.subr.bf16.mxu1 %v5390_v42 }
 0x21c   : > { %4704 = vmatpush3.bf16.msra.mxu1 %v5391_v46 }
 0x21d   : > { %4705 = vmatprep.subr.bf16.mxu1 %v5392_v50  ;;  %v2423_v50 = vor.u32 %v6417_v38, %v6413_v5 }
 0x21f   : > { %4930 = vmatmul.mubr.bf16.gmra.mrb[28].mxu1 %v2003_v22 }
 0x220   : > { %4706 = vmatpush3.bf16.msra.mxu1 %v5393_v51 }
 0x221   : > { %4707 = vmatprep.subr.bf16.mxu1 %v5394_v54 }
 0x224   : > { %4708 = vmatpush3.bf16.msra.mxu1 %v5395_v10 }
 0x225   : > { %4709 = vmatprep.subr.bf16.mxu1 %v5396_v62  ;;  %v2361_v62 = vld [vmem:[#allocation2 + $0x18] sm:$0xf] }
 0x228   : > { %4710 = vmatpush3.bf16.msra.mxu1 %v5397_v63 }
 0x229   : > { %4711 = vmatprep.subr.bf16.mxu1 %v5398_v0 }
 0x22c   : > { %4712 = vmatpush3.bf16.msra.mxu1 %v5399_v12 }
 0x22d   : > { %4713 = vmatprep.subr.bf16.mxu1 %v5400_v3 }
 0x230   : > { %4714 = vmatpush3.bf16.msra.mxu1 %v5401_v4  ;;  %v2364_v4 = vld [vmem:[#allocation2 + $0x1c] sm:$0x1] }
 0x231   : > { %4715 = vmatprep.subr.bf16.mxu1 %v5402_v2 }
 0x234   : > { %4716 = vmatpush3.bf16.msra.mxu1 %v5403_v13 }
 0x235   : > { %4741 = vmatprep.subr.bf16.mxu1 %v5404_v14 }
 0x2ca   : > { %v6372_v15 = vpop.f32.mrb[16].mxu1 }
 0x2cb   : > { %v6374_v20 = vpop.f32.mrb[17].mxu1 }
 0x2cc   : > { %v6376_v16 = vpop.f32.mrb[18].mxu1 }
 0x2cd   : > { %v6378_v23 = vpop.f32.mrb[19].mxu1 }
 0x2da   : > { %v6380_v25 = vpop.f32.mrb[20].mxu1 }
 0x2db   : > { %v6382_v17 = vpop.f32.mrb[21].mxu1 }
 0x2dc   : > { %v6384_v18 = vpop.f32.mrb[22].mxu1 }
 0x2dd   : > { %v6386_v28 = vpop.f32.mrb[23].mxu1 }
 0x2ea   : > { %v4927_v22 = vpop.f32.mrb[24].mxu1 }
 0x2eb   : > { %v2137_v57 = vmul.f32 %v4927_v22, %v6393_v21  ;;  %v2102_v61 = vpop.f32.mrb[25].mxu1 }
 0x2ec   : > { %v2135_v27 = vmul.f32 %v6393_v21, %v2102_v61  ;;  %v4928_v29 = vpop.f32.mrb[26].mxu1  ;;  %v2352_v61 = vld [vmem:[#allocation2 + $0xc] sm:$0x1] }
 0x2ed   : > { %v2145_v30 = vadd.f32 %v2137_v57, %v6398_v31  ;;  %v2138_v32 = vmul.f32 %v4928_v29, %v6393_v21  ;;  %v2105_v33 = vpop.f32.mrb[27].mxu1  ;;  %v2349_v57 = vld [vmem:[#allocation2 + $0x8] sm:$0xf] }
 0x2ee   : > { %v2143_v34 = vadd.f32 %v2135_v27, %v6398_v31  ;;  %v2136_v36 = vmul.f32 %v6393_v21, %v2105_v33  ;;  %v2370_v33 = vld [vmem:[#allocation2 + $0x24] sm:$0x1] }
 0x2ef   : > { %vm2154_vm5 = vcmp.ge.f32.partialorder %v2145_v30, 0.0  ;;  %v2162_v37 = vmul.f32 %v6406_v26, %v2145_v30  ;;  %v2146_v6 = vadd.f32 %v2138_v32, %v6398_v31  ;;  %v2367_v32 = vld [vmem:[#allocation2 + $0x20] sm:$0xf] }
 0x2f0   : > { %vm2152_vm7 = vcmp.ge.f32.partialorder %v2143_v34, 0.0  ;;  %v2160_v39 = vmul.f32 %v6406_v26, %v2143_v34  ;;  %v2144_v40 = vadd.f32 %v2136_v36, %v6398_v31 }
 0x2f1   : > { %v2170_v41 = vsel %vm2154_vm5, %v2145_v30, %v2162_v37  ;;  %vm2155_vm8 = vcmp.ge.f32.partialorder %v2146_v6, 0.0  ;;  %v2163_v42 = vmul.f32 %v6406_v26, %v2146_v6 }
 0x2f2   : > { %v4670_v43 = vpack.c.bf16 %v2170_v41, %v2170_v41  ;;  %v2168_v44 = vsel %vm2152_vm7, %v2143_v34, %v2160_v39  ;;  %vm2153_vm9 = vcmp.ge.f32.partialorder %v2144_v40, 0.0  ;;  %v2161_v45 = vmul.f32 %v6406_v26, %v2144_v40  ;;  %v4931_v46 = vpop.f32.mrb[28].mxu1  ;;  %v2355_v41 = vld [vmem:[#allocation2 + $0x10] sm:$0xf] }
 0x2f3   : > { %v4668_v47 = vpack.c.bf16 %v2168_v44, %v2168_v44  ;;  %v2171_v48 = vsel %vm2155_vm8, %v2146_v6, %v2163_v42  ;;  %v2141_v49 = vmul.f32 %v4931_v46, %v6393_v21  ;;  %v2118_v9 = vpop.f32.mrb[29].mxu1  ;;  %v2358_v42 = vld [vmem:[#allocation2 + $0x14] sm:$0x1] }
 0x2f4   : > { %v2284_v51 = vshrl.u32 %v4670_v43, 16  ;;  %v2287_v52 = vshll.u32 %v4670_v43, 16  ;;  %v4671_v53 = vpack.c.bf16 %v2171_v48, %v2171_v48  ;;  %v2169_v54 = vsel %vm2153_vm9, %v2144_v40, %v2161_v45  ;;  %v4932_v55 = vpop.f32.mrb[30].mxu1 }
 0x2f5   : > { %v2268_v56 = vshrl.u32 %v4668_v47, 16  ;;  %v2271_v58 = vshll.u32 %v4668_v47, 16  ;;  %v4669_v59 = vpack.c.bf16 %v2169_v54, %v2169_v54  ;;  %v2149_v10 = vadd.f32 %v2141_v49, %v6398_v31  ;;  %v2121_v60 = vpop.f32.mrb[31].mxu1 }
 0x2f6   : > { %v2286_v11 = vrot.slane %v2284_v51, 7  ;;  %v2292_v63 = vshrl.u32 %v4671_v53, 16  ;;  %v2295_v0 = vshll.u32 %v4671_v53, 16  ;;  %v2139_v12 = vmul.f32 %v6393_v21, %v2118_v9 }
 0x2f7   : > { %v2270_v2 = vrot.slane %v2268_v56, 7  ;;  %v2276_v13 = vshrl.u32 %v4669_v59, 16  ;;  %v2279_v14 = vshll.u32 %v4669_v59, 16  ;;  %vm2158_vm11 = vcmp.ge.f32.partialorder %v2149_v10, 0.0 }
 0x2f8   : > { %v2289_v22 = vor.u32 %v2287_v52, %v2286_v11  ;;  %v2290_v35 = vrot.slane %v2286_v11, 4  ;;  %v2294_v24 = vrot.slane %v2292_v63, 7  ;;  %v2166_v27 = vmul.f32 %v6406_v26, %v2149_v10 }
 0x2f9   : > { %v2273_v29 = vor.u32 %v2271_v58, %v2270_v2  ;;  %v2274_v30 = vrot.slane %v2270_v2, 4  ;;  %v2278_v34 = vrot.slane %v2276_v13, 7  ;;  %v2147_v36 = vadd.f32 %v2139_v12, %v6398_v31  ;;  %v2385_v12 = vld [vmem:[#allocation2 + $0x38] sm:$0xf] }
 0x2fa   : > { %v2362_v37 = vsel %vm6433_vm10, %v2289_v22, %v2361_v62  ;;  %v2365_v6 = vsel %vm6286_vm3, %v2290_v35, %v2364_v4  ;;  %v2297_v39 = vor.u32 %v2295_v0, %v2294_v24  ;;  %v2298_v40 = vrot.slane %v2294_v24, 4 }
 0x2fb   : > { %2363 = vst [vmem:[#allocation2 + $0x18] sm:$0xf] %v2362_v37  ;;  %2366 = vst [vmem:[#allocation2 + $0x1c] sm:$0x1] %v2365_v6  ;;  %v2350_v43 = vsel %vm6433_vm10, %v2273_v29, %v2349_v57  ;;  %v2353_v44 = vsel %vm6286_vm3, %v2274_v30, %v2352_v61  ;;  %v2281_v45 = vor.u32 %v2279_v14, %v2278_v34  ;;  %v2282_v46 = vrot.slane %v2278_v34, 4 }
 0x2fc   : > { %2351 = vst [vmem:[#allocation2 + $0x8] sm:$0xf] %v2350_v43  ;;  %2354 = vst [vmem:[#allocation2 + $0xc] sm:$0x1] %v2353_v44  ;;  %v2368_v47 = vsel %vm6433_vm10, %v2297_v39, %v2367_v32  ;;  %v2371_v48 = vsel %vm6286_vm3, %v2298_v40, %v2370_v33  ;;  %v2174_v49 = vsel %vm2158_vm11, %v2149_v10, %v2166_v27  ;;  %vm2156_vm12 = vcmp.ge.f32.partialorder %v2147_v36, 0.0 }
 0x2fd   : > { %2369 = vst [vmem:[#allocation2 + $0x20] sm:$0xf] %v2368_v47  ;;  %2372 = vst [vmem:[#allocation2 + $0x24] sm:$0x1] %v2371_v48  ;;  %v2356_v9 = vsel %vm6433_vm10, %v2281_v45, %v2355_v41  ;;  %v2359_v51 = vsel %vm6286_vm3, %v2282_v46, %v2358_v42  ;;  %v4674_v52 = vpack.c.bf16 %v2174_v49, %v2174_v49  ;;  %v6464_v4 = vrot.slane %v2423_v50, 4 }
 0x2fe   : > { %v2164_v53 = vmul.f32 %v6406_v26, %v2147_v36  ;;  %2357 = vst [vmem:[#allocation2 + $0x10] sm:$0xf] %v2356_v9  ;;  %2360 = vst [vmem:[#allocation2 + $0x14] sm:$0x1] %v2359_v51  ;;  %v2142_v54 = vmul.f32 %v4932_v55, %v6393_v21  ;;  %v2140_v56 = vmul.f32 %v6393_v21, %v2121_v60  ;;  %v6468_v21 = vrot.slane %v2426_v8, 5 }
 0x2ff   : > { %v2316_v58 = vshrl.u32 %v4674_v52, 16  ;;  %v2319_v0 = vshll.u32 %v4674_v52, 16  ;;  %v2388_v55 = vld [vmem:[#allocation2 + $0x3c] sm:$0x1]  ;;  %v2373_v27 = vld [vmem:[#allocation2 + $0x28] sm:$0xf] }
 0x300   : > { %v2172_v59 = vsel %vm2156_vm12, %v2147_v36, %v2164_v53  ;;  %v2150_v11 = vadd.f32 %v2142_v54, %v6398_v31  ;;  %v2148_v62 = vadd.f32 %v2140_v56, %v6398_v31  ;;  %v2376_v29 = vld [vmem:[#allocation2 + $0x2c] sm:$0x1]  ;;  %v2391_v44 = vld [vmem:[#allocation2 + $0x40] sm:$0xf]  ;;  %v2394_v45 = vld [vmem:[#allocation2 + $0x44] sm:$0x1]  ;;  %v2429_v51 = vsel %vm6484_vm1, %v6464_v4, %v6468_v21 }
 0x301   : > { %v4672_v10 = vpack.c.bf16 %v2172_v59, %v2172_v59  ;;  %v2318_v63 = vrot.slane %v2316_v58, 7  ;;  %v2379_v49 = vld [vmem:[#allocation2 + $0x30] sm:$0xf]  ;;  %v2382_v9 = vld [vmem:[#allocation2 + $0x34] sm:$0x1] }
 0x302   : > { %vm2159_vm15 = vcmp.ge.f32.partialorder %v2150_v11, 0.0  ;;  %v2167_v13 = vmul.f32 %v6406_v26, %v2150_v11  ;;  %vm2157_vm0 = vcmp.ge.f32.partialorder %v2148_v62, 0.0  ;;  %v2165_v22 = vmul.f32 %v6406_v26, %v2148_v62  ;;  %v5469_v36 = vld [vmem:[%s7082_s4 + $0x230] sm:$0xff]  }
 0x303   : > { %v2300_v60 = vshrl.u32 %v4672_v10, 16  ;;  %v2303_v2 = vshll.u32 %v4672_v10, 16  ;;  %v2321_v31 = vor.u32 %v2319_v0, %v2318_v63  ;;  %v2322_v14 = vrot.slane %v2318_v63, 4  ;;  %v6472_v35 = vld [vmem:[#allocation2 + $0x8] sm:$0xf] }
 0x304   : > { %v2175_v38 = vsel %vm2159_vm15, %v2150_v11, %v2167_v13  ;;  %v6474_v50 = vld [vmem:[#allocation2 + $0xc] sm:$0x1]  ;;  %v2431_v8 = vshrl.u32 %v6472_v35, 16  ;;  %v2434_v57 = vshll.u32 %v6472_v35, 16  ;;  %v2173_v26 = vsel %vm2157_vm0, %v2148_v62, %v2165_v22  ;;  %v6503_v0 = vld [vmem:[#allocation2 + $0x18] sm:$0xf] }
 0x305   : > { %v2302_v5 = vrot.slane %v2300_v60, 7  ;;  %v2386_v61 = vsel %vm6433_vm10, %v2321_v31, %v2385_v12  ;;  %v2389_v24 = vsel %vm6286_vm3, %v2322_v14, %v2388_v55  ;;  %v4675_v30 = vpack.c.bf16 %v2175_v38, %v2175_v38  ;;  %v6489_v41 = vld [vmem:[#allocation2 + $0x10] sm:$0xf]  ;;  %v6499_v56 = vld [vmem:[#allocation2 + $0x14] sm:$0x1] }
 0x306   : > { %2387 = vst [vmem:[#allocation2 + $0x38] sm:$0xf] %v2386_v61  ;;  %2390 = vst [vmem:[#allocation2 + $0x3c] sm:$0x1] %v2389_v24  ;;  %v4673_v34 = vpack.c.bf16 %v2173_v26, %v2173_v26  ;;  %v2433_v37 = vrot.slane %v2431_v8, 4  ;;  %v2436_v39 = vrot.slane %v2434_v57, 5  ;;  %v4547_v24 = vcombine.low %v6388_v19, %v6472_v35 }
 0x307   : > { %v2305_v32 = vor.u32 %v2303_v2, %v2302_v5  ;;  %v2306_v33 = vrot.slane %v2302_v5, 4  ;;  %v2324_v6 = vshrl.u32 %v4675_v30, 16  ;;  %v2440_v40 = vshll.u32 %v6474_v50, 16  ;;  %v6505_v60 = vld [vmem:[#allocation2 + $0x1c] sm:$0x1]  ;;  %v5406_v57 = vld [vmem:[%s7082_s4 + $0x80] sm:$0xff]  }
 0x308   : > { %v2308_v46 = vshrl.u32 %v4673_v34, 16  ;;  %v2327_v48 = vshll.u32 %v4675_v30, 16  ;;  %v2437_v52 = vor.u32 %v2436_v39, %v2433_v37  ;;  %v2311_v54 = vshll.u32 %v4673_v34, 16  ;;  %v6514_v22 = vld [vmem:[#allocation2 + $0x20] sm:$0xf]  ;;  %v5408_v39 = vld [vmem:[%s7082_s4 + $0x88] sm:$0xff]  }
 0x309   : > { %v2374_v42 = vsel %vm6433_vm10, %v2305_v32, %v2373_v27  ;;  %v2377_v43 = vsel %vm6286_vm3, %v2306_v33, %v2376_v29  ;;  %v2326_v47 = vrot.slane %v2324_v6, 7  ;;  %v2445_v58 = vshrl.u32 %v6489_v41, 16  ;;  %v6533_v32 = vld [vmem:[#allocation2 + $0x24] sm:$0x1] }
 0x30a   : > { %2375 = vst [vmem:[#allocation2 + $0x28] sm:$0xf] %v2374_v42  ;;  %2378 = vst [vmem:[#allocation2 + $0x2c] sm:$0x1] %v2377_v43  ;;  %v2310_v53 = vrot.slane %v2308_v46, 7  ;;  %v2448_v59 = vshll.u32 %v6489_v41, 16 }
 0x30b   : > { %v2329_v10 = vor.u32 %v2327_v48, %v2326_v47  ;;  %v2330_v11 = vrot.slane %v2326_v47, 4  ;;  %v2438_v62 = vrot.slane %v2437_v52, 4  ;;  %v2442_v63 = vrot.slane %v2440_v40, 5  ;;  %v5409_v46 = vld [vmem:[%s7082_s4 + $0xd0] sm:$0xff]  }
 0x30c   : > { %v2313_v12 = vor.u32 %v2311_v54, %v2310_v53  ;;  %v2314_v55 = vrot.slane %v2310_v53, 4  ;;  %v2447_v4 = vrot.slane %v2445_v58, 4  ;;  %v2450_v21 = vrot.slane %v2448_v59, 5 }
 0x30d   : > { %v2392_v2 = vsel %vm6433_vm10, %v2329_v10, %v2391_v44  ;;  %v2395_v13 = vsel %vm6286_vm3, %v2330_v11, %v2394_v45  ;;  %v2443_v31 = vsel %vm6484_vm1, %v2438_v62, %v2442_v63  ;;  %v2454_v14 = vshll.u32 %v6499_v56, 16  ;;  %v6537_v37 = vld [vmem:[#allocation2 + $0x38] sm:$0xf]  ;;  %v5411_v10 = vld [vmem:[%s7082_s4 + $0x90] sm:$0xff]  }
 0x30e   : > { %2393 = vst [vmem:[#allocation2 + $0x40] sm:$0xf] %v2392_v2  ;;  %2396 = vst [vmem:[#allocation2 + $0x44] sm:$0x1] %v2395_v13  ;;  %v2380_v5 = vsel %vm6433_vm10, %v2313_v12, %v2379_v49  ;;  %v2383_v38 = vsel %vm6286_vm3, %v2314_v55, %v2382_v9  ;;  %v4551_v8 = vcombine.low %v2429_v51, %v2443_v31  ;;  %v2459_v27 = vshrl.u32 %v6503_v0, 16 }
 0x30f   : > { %v2451_v61 = vor.u32 %v2450_v21, %v2447_v4  ;;  %2381 = vst [vmem:[#allocation2 + $0x30] sm:$0xf] %v2380_v5  ;;  %2384 = vst [vmem:[#allocation2 + $0x34] sm:$0x1] %v2383_v38  ;;  %v2462_v29 = vshll.u32 %v6503_v0, 16  ;;  %v2468_v3 = vshll.u32 %v6505_v60, 16 }
 0x310   : > { %3732 = vmatprep.mubr.bf16.mxu1 %v4551_v8  ;;  %v2473_v33 = vshrl.u32 %v6514_v22, 16  ;;  %v2461_v19 = vrot.slane %v2459_v27, 4  ;;  %v2476_v34 = vshll.u32 %v6514_v22, 16  ;;  %v2456_v6 = vrot.slane %v2454_v14, 5  ;;  %v5412_v21 = vld [vmem:[%s7082_s4 + $0xd8] sm:$0xff]  }
 0x311   : > { %v2452_v30 = vrot.slane %v2451_v61, 4  ;;  %v6531_v26 = vld [vmem:[#allocation2 + $0x28] sm:$0xf]  ;;  %3733 = vmatmul.mubr.bf16.vlgmr.msra.gmra.mrb[32].mxu1 %v4547_v24  ;;  %v2464_v35 = vrot.slane %v2462_v29, 5  ;;  %v6542_v40 = vld [vmem:[#allocation2 + $0x2c] sm:$0x1]  ;;  %v4548_v14 = vcombine.low %v6489_v41, %v6503_v0 }
 0x312   : > { %4742 = vmatpush3.bf16.msra.mxu1 %v5406_v57  ;;  %v2475_v42 = vrot.slane %v2473_v33, 4  ;;  %v2487_v43 = vshrl.u32 %v6531_v26, 16  ;;  %v2470_v45 = vrot.slane %v2468_v3, 5  ;;  %v2478_v47 = vrot.slane %v2476_v34, 5  ;;  %v6570_v5 = vld [vmem:[#allocation2 + $0x3c] sm:$0x1] }
 0x313   : > { %v2465_v44 = vor.u32 %v2464_v35, %v2461_v19  ;;  %4743 = vmatprep.subr.bf16.mxu1 %v5407_v1  ;;  %v2490_v48 = vshll.u32 %v6531_v26, 16  ;;  %v2457_v49 = vsel %vm6484_vm1, %v2452_v30, %v2456_v6  ;;  %v2482_v9 = vshll.u32 %v6533_v32, 16  ;;  %v5413_v29 = vld [vmem:[%s7082_s4 + $0x98] sm:$0xff]   ;;  %v5414_v33 = vld [vmem:[%s7082_s4 + $0xe0] sm:$0xff]  }
 0x314   : > { %v2489_v51 = vrot.slane %v2487_v43, 4  ;;  %v2515_v52 = vshrl.u32 %v6537_v37, 16  ;;  %v2479_v54 = vor.u32 %v2478_v47, %v2475_v42  ;;  %v2496_v59 = vshll.u32 %v6542_v40, 16 }
 0x315   : > { %v2466_v53 = vrot.slane %v2465_v44, 4  ;;  %v2492_v58 = vrot.slane %v2490_v48, 5  ;;  %v2518_v63 = vshll.u32 %v6537_v37, 16  ;;  %v2484_v57 = vrot.slane %v2482_v9, 5  ;;  %v5418_v9 = vld [vmem:[%s7082_s4 + $0xa8] sm:$0xff]  }
 0x316   : > { %4744 = vmatpush3.bf16.msra.mxu1 %v5408_v39  ;;  %v6557_v11 = vld [vmem:[#allocation2 + $0x30] sm:$0xf]  ;;  %v2517_v62 = vrot.slane %v2515_v52, 4  ;;  %v2480_v55 = vrot.slane %v2479_v54, 4  ;;  %v6565_v2 = vld [vmem:[#allocation2 + $0x34] sm:$0x1]  ;;  %v4549_v47 = vcombine.low %v6514_v22, %v6531_v26 }
 0x317   : > { %v2471_v12 = vsel %vm6484_vm1, %v2466_v53, %v2470_v45  ;;  %4745 = vmatprep.subr.bf16.mxu1 %v5409_v46  ;;  %v2493_v4 = vor.u32 %v2492_v58, %v2489_v51  ;;  %v2501_v13 = vshrl.u32 %v6557_v11, 16  ;;  %v2504_v38 = vshll.u32 %v6557_v11, 16  ;;  %v5416_v39 = vld [vmem:[%s7082_s4 + $0xa0] sm:$0xff]   ;;  %v5417_v45 = vld [vmem:[%s7082_s4 + $0xe8] sm:$0xff]   ;;  %v5419_v51 = vld [vmem:[%s7082_s4 + $0xf0] sm:$0xff]  }
 0x318   : > { %v4552_v31 = vcombine.low %v2457_v49, %v2471_v12  ;;  %v2520_v8 = vrot.slane %v2518_v63, 5  ;;  %v2498_v24 = vrot.slane %v2496_v59, 5  ;;  %v2510_v1 = vshll.u32 %v6565_v2, 16  ;;  %v5421_v22 = vld [vmem:[%s7082_s4 + $0xb0] sm:$0xff]   ;;  %v2528_v26 = vld [vmem:[#allocation2] sm:$0xe] }
 0x319   : > { %v2494_v61 = vrot.slane %v2493_v4, 4  ;;  %v2503_v27 = vrot.slane %v2501_v13, 4  ;;  %v2506_v3 = vrot.slane %v2504_v38, 5  ;;  %v2485_v41 = vsel %vm6484_vm1, %v2480_v55, %v2484_v57  ;;  %v6606_v52 = vld [vmem:[#allocation2 + $0x10] sm:$0xf]  ;;  %v5423_v53 = vld [vmem:[%s7082_s4 + $0xf8] sm:$0xff]  }
 0x31a   : > { %3740 = vmatprep.mubr.bf16.mxu1 %v4552_v31  ;;  %4746 = vmatpush3.bf16.msra.mxu1 %v5411_v10  ;;  %v2521_v30 = vor.u32 %v2520_v8, %v2517_v62  ;;  %v2524_v19 = vshll.u32 %v6570_v5, 16  ;;  %v2512_v43 = vrot.slane %v2510_v1, 5  ;;  %v2529_v54 = vld [vmem:[#allocation2 + $0x8] sm:$0xe]  ;;  %vm2553_vm3 = vcmask 1046532   ;;  %v5424_v12 = vld [vmem:[%s7082_s4 + $0xb8] sm:$0xff]  }
 0x31b   : > { %3741 = vmatmul.mubr.bf16.gmra.mrb[36].mxu1 %v4548_v14  ;;  %v2499_v0 = vsel %vm6484_vm1, %v2494_v61, %v2498_v24  ;;  %4747 = vmatprep.subr.bf16.mxu1 %v5412_v21  ;;  %v2507_v34 = vor.u32 %v2506_v3, %v2503_v27  ;;  %v2557_v58 = vrot.slane %v6421_v7, 5  ;;  %v4550_v59 = vcombine.low %v6557_v11, %v6537_v37  ;;  %v6614_v10 = vld [vmem:[#allocation2 + $0x8] sm:$0xf]  ;;  %v5425_v7 = vld [vmem:[%s7082_s4 + $0x140] sm:$0xff]   ;;  %vm6625_vm4 = vmor %vm2552_vm2, %vm2553_vm3 }
 0x31c   : > { %v4553_v35 = vcombine.low %v2485_v41, %v2499_v0  ;;  %v2522_v6 = vrot.slane %v2521_v30, 4  ;;  %v2526_v44 = vrot.slane %v2524_v19, 5  ;;  %v2561_v62 = vrot.slane %v6474_v50, 5  ;;  %v6633_v21 = vld [vmem:[#allocation2 + $0x20] sm:$0xf]  ;;  %v5428_v8 = vld [vmem:[%s7082_s4 + $0x148] sm:$0xff]  }
 0x31d   : > { %v2508_v42 = vrot.slane %v2507_v34, 4  ;;  %v4559_v63 = vcombine.low %v6614_v10, %v6606_v52  ;;  %v4523_v55 = vrot.slane %v2528_v26, 9  ;;  %v4524_v4 = vrot.slane %v2529_v54, 9  ;;  %v2530_v13 = vld [vmem:[#allocation2 + $0x10] sm:$0xe]  ;;  %v5426_v31 = vld [vmem:[%s7082_s4 + $0x100] sm:$0xff]  }
 0x31e   : > { %3748 = vmatprep.mubr.bf16.mxu1 %v4553_v35  ;;  %4748 = vmatpush3.bf16.msra.mxu1 %v5413_v29  ;;  %v2527_v48 = vsel %vm6484_vm1, %v2522_v6, %v2526_v44  ;;  %v6638_v38 = vld [vmem:[#allocation2 + $0x18] sm:$0xf]  ;;  %v4525_v24 = vrot.slane %v2530_v13, 9  ;;  %v2565_v27 = vrot.slane %v6499_v56, 5  ;;  %v5429_v29 = vld [vmem:[%s7082_s4 + $0x108] sm:$0xff]   ;;  %v2569_v1 = vrot.slane %v6505_v60, 5 }
 0x31f   : > { %4749 = vmatprep.subr.bf16.mxu1 %v5414_v33  ;;  %v2513_v46 = vsel %vm6484_vm1, %v2508_v42, %v2512_v43  ;;  %v2558_v50 = vsel %vm6625_vm4, %v4523_v55, %v2557_v58  ;;  %v2562_v11 = vsel %vm6625_vm4, %v4524_v4, %v2561_v62  ;;  %v2531_v57 = vld [vmem:[#allocation2 + $0x18] sm:$0xe]  ;;  %v4560_v61 = vcombine.low %v6638_v38, %v6633_v21  ;;  %v5430_v30 = vld [vmem:[%s7082_s4 + $0x150] sm:$0xff]   ;;  %v2533_v56 = vld [vmem:[#allocation2 + $0x28] sm:$0xe] }
 0x320   : > { %v4554_v49 = vcombine.low %v2513_v46, %v2527_v48  ;;  %v4555_v14 = vcombine.low %v2558_v50, %v2562_v11  ;;  %v4526_v3 = vrot.slane %v2531_v57, 9  ;;  %v2566_v41 = vsel %vm6625_vm4, %v4525_v24, %v2565_v27  ;;  %v6655_v0 = vld [vmem:[#allocation2 + $0x30] sm:$0xf]  ;;  %v6662_v35 = vld [vmem:[#allocation2 + $0x28] sm:$0xf]  ;;  %v5433_v34 = vld [vmem:[%s7082_s4 + $0x158] sm:$0xff]  }
 0x321   : > { %v5431_v19 = vld [vmem:[%s7082_s4 + $0x110] sm:$0xff]   ;;  %v2532_v6 = vld [vmem:[#allocation2 + $0x20] sm:$0xe]  ;;  %v4528_v42 = vrot.slane %v2533_v56, 9  ;;  %v2577_v43 = vrot.slane %v6542_v40, 5  ;;  %v5434_v44 = vld [vmem:[%s7082_s4 + $0x118] sm:$0xff]  }
 0x322   : > { %4750 = vmatpush3.bf16.msra.mxu1 %v5416_v39  ;;  %v2570_v33 = vsel %vm6625_vm4, %v4526_v3, %v2569_v1  ;;  %v4561_v39 = vcombine.low %v6662_v35, %v6655_v0  ;;  %v2573_v46 = vrot.slane %v6533_v32, 5  ;;  %v2618_v48 = vshrl.u32 %v6606_v52, 16  ;;  %v2534_v32 = vld [vmem:[#allocation2 + $0x30] sm:$0xe]  ;;  %v2596_v54 = vld [vmem:[#allocation2 + $0x14] sm:$0x1] }
 0x323   : > { %3749 = vmatmul.mubr.bf16.gmra.mrb[40].mxu1 %v4549_v47  ;;  %4751 = vmatprep.subr.bf16.mxu1 %v5417_v45  ;;  %v4556_v60 = vcombine.low %v2566_v41, %v2570_v33  ;;  %v4527_v45 = vrot.slane %v2532_v6, 9  ;;  %v5435_v47 = vld [vmem:[%s7082_s4 + $0x160] sm:$0xff]   ;;  %v2578_v40 = vsel %vm6625_vm4, %v4528_v42, %v2577_v43  ;;  %v2604_v26 = vshrl.u32 %v6614_v10, 16  ;;  %v2716_v58 = vld [vmem:[#allocation2 + $0x10] sm:$0xe]  ;;  %v5439_v57 = vld [vmem:[%s7082_s4 + $0x128] sm:$0xff]  }
 0x324   : > { %3756 = vmatprep.mubr.bf16.mxu1 %v4554_v49  ;;  %v2621_v49 = vshll.u32 %v6606_v52, 16  ;;  %v6697_v55 = vld [vmem:[#allocation2 + $0xc] sm:$0x1]  ;;  %v2620_v4 = vrot.slane %v2618_v48, 4  ;;  %v2581_v50 = vrot.slane %v6565_v2, 5  ;;  %v4532_v13 = vrot.slane %v2716_v58, 9 }
 0x325   : > { %v2574_v52 = vsel %vm6625_vm4, %v4527_v45, %v2573_v46  ;;  %v2715_v11 = vld [vmem:[#allocation2 + $0x8] sm:$0xe]  ;;  %v2585_v24 = vrot.slane %v6570_v5, 5  ;;  %v2646_v27 = vshrl.u32 %v6633_v21, 16  ;;  %v5440_v2 = vld [vmem:[%s7082_s4 + $0x170] sm:$0xff]   ;;  %v2741_v3 = vrot.slane %v6697_v55, 5 }
 0x326   : > { %4752 = vmatpush3.bf16.msra.mxu1 %v5418_v9  ;;  %v6681_v9 = vld [vmem:[#allocation2 + $0x40] sm:$0xf]  ;;  %v2632_v56 = vshrl.u32 %v6638_v38, 16  ;;  %v5441_v5 = vld [vmem:[%s7082_s4 + $0x130] sm:$0xff]   ;;  %v6721_v6 = vld [vmem:[#allocation2 + $0x24] sm:$0x1] }
 0x327   : > { %4753 = vmatprep.subr.bf16.mxu1 %v5419_v51  ;;  %v5436_v51 = vld [vmem:[%s7082_s4 + $0x120] sm:$0xff]   ;;  %v2648_v42 = vrot.slane %v2646_v27, 4  ;;  %v5442_v45 = vld [vmem:[%s7082_s4 + $0x178] sm:$0xff]   ;;  %v2613_v48 = vshll.u32 %v6697_v55, 16  ;;  %v2674_v58 = vshrl.u32 %v6655_v0, 16  ;;  %v5474_v37 = vld [vmem:[%s7083_s5 + $0x10] sm:$0xff]  }
 0x328   : > { %v6728_v46 = vld [vmem:[#allocation2 + $0x1c] sm:$0x1]  ;;  %v2720_v27 = vld [vmem:[#allocation2 + $0x30] sm:$0xe] }
 0x32a   : > { %4754 = vmatpush3.bf16.msra.mxu1 %v5421_v22  ;;  %v6686_v22 = vld [vmem:[#allocation2 + $0x38] sm:$0xf] }
 0x32b   : > { %3757 = vmatmul.mubr.bf16.gmra.mrb[44].mxu1 %v4550_v59  ;;  %4755 = vmatprep.subr.bf16.mxu1 %v5423_v53  ;;  %v2607_v53 = vshll.u32 %v6614_v10, 16  ;;  %v4557_v59 = vcombine.low %v2574_v52, %v2578_v40  ;;  %v4562_v62 = vcombine.low %v6686_v22, %v6681_v9  ;;  %v2623_v10 = vrot.slane %v2621_v49, 5  ;;  %v2717_v40 = vld [vmem:[#allocation2 + $0x18] sm:$0xe] }
 0x32c   : > { %3797 = vmatprep.mubr.bf16.mxu1 %v4559_v63  ;;  %v5438_v63 = vld [vmem:[%s7082_s4 + $0x168] sm:$0xff]   ;;  %v4533_v55 = vrot.slane %v2717_v40, 9 }
 0x32d   : > { %v2624_v1 = vor.u32 %v2623_v10, %v2620_v4  ;;  %v2749_v4 = vrot.slane %v6728_v46, 5  ;;  %v2663_v10 = vshll.u32 %v6662_v35, 16 }
 0x32e   : > { %4756 = vmatpush3.bf16.msra.mxu1 %v5424_v12  ;;  %v2535_v12 = vld [vmem:[#allocation2 + $0x38] sm:$0xe] }
 0x32f   : > { %4781 = vmatprep.subr.bf16.mxu1 %v5425_v7  ;;  %v4529_v7 = vrot.slane %v2534_v32, 9  ;;  %v2660_v32 = vshrl.u32 %v6662_v35, 16 }
 0x331   : > { %v2582_v41 = vsel %vm6625_vm4, %v4529_v7, %v2581_v50  ;;  %v2615_v7 = vrot.slane %v2613_v48, 5 }
 0x333   : > { %3798 = vmatmul.mubr.bf16.vlgmr.msra.gmra.mrb[48].mxu1 %v4555_v14  ;;  %v2606_v14 = vrot.slane %v2604_v26, 4 }
 0x334   : > { %4782 = vmatpush3.bf16.msra.mxu1 %v5426_v31  ;;  %3805 = vmatprep.mubr.bf16.mxu1 %v4560_v61  ;;  %v2745_v31 = vrot.slane %v2596_v54, 5  ;;  %v4530_v61 = vrot.slane %v2535_v12, 9  ;;  %v5444_v12 = vld [vmem:[%s7082_s4 + $0x1c0] sm:$0xff]  }
 0x335   : > { %4783 = vmatprep.subr.bf16.mxu1 %v5428_v8  ;;  %v2609_v8 = vrot.slane %v2607_v53, 5  ;;  %v2753_v53 = vrot.slane %v6721_v6, 5 }
 0x336   : > { %v2746_v33 = vsel %vm6625_vm4, %v4532_v13, %v2745_v31  ;;  %v6745_v13 = vrot.slane %v2660_v32, 4 }
 0x338   : > { %4784 = vmatpush3.bf16.msra.mxu1 %v5429_v29  ;;  %v4531_v29 = vrot.slane %v2715_v11, 9 }
 0x339   : > { %4785 = vmatprep.subr.bf16.mxu1 %v5430_v30  ;;  %v2649_v30 = vshll.u32 %v6633_v21, 16  ;;  %v2627_v21 = vshll.u32 %v2596_v54, 16 }
 0x33b   : > { %3806 = vmatmul.mubr.bf16.gmra.mrb[52].mxu1 %v4556_v60  ;;  %v2635_v60 = vshll.u32 %v6638_v38, 16  ;;  %v2625_v38 = vrot.slane %v2624_v1, 4  ;;  %v2750_v1 = vsel %vm6625_vm4, %v4533_v55, %v2749_v4  ;;  %v2602_v4 = vld [vmem:[#allocation2 + $0x44] sm:$0x1] }
 0x33c   : > { %4786 = vmatpush3.bf16.msra.mxu1 %v5431_v19  ;;  %3813 = vmatprep.mubr.bf16.mxu1 %v4561_v39  ;;  %v2610_v19 = vor.u32 %v2609_v8, %v2606_v14  ;;  %v2718_v39 = vld [vmem:[#allocation2 + $0x20] sm:$0xe]  ;;  %v5446_v14 = vld [vmem:[%s7082_s4 + $0x1c8] sm:$0xff]   ;;  %v2676_v8 = vrot.slane %v2674_v58, 4 }
 0x33d   : > { %4787 = vmatprep.subr.bf16.mxu1 %v5433_v34  ;;  %v2586_v34 = vsel %vm6625_vm4, %v4530_v61, %v2585_v24  ;;  %v4534_v26 = vrot.slane %v2718_v39, 9  ;;  %v2637_v54 = vrot.slane %v2635_v60, 5  ;;  %v2655_v61 = vshll.u32 %v6721_v6, 16  ;;  %v2600_v24 = vld [vmem:[#allocation2 + $0x34] sm:$0x1] }
 0x33e   : > { %v4558_v43 = vcombine.low %v2582_v41, %v2586_v34  ;;  %v2611_v52 = vrot.slane %v2610_v19, 4  ;;  %v2719_v41 = vld [vmem:[#allocation2 + $0x28] sm:$0xe]  ;;  %v2702_v60 = vshrl.u32 %v6681_v9, 16  ;;  %v2705_v34 = vshll.u32 %v6681_v9, 16  ;;  %v5448_v9 = vld [vmem:[%s7082_s4 + $0x1d0] sm:$0xff]  }
 0x33f   : > { %v2754_v31 = vsel %vm6625_vm4, %v4534_v26, %v2753_v53  ;;  %v4536_v6 = vrot.slane %v2720_v27, 9  ;;  %v2761_v39 = vrot.slane %v2600_v24, 5  ;;  %v2683_v32 = vshll.u32 %v2600_v24, 16  ;;  %v6778_v26 = vld [vmem:[#allocation2 + $0x18] sm:$0xf] }
 0x340   : > { %4788 = vmatpush3.bf16.msra.mxu1 %v5434_v44  ;;  %v2742_v44 = vsel %vm6625_vm4, %v4531_v29, %v2741_v3  ;;  %v2616_v35 = vsel %vm6484_vm1, %v2611_v52, %v2615_v7  ;;  %v2688_v29 = vshrl.u32 %v6686_v22, 16  ;;  %v2704_v53 = vrot.slane %v2702_v60, 4 }
 0x341   : > { %4789 = vmatprep.subr.bf16.mxu1 %v5435_v47  ;;  %v2651_v47 = vrot.slane %v2649_v30, 5  ;;  %v4567_v49 = vcombine.low %v2742_v44, %v2746_v33  ;;  %v2599_v30 = vld [vmem:[#allocation2 + $0x2c] sm:$0x1]  ;;  %v2641_v33 = vshll.u32 %v6728_v46, 16  ;;  %v4535_v44 = vrot.slane %v2719_v41, 9 }
 0x342   : > { %v6769_v46 = vrot.slane %v2688_v29, 4  ;;  %v2762_v52 = vsel %vm6625_vm4, %v4536_v6, %v2761_v39  ;;  %v2669_v55 = vshll.u32 %v2599_v30, 16  ;;  %v2769_v24 = vrot.slane %v2602_v4, 5  ;;  %v5451_v29 = vld [vmem:[%s7082_s4 + $0x198] sm:$0xff]   ;;  %v6812_v39 = vld [vmem:[#allocation2 + $0x14] sm:$0x1] }
 0x343   : > { %3814 = vmatmul.mubr.bf16.gmra.mrb[56].mxu1 %v4557_v59  ;;  %v2629_v59 = vrot.slane %v2627_v21, 5  ;;  %v2652_v11 = vor.u32 %v2651_v47, %v2648_v42  ;;  %v5447_v21 = vld [vmem:[%s7082_s4 + $0x188] sm:$0xff]   ;;  %v2691_v47 = vshll.u32 %v6686_v22, 16  ;;  %v5449_v22 = vld [vmem:[%s7082_s4 + $0x190] sm:$0xff]   ;;  %v2711_v6 = vshll.u32 %v2602_v4, 16 }
 0x344   : > { %4790 = vmatpush3.bf16.msra.mxu1 %v5436_v51  ;;  %3821 = vmatprep.mubr.bf16.mxu1 %v4562_v62  ;;  %v2634_v51 = vrot.slane %v2632_v56, 4  ;;  %v5443_v62 = vld [vmem:[%s7082_s4 + $0x138] sm:$0xff]   ;;  %v2665_v56 = vrot.slane %v2663_v10, 5  ;;  %v2722_v10 = vld [vmem:[#allocation2 + $0x40] sm:$0xe] }
 0x345   : > { %4791 = vmatprep.subr.bf16.mxu1 %v5438_v63  ;;  %v2677_v63 = vshll.u32 %v6655_v0, 16  ;;  %v2630_v50 = vsel %vm6484_vm1, %v2625_v38, %v2629_v59  ;;  %v5445_v0 = vld [vmem:[%s7082_s4 + $0x180] sm:$0xff]   ;;  %v2653_v19 = vrot.slane %v2652_v11, 4  ;;  %v6767_v38 = vld [vmem:[#allocation2 + $0x10] sm:$0xf] }
 0x346   : > { %v4563_v3 = vcombine.low %v2616_v35, %v2630_v50  ;;  %v2789_v58 = vshrl.u32 %v6767_v38, 16  ;;  %v2792_v59 = vshll.u32 %v6767_v38, 16  ;;  %v5450_v50 = vld [vmem:[%s7082_s4 + $0x1d8] sm:$0xff]  }
 0x348   : > { %4792 = vmatpush3.bf16.msra.mxu1 %v5439_v57  ;;  %v2638_v57 = vor.u32 %v2637_v54, %v2634_v51  ;;  %v2666_v51 = vor.u32 %v2665_v56, %v6745_v13  ;;  %v6785_v54 = vld [vmem:[#allocation2 + $0x3c] sm:$0x1]  ;;  %v2721_v13 = vld [vmem:[#allocation2 + $0x38] sm:$0xe]  ;;  %v2791_v27 = vrot.slane %v2789_v58, 4 }
 0x349   : > { %4793 = vmatprep.subr.bf16.mxu1 %v5440_v2  ;;  %v2679_v2 = vrot.slane %v2677_v63, 5  ;;  %v6802_v56 = vld [vmem:[#allocation2 + $0x28] sm:$0xf] }
 0x34a   : > { %v2639_v42 = vrot.slane %v2638_v57, 4  ;;  %v2667_v35 = vrot.slane %v2666_v51, 4  ;;  %v2685_v57 = vrot.slane %v2683_v32, 5  ;;  %v5454_v32 = vld [vmem:[%s7082_s4 + $0x1e8] sm:$0xff]  }
 0x34b   : > { %3822 = vmatmul.mubr.bf16.gmra.mrb[60].mxu1 %v4558_v43  ;;  %v2657_v43 = vrot.slane %v2655_v61, 5  ;;  %v2680_v48 = vor.u32 %v2679_v2, %v2676_v8  ;;  %v4538_v61 = vrot.slane %v2722_v10, 9  ;;  %v2794_v2 = vrot.slane %v2792_v59, 5  ;;  %v5455_v10 = vld [vmem:[%s7082_s4 + $0x1a8] sm:$0xff]  }
 0x34c   : > { %4794 = vmatpush3.bf16.msra.mxu1 %v5441_v5  ;;  %3862 = vmatprep.mubr.bf16.mxu1 %v4567_v49  ;;  %v4568_v5 = vcombine.low %v2750_v1, %v2754_v31  ;;  %v2643_v49 = vrot.slane %v2641_v33, 5  ;;  %v2806_v31 = vshll.u32 %v6778_v26, 16  ;;  %v4537_v1 = vrot.slane %v2721_v13, 9  ;;  %v6843_v13 = vld [vmem:[#allocation2 + $0x30] sm:$0xf] }
 0x34d   : > { %4795 = vmatprep.subr.bf16.mxu1 %v5442_v45  ;;  %v2757_v45 = vrot.slane %v2599_v30, 5  ;;  %v2658_v40 = vsel %vm6484_vm1, %v2653_v19, %v2657_v43  ;;  %v2681_v11 = vrot.slane %v2680_v48, 4  ;;  %v2765_v30 = vrot.slane %v6785_v54, 5 }
 0x34e   : > { %v2644_v63 = vsel %vm6484_vm1, %v2639_v42, %v2643_v49  ;;  %v2808_v60 = vrot.slane %v2806_v31, 5  ;;  %v6814_v42 = vld [vmem:[#allocation2 + $0x20] sm:$0xf]  ;;  %v2770_v43 = vsel %vm6625_vm4, %v4538_v61, %v2769_v24  ;;  %v6849_v24 = vld [vmem:[#allocation2 + $0x38] sm:$0xf] }
 0x34f   : > { %v4564_v7 = vcombine.low %v2644_v63, %v2658_v40  ;;  %v2686_v33 = vsel %vm6484_vm1, %v2681_v11, %v2685_v57  ;;  %v2766_v49 = vsel %vm6625_vm4, %v4537_v1, %v2765_v30  ;;  %v2697_v40 = vshll.u32 %v6785_v54, 16 }
 0x350   : > { %4796 = vmatpush3.bf16.msra.mxu1 %v5443_v62  ;;  %v2707_v62 = vrot.slane %v2705_v34, 5  ;;  %v2820_v58 = vshll.u32 %v6814_v42, 16  ;;  %v4570_v59 = vcombine.low %v2766_v49, %v2770_v43  ;;  %v2713_v63 = vrot.slane %v2711_v6, 5  ;;  %v6874_v49 = vld [vmem:[#allocation2 + $0x40] sm:$0xf] }
 0x351   : > { %4821 = vmatprep.subr.bf16.mxu1 %v5444_v12  ;;  %v2758_v12 = vsel %vm6625_vm4, %v4535_v44, %v2757_v45  ;;  %v6818_v44 = vld [vmem:[#allocation2 + $0x1c] sm:$0x1]  ;;  %v2795_v45 = vor.u32 %v2794_v2, %v2791_v27  ;;  %v6853_v2 = vld [vmem:[#allocation2 + $0x24] sm:$0x1]  ;;  %v2848_v1 = vshll.u32 %v6843_v13, 16 }
 0x352   : > { %v4569_v8 = vcombine.low %v2758_v12, %v2762_v52  ;;  %v2708_v41 = vor.u32 %v2707_v62, %v2704_v53  ;;  %v2798_v53 = vshll.u32 %v6812_v39, 16  ;;  %v2817_v52 = vshrl.u32 %v6814_v42, 16 }
 0x353   : > { %3863 = vmatmul.mubr.bf16.vlgmr.msra.gmra.mrb[64].mxu1 %v4563_v3  ;;  %v2671_v3 = vrot.slane %v2669_v55, 5  ;;  %v2812_v12 = vshll.u32 %v6818_v44, 16  ;;  %v2796_v54 = vrot.slane %v2795_v45, 4  ;;  %v2826_v43 = vshll.u32 %v6853_v2, 16 }
 0x354   : > { %4822 = vmatpush3.bf16.msra.mxu1 %v5445_v0  ;;  %3870 = vmatprep.mubr.bf16.mxu1 %v4568_v5  ;;  %v2803_v0 = vshrl.u32 %v6778_v26, 16  ;;  %v5452_v5 = vld [vmem:[%s7082_s4 + $0x1e0] sm:$0xff]   ;;  %v2709_v51 = vrot.slane %v2708_v41, 4  ;;  %v5457_v41 = vld [vmem:[%s7082_s4 + $0x1b0] sm:$0xff]  }
 0x355   : > { %4823 = vmatprep.subr.bf16.mxu1 %v5446_v14  ;;  %v2693_v14 = vrot.slane %v2691_v47, 5  ;;  %v2672_v34 = vsel %vm6484_vm1, %v2667_v35, %v2671_v3  ;;  %v2831_v47 = vshrl.u32 %v6802_v56, 16  ;;  %v2822_v35 = vrot.slane %v2820_v58, 5  ;;  %v6879_v58 = vld [vmem:[#allocation2 + $0x34] sm:$0x1] }
 0x356   : > { %v2805_v19 = vrot.slane %v2803_v0, 4  ;;  %v4565_v48 = vcombine.low %v2672_v34, %v2686_v33  ;;  %v2714_v11 = vsel %vm6484_vm1, %v2709_v51, %v2713_v63  ;;  %v2800_v0 = vrot.slane %v2798_v53, 5 }
 0x357   : > { %v2833_v55 = vrot.slane %v2831_v47, 4  ;;  %v2814_v61 = vrot.slane %v2812_v12, 5  ;;  %v2845_v3 = vshrl.u32 %v6843_v13, 16  ;;  %v2859_v34 = vshrl.u32 %v6849_v24, 16 }
 0x358   : > { %4824 = vmatpush3.bf16.msra.mxu1 %v5447_v21  ;;  %v2694_v21 = vor.u32 %v2693_v14, %v6769_v46  ;;  %v5453_v46 = vld [vmem:[%s7082_s4 + $0x1a0] sm:$0xff]   ;;  %v6845_v14 = vld [vmem:[#allocation2 + $0x2c] sm:$0x1]  ;;  %v2801_v27 = vsel %vm6484_vm1, %v2796_v54, %v2800_v0  ;;  %v2873_v54 = vshrl.u32 %v6874_v49, 16 }
 0x359   : > { %4825 = vmatprep.subr.bf16.mxu1 %v5448_v9  ;;  %v2834_v9 = vshll.u32 %v6802_v56, 16  ;;  %v2847_v47 = vrot.slane %v2845_v3, 4  ;;  %v2861_v53 = vrot.slane %v2859_v34, 4  ;;  %v4572_v34 = vcombine.low %v6814_v42, %v6802_v56  ;;  %v5466_v56 = vld [vmem:[%s7082_s4 + $0x220] sm:$0xff]  }
 0x35a   : > { %v2695_v62 = vrot.slane %v2694_v21, 4  ;;  %v2862_v21 = vshll.u32 %v6849_v24, 16 }
 0x35b   : > { %3871 = vmatmul.mubr.bf16.gmra.mrb[68].mxu1 %v4564_v7  ;;  %v2836_v4 = vrot.slane %v2834_v9, 5  ;;  %v5456_v7 = vld [vmem:[%s7082_s4 + $0x1f0] sm:$0xff]   ;;  %v2850_v9 = vrot.slane %v2848_v1, 5  ;;  %v6901_v1 = vld [vmem:[#allocation2 + $0x44] sm:$0x1] }
 0x35c   : > { %4826 = vmatpush3.bf16.msra.mxu1 %v5449_v22  ;;  %3878 = vmatprep.mubr.bf16.mxu1 %v4569_v8  ;;  %v2809_v22 = vor.u32 %v2808_v60, %v2805_v19  ;;  %v2819_v8 = vrot.slane %v2817_v52, 4  ;;  %v5458_v19 = vld [vmem:[%s7082_s4 + $0x1f8] sm:$0xff]   ;;  %v2828_v52 = vrot.slane %v2826_v43, 5  ;;  %v2882_v43 = vshll.u32 %v6901_v1, 16 }
 0x35d   : > { %4827 = vmatprep.subr.bf16.mxu1 %v5450_v50  ;;  %v2699_v50 = vrot.slane %v2697_v40, 5  ;;  %v5460_v40 = vld [vmem:[%s7082_s4 + $0x200] sm:$0xff]   ;;  %v2851_v12 = vor.u32 %v2850_v9, %v2847_v47 }
 0x35e   : > { %v2810_v31 = vrot.slane %v2809_v22, 4  ;;  %v2823_v60 = vor.u32 %v2822_v35, %v2819_v8  ;;  %v2864_v22 = vrot.slane %v2862_v21, 5  ;;  %v2884_v42 = vrot.slane %v2882_v43, 5 }
 0x35f   : > { %v2700_v57 = vsel %vm6484_vm1, %v2695_v62, %v2699_v50  ;;  %v5462_v50 = vld [vmem:[%s7082_s4 + $0x208] sm:$0xff]  }
 0x360   : > { %4828 = vmatpush3.bf16.msra.mxu1 %v5451_v29  ;;  %v2837_v29 = vor.u32 %v2836_v4, %v2833_v55  ;;  %v4566_v30 = vcombine.low %v2700_v57, %v2714_v11  ;;  %v2815_v33 = vsel %vm6484_vm1, %v2810_v31, %v2814_v61  ;;  %v2824_v51 = vrot.slane %v2823_v60, 4  ;;  %v6887_v4 = vld [vmem:[#allocation2 + $0x3c] sm:$0x1] }
 0x361   : > { %4829 = vmatprep.subr.bf16.mxu1 %v5452_v5  ;;  %v2840_v5 = vshll.u32 %v6845_v14, 16  ;;  %v4575_v6 = vcombine.low %v2801_v27, %v2815_v33  ;;  %v2876_v55 = vshll.u32 %v6874_v49, 16  ;;  %v2854_v11 = vshll.u32 %v6879_v58, 16 }
 0x362   : > { %v2838_v45 = vrot.slane %v2837_v29, 4  ;;  %v2865_v0 = vor.u32 %v2864_v22, %v2861_v53  ;;  %v2852_v57 = vrot.slane %v2851_v12, 4  ;;  %v2868_v61 = vshll.u32 %v6887_v4, 16  ;;  %v5468_v22 = vld [vmem:[%s7082_s4 + $0x228] sm:$0xff]  }
 0x363   : > { %3879 = vmatmul.mubr.bf16.gmra.mrb[72].mxu1 %v4565_v48  ;;  %v6869_v48 = vld [vmem:[#allocation2 + $0x48] sm:$0xf]  ;;  %v2875_v27 = vrot.slane %v2873_v54, 4  ;;  %v2878_v29 = vrot.slane %v2876_v55, 5  ;;  %v4573_v53 = vcombine.low %v6843_v13, %v6849_v24  ;;  %v2930_v13 = vrot.slane %v6818_v44, 5 }
 0x364   : > { %4830 = vmatpush3.bf16.msra.mxu1 %v5453_v46  ;;  %3886 = vmatprep.mubr.bf16.mxu1 %v4570_v59  ;;  %v5459_v46 = vld [vmem:[%s7082_s4 + $0x1b8] sm:$0xff]   ;;  %v2887_v59 = vshrl.u32 %v6869_v48, 16  ;;  %v2890_v62 = vshll.u32 %v6869_v48, 16  ;;  %v2866_v3 = vrot.slane %v2865_v0, 4  ;;  %v2870_v33 = vrot.slane %v2868_v61, 5 }
 0x365   : > { %4831 = vmatprep.subr.bf16.mxu1 %v5454_v32  ;;  %v2842_v32 = vrot.slane %v2840_v5, 5  ;;  %v2903_v54 = vld [vmem:[#allocation2 + $0x28] sm:$0xe]  ;;  %v2904_v55 = vld [vmem:[#allocation2 + $0x30] sm:$0xe]  ;;  %v2938_v44 = vrot.slane %v6845_v14, 5 }
 0x366   : > { %v2889_v8 = vrot.slane %v2887_v59, 4  ;;  %v2892_v35 = vrot.slane %v2890_v62, 5  ;;  %v2871_v21 = vsel %vm6484_vm1, %v2866_v3, %v2870_v33  ;;  %v2901_v59 = vld [vmem:[#allocation2 + $0x18] sm:$0xe]  ;;  %v4542_v0 = vrot.slane %v2903_v54, 9 }
 0x367   : > { %v2843_v63 = vsel %vm6484_vm1, %v2838_v45, %v2842_v32  ;;  %v2900_v32 = vld [vmem:[#allocation2 + $0x10] sm:$0xe]  ;;  %v4540_v12 = vrot.slane %v2901_v59, 9  ;;  %v2946_v61 = vrot.slane %v6887_v4, 5  ;;  %v2907_v14 = vld [vmem:[#allocation2 + $0x48] sm:$0xe] }
 0x368   : > { %4832 = vmatpush3.bf16.msra.mxu1 %v5455_v10  ;;  %v4571_v10 = vcombine.low %v6767_v38, %v6778_v26  ;;  %v5463_v38 = vld [vmem:[%s7082_s4 + $0x210] sm:$0xff]   ;;  %v2856_v26 = vrot.slane %v2854_v11, 5  ;;  %v4539_v62 = vrot.slane %v2900_v32, 9  ;;  %v4546_v3 = vrot.slane %v2907_v14, 9  ;;  %v5479_v54 = vld [vmem:[%s7083_s5 + $0x38] sm:$0xff]  }
 0x369   : > { %4833 = vmatprep.subr.bf16.mxu1 %v5456_v7  ;;  %v2829_v7 = vsel %vm6484_vm1, %v2824_v51, %v2828_v52  ;;  %v2950_v4 = vrot.slane %v6901_v1, 5  ;;  %v5473_v1 = vld [vmem:[%s7083_s5 + $0x8] sm:$0xff]  }
 0x36a   : > { %v4576_v31 = vcombine.low %v2829_v7, %v2843_v63  ;;  %v2857_v5 = vsel %vm6484_vm1, %v2852_v57, %v2856_v26  ;;  %v2926_v63 = vrot.slane %v6812_v39, 5  ;;  %v4574_v39 = vcombine.low %v6874_v49, %v6869_v48  ;;  %v5471_v7 = vld [vmem:[%s7082_s4 + $0x238] sm:$0xff]  }
 0x36b   : > { %3887 = vmatmul.mubr.bf16.gmra.mrb[76].mxu1 %v4566_v30  ;;  %v6903_v30 = vld [vmem:[#allocation2 + $0x4c] sm:$0x1]  ;;  %v4577_v45 = vcombine.low %v2857_v5, %v2871_v21  ;;  %v2934_v57 = vrot.slane %v6853_v2, 5  ;;  %v5472_v21 = vld [vmem:[%s7083_s5] sm:$0xff]  }
 0x36c   : > { %4834 = vmatpush3.bf16.msra.mxu1 %v5457_v41  ;;  %3927 = vmatprep.mubr.bf16.mxu1 %v4575_v6  ;;  %v2893_v41 = vor.u32 %v2892_v35, %v2889_v8  ;;  %v2896_v60 = vshll.u32 %v6903_v30, 16  ;;  %v5465_v6 = vld [vmem:[%s7082_s4 + $0x218] sm:$0xff]   ;;  %v2927_v24 = vsel %vm6625_vm4, %v4539_v62, %v2926_v63  ;;  %v4543_v8 = vrot.slane %v2904_v55, 9  ;;  %v5478_v63 = vld [vmem:[%s7083_s5 + $0x30] sm:$0xff]  }
 0x36d   : > { %4835 = vmatprep.subr.bf16.mxu1 %v5458_v19  ;;  %v2879_v19 = vor.u32 %v2878_v29, %v2875_v27  ;;  %v2942_v35 = vrot.slane %v6879_v58, 5  ;;  %v2939_v27 = vsel %vm6625_vm4, %v4542_v0, %v2938_v44  ;;  %v2954_v33 = vrot.slane %v6903_v30, 5  ;;  %4957 = vmatprep.subr.bf16.mxu0 %v5472_v21  ;;  %v5475_v30 = vld [vmem:[%s7083_s5 + $0x18] sm:$0xff]  }
 0x36e   : > { %v2894_v9 = vrot.slane %v2893_v41, 4  ;;  %4958 = vmatpush3.bf16.msra.mxu0 %v5472_v21 }
 0x36f   : > { %v2880_v47 = vrot.slane %v2879_v19, 4  ;;  %v2943_v29 = vsel %vm6625_vm4, %v4543_v8, %v2942_v35  ;;  %4959 = vmatprep.subr.bf16.mxu0 %v5473_v1 }
 0x370   : > { %4836 = vmatpush3.bf16.msra.mxu1 %v5459_v46  ;;  %v2898_v46 = vrot.slane %v2896_v60, 5  ;;  %v2955_v60 = vsel %vm6625_vm4, %v4546_v3, %v2954_v33 }
 0x371   : > { %4933 = vmatprep.subr.bf16.mxu1 %v5460_v40 }
 0x372   : > { %v2899_v51 = vsel %vm6484_vm1, %v2894_v9, %v2898_v46  ;;  %4960 = vmatpush3.bf16.msra.mxu0 %v5473_v1 }
 0x373   : > { %3928 = vmatmul.mubr.bf16.vlgmr.msra.gmra.mrb[80].mxu1 %v4571_v10  ;;  %v2931_v10 = vsel %vm6625_vm4, %v4540_v12, %v2930_v13  ;;  %4961 = vmatprep.subr.bf16.mxu0 %v5474_v37 }
 0x374   : > { %4934 = vmatpush3.bf16.msra.mxu1 %v5460_v40  ;;  %3935 = vmatprep.mubr.bf16.mxu1 %v4576_v31  ;;  %v2885_v40 = vsel %vm6484_vm1, %v2880_v47, %v2884_v42  ;;  %v4579_v11 = vcombine.low %v2927_v24, %v2931_v10  ;;  %v2905_v31 = vld [vmem:[#allocation2 + $0x38] sm:$0xe] }
 0x375   : > { %4935 = vmatprep.subr.bf16.mxu1 %v5462_v50  ;;  %v4578_v52 = vcombine.low %v2885_v40, %v2899_v51  ;;  %v4544_v49 = vrot.slane %v2905_v31, 9  ;;  %v5476_v40 = vld [vmem:[%s7083_s5 + $0x20] sm:$0xff]  }
 0x376   : > { %4962 = vmatpush3.bf16.msra.mxu0 %v5474_v37 }
 0x377   : > { %v2947_v26 = vsel %vm6625_vm4, %v4544_v49, %v2946_v61  ;;  %4963 = vmatprep.subr.bf16.mxu0 %v5475_v30 }
 0x378   : > { %4936 = vmatpush3.bf16.msra.mxu1 %v5462_v50  ;;  %v2902_v50 = vld [vmem:[#allocation2 + $0x20] sm:$0xe]  ;;  %v4581_v41 = vcombine.low %v2943_v29, %v2947_v26 }
 0x379   : > { %4937 = vmatprep.subr.bf16.mxu1 %v5463_v38  ;;  %v4541_v48 = vrot.slane %v2902_v50, 9 }
 0x37a   : > { %4964 = vmatpush3.bf16.msra.mxu0 %v5475_v30 }
 0x37b   : > { %3936 = vmatmul.mubr.bf16.gmra.mrb[84].mxu1 %v4572_v34  ;;  %v2935_v58 = vsel %vm6625_vm4, %v4541_v48, %v2934_v57  ;;  %4965 = vmatprep.subr.bf16.mxu0 %v5476_v40 }
 0x37c   : > { %4938 = vmatpush3.bf16.msra.mxu1 %v5463_v38  ;;  %3943 = vmatprep.mubr.bf16.mxu1 %v4577_v45  ;;  %v2906_v38 = vld [vmem:[#allocation2 + $0x40] sm:$0xe]  ;;  %v4580_v2 = vcombine.low %v2935_v58, %v2939_v27 }
 0x37d   : > { %4939 = vmatprep.subr.bf16.mxu1 %v5465_v6  ;;  %v4545_v5 = vrot.slane %v2906_v38, 9 }
 0x37e   : > { %4966 = vmatpush3.bf16.msra.mxu0 %v5476_v40 }
 0x37f   : > { %v2951_v19 = vsel %vm6625_vm4, %v4545_v5, %v2950_v4 }
 0x380   : > { %4940 = vmatpush3.bf16.msra.mxu1 %v5465_v6  ;;  %v4582_v34 = vcombine.low %v2951_v19, %v2955_v60 }
 0x381   : > { %4941 = vmatprep.subr.bf16.mxu1 %v5466_v56 }
 0x383   : > { %3944 = vmatmul.mubr.bf16.gmra.mrb[88].mxu1 %v4573_v53 }
 0x384   : > { %4942 = vmatpush3.bf16.msra.mxu1 %v5466_v56  ;;  %3951 = vmatprep.mubr.bf16.mxu1 %v4578_v52  ;;  %v5477_v52 = vld [vmem:[%s7083_s5 + $0x28] sm:$0xff]  }
 0x385   : > { %4943 = vmatprep.subr.bf16.mxu1 %v5468_v22  ;;  %4967 = vmatprep.subr.bf16.mxu0 %v5477_v52 }
 0x386   : > { %4968 = vmatpush3.bf16.msra.mxu0 %v5477_v52 }
 0x387   : > { %4969 = vmatprep.subr.bf16.mxu0 %v5478_v63 }
 0x388   : > { %4944 = vmatpush3.bf16.msra.mxu1 %v5468_v22 }
 0x389   : > { %4945 = vmatprep.subr.bf16.mxu1 %v5469_v36 }
 0x38a   : > { %4970 = vmatpush3.bf16.msra.mxu0 %v5478_v63 }
 0x38b   : > { %3952 = vmatmul.mubr.bf16.gmra.mrb[92].mxu1 %v4574_v39  ;;  %4971 = vmatprep.subr.bf16.mxu0 %v5479_v54 }
 0x38c   : > { %4946 = vmatpush3.bf16.msra.mxu1 %v5469_v36  ;;  %4949 = vmatprep.mubr.bf16.mxu1 %v4579_v11 }
 0x38d   : > { %4947 = vmatprep.subr.bf16.mxu1 %v5471_v7 }
 0x38e   : > { %4972 = vmatpush3.bf16.msra.mxu0 %v5479_v54 }
 0x390   : > { %4948 = vmatpush3.bf16.msra.mxu1 %v5471_v7 }
 0x391   : > { %4981 = vmatprep.subr.bf16.mxu1 %v5472_v21 }
 0x393   : > { %4950 = vmatmul.mubr.bf16.vlgmr.msra.gmra.mrb[96].mxu1 %v4580_v2 }
 0x394   : > { %4953 = vmatprep.mubr.bf16.mxu1 %v4581_v41  ;;  %4989 = vmatpush3.bf16.msra.mxu1 %v5472_v21 }
 0x395   : > { %4982 = vmatprep.subr.bf16.mxu1 %v5473_v1 }
 0x398   : > { %4990 = vmatpush3.bf16.msra.mxu1 %v5473_v1 }
 0x399   : > { %4983 = vmatprep.subr.bf16.mxu1 %v5474_v37 }
 0x39b   : > { %4954 = vmatmul.mubr.bf16.gmra.mrb[100].mxu1 %v4582_v34 }
 0x39c   : > { %4991 = vmatpush3.bf16.msra.mxu1 %v5474_v37 }
 0x39d   : > { %4984 = vmatprep.subr.bf16.mxu1 %v5475_v30 }
 0x3a0   : > { %4992 = vmatpush3.bf16.msra.mxu1 %v5475_v30 }
 0x3a1   : > { %4985 = vmatprep.subr.bf16.mxu1 %v5476_v40 }
 0x3a4   : > { %4993 = vmatpush3.bf16.msra.mxu1 %v5476_v40 }
 0x3a5   : > { %4986 = vmatprep.subr.bf16.mxu1 %v5477_v52 }
 0x3a8   : > { %4994 = vmatpush3.bf16.msra.mxu1 %v5477_v52 }
 0x3a9   : > { %4987 = vmatprep.subr.bf16.mxu1 %v5478_v63 }
 0x3ac   : > { %4995 = vmatpush3.bf16.msra.mxu1 %v5478_v63 }
 0x3ad   : > { %4988 = vmatprep.subr.bf16.mxu1 %v5479_v54 }
 0x3b0   : > { %4996 = vmatpush3.bf16.msra.mxu1 %v5479_v54 }
 0x3e4   : > { %v4717_v6 = vpop.f32.mrb[32].mxu1 }
 0x3e5   : > { %v4718_v43 = vpop.f32.mrb[33].mxu1 }
 0x3e6   : > { %v4719_v45 = vadd.f32 %v4718_v43, %v4717_v6  ;;  %v4720_v47 = vpop.f32.mrb[34].mxu1 }
 0x3e7   : > { %v4721_v9 = vpop.f32.mrb[35].mxu1 }
 0x3e8   : > { %v4722_v46 = vadd.f32 %v4721_v9, %v4720_v47 }
 0x3ee   : > { %v4723_v56 = vpop.f32.mrb[36].mxu1 }
 0x3ef   : > { %v4724_v42 = vpop.f32.mrb[37].mxu1 }
 0x3f0   : > { %v4725_v51 = vadd.f32 %v4724_v42, %v4723_v56  ;;  %v4726_v32 = vpop.f32.mrb[38].mxu1 }
 0x3f1   : > { %v4727_v53 = vpop.f32.mrb[39].mxu1 }
 0x3f2   : > { %v4728_v22 = vadd.f32 %v4727_v53, %v4726_v32 }
 0x3f6   : > { %v4729_v59 = vpop.f32.mrb[40].mxu1 }
 0x3f7   : > { %v4730_v62 = vpop.f32.mrb[41].mxu1 }
 0x3f8   : > { %v4731_v36 = vadd.f32 %v4730_v62, %v4729_v59  ;;  %v4732_v12 = vpop.f32.mrb[42].mxu1 }
 0x3f9   : > { %v4733_v13 = vpop.f32.mrb[43].mxu1 }
 0x3fa   : > { %v4734_v24 = vadd.f32 %v4733_v13, %v4732_v12 }
 0x3fe   : > { %v4735_v55 = vpop.f32.mrb[44].mxu1 }
 0x3ff   : > { %v4736_v39 = vpop.f32.mrb[45].mxu1 }
 0x400   : > { %v4737_v10 = vadd.f32 %v4736_v39, %v4735_v55  ;;  %v4738_v7 = vpop.f32.mrb[46].mxu1 }
 0x401   : > { %v4739_v50 = vpop.f32.mrb[47].mxu1 }
 0x402   : > { %v4740_v44 = vadd.f32 %v4739_v50, %v4738_v7 }
 0x406   : > { %v4757_v11 = vpop.f32.mrb[48].mxu1 }
 0x407   : > { %v4758_v0 = vpop.f32.mrb[49].mxu1 }
 0x408   : > { %v4759_v31 = vadd.f32 %v4758_v0, %v4757_v11  ;;  %v4760_v8 = vpop.f32.mrb[50].mxu1 }
 0x409   : > { %v4761_v35 = vpop.f32.mrb[51].mxu1 }
 0x40a   : > { %v3800_v57 = vadd.f32 %v4759_v31, %v4719_v45  ;;  %v4762_v48 = vadd.f32 %v4761_v35, %v4760_v8 }
 0x40c   : > { %v3803_v49 = vadd.f32 %v4762_v48, %v4722_v46 }
 0x40e   : > { %v4763_v61 = vpop.f32.mrb[52].mxu1 }
 0x40f   : > { %v4764_v27 = vpop.f32.mrb[53].mxu1 }
 0x410   : > { %v4765_v14 = vadd.f32 %v4764_v27, %v4763_v61  ;;  %v4766_v29 = vpop.f32.mrb[54].mxu1 }
 0x411   : > { %v4767_v38 = vpop.f32.mrb[55].mxu1 }
 0x412   : > { %v3808_v58 = vadd.f32 %v4765_v14, %v4725_v51  ;;  %v4768_v2 = vadd.f32 %v4767_v38, %v4766_v29 }
 0x414   : > { %v3811_v26 = vadd.f32 %v4768_v2, %v4728_v22 }
 0x416   : > { %v4769_v3 = vpop.f32.mrb[56].mxu1 }
 0x417   : > { %v4770_v41 = vpop.f32.mrb[57].mxu1 }
 0x418   : > { %v4771_v5 = vadd.f32 %v4770_v41, %v4769_v3  ;;  %v4772_v4 = vpop.f32.mrb[58].mxu1 }
 0x419   : > { %v4773_v33 = vpop.f32.mrb[59].mxu1 }
 0x41a   : > { %v3816_v19 = vadd.f32 %v4771_v5, %v4731_v36  ;;  %v4774_v60 = vadd.f32 %v4773_v33, %v4772_v4 }
 0x41c   : > { %v3819_v34 = vadd.f32 %v4774_v60, %v4734_v24 }
 0x41e   : > { %v4775_v21 = vpop.f32.mrb[60].mxu1 }
 0x41f   : > { %v4776_v1 = vpop.f32.mrb[61].mxu1 }
 0x420   : > { %v4777_v37 = vadd.f32 %v4776_v1, %v4775_v21  ;;  %v4778_v30 = vpop.f32.mrb[62].mxu1 }
 0x421   : > { %v4779_v6 = vpop.f32.mrb[63].mxu1 }
 0x422   : > { %v3824_v43 = vadd.f32 %v4777_v37, %v4737_v10  ;;  %v4780_v45 = vadd.f32 %v4779_v6, %v4778_v30 }
 0x424   : > { %v3827_v47 = vadd.f32 %v4780_v45, %v4740_v44 }
 0x426   : > { %v4797_v9 = vpop.f32.mrb[64].mxu1 }
 0x427   : > { %v4798_v46 = vpop.f32.mrb[65].mxu1 }
 0x428   : > { %v4799_v56 = vadd.f32 %v4798_v46, %v4797_v9  ;;  %v4800_v42 = vpop.f32.mrb[66].mxu1 }
 0x429   : > { %v4801_v40 = vpop.f32.mrb[67].mxu1 }
 0x42a   : > { %v3865_v51 = vadd.f32 %v4799_v56, %v3800_v57  ;;  %v4802_v32 = vadd.f32 %v4801_v40, %v4800_v42 }
 0x42c   : > { %v3868_v53 = vadd.f32 %v4802_v32, %v3803_v49 }
 0x42e   : > { %v4803_v22 = vpop.f32.mrb[68].mxu1 }
 0x42f   : > { %v4804_v52 = vpop.f32.mrb[69].mxu1 }
 0x430   : > { %v4805_v59 = vadd.f32 %v4804_v52, %v4803_v22  ;;  %v4806_v62 = vpop.f32.mrb[70].mxu1  ;;  %v4025_v52 = vld [vmem:[%s7084_s6 + $0x11] ss:$0 sm:$0xff] }
 0x431   : > { %v4807_v63 = vpop.f32.mrb[71].mxu1 }
 0x432   : > { %v3873_v36 = vadd.f32 %v4805_v59, %v3808_v58  ;;  %v4808_v12 = vadd.f32 %v4807_v63, %v4806_v62  ;;  %v4026_v63 = vld [vmem:[%s7084_s6 + $0x12] ss:$0 sm:$0xff] }
 0x434   : > { %v3876_v13 = vadd.f32 %v4808_v12, %v3811_v26 }
 0x436   : > { %v4809_v24 = vpop.f32.mrb[72].mxu1 }
 0x437   : > { %v4810_v54 = vpop.f32.mrb[73].mxu1 }
 0x438   : > { %v4811_v55 = vadd.f32 %v4810_v54, %v4809_v24  ;;  %v4812_v39 = vpop.f32.mrb[74].mxu1 }
 0x439   : > { %v4813_v10 = vpop.f32.mrb[75].mxu1 }
 0x43a   : > { %v3881_v7 = vadd.f32 %v4811_v55, %v3816_v19  ;;  %v4814_v50 = vadd.f32 %v4813_v10, %v4812_v39  ;;  %v4043_v55 = vld [vmem:[%s7084_s6 + $0x13] ss:$0 sm:$0xff] }
 0x43c   : > { %v3884_v44 = vadd.f32 %v4814_v50, %v3819_v34 }
 0x43e   : > { %v4815_v11 = vpop.f32.mrb[76].mxu1 }
 0x43f   : > { %v4816_v0 = vpop.f32.mrb[77].mxu1 }
 0x440   : > { %v4817_v31 = vadd.f32 %v4816_v0, %v4815_v11  ;;  %v4818_v8 = vpop.f32.mrb[78].mxu1 }
 0x441   : > { %v4819_v35 = vpop.f32.mrb[79].mxu1 }
 0x442   : > { %v3889_v57 = vadd.f32 %v4817_v31, %v3824_v43  ;;  %v4820_v48 = vadd.f32 %v4819_v35, %v4818_v8 }
 0x444   : > { %v3892_v49 = vadd.f32 %v4820_v48, %v3827_v47 }
 0x446   : > { %v4837_v61 = vpop.f32.mrb[80].mxu1 }
 0x447   : > { %v4838_v27 = vpop.f32.mrb[81].mxu1 }
 0x448   : > { %v4839_v14 = vadd.f32 %v4838_v27, %v4837_v61  ;;  %v4840_v29 = vpop.f32.mrb[82].mxu1 }
 0x449   : > { %v4841_v38 = vpop.f32.mrb[83].mxu1 }
 0x44a   : > { %v4842_v58 = vadd.f32 %v4841_v38, %v4840_v29  ;;  %v3930_v2 = vadd.f32 %v4839_v14, %v3865_v51 }
 0x44c   : > { %v3933_v26 = vadd.f32 %v4842_v58, %v3868_v53 }
 0x44e   : > { %v4843_v3 = vpop.f32.mrb[84].mxu1 }
 0x44f   : > { %v4844_v41 = vpop.f32.mrb[85].mxu1 }
 0x450   : > { %v4845_v5 = vadd.f32 %v4844_v41, %v4843_v3  ;;  %v4846_v4 = vpop.f32.mrb[86].mxu1 }
 0x451   : > { %v4847_v33 = vpop.f32.mrb[87].mxu1 }
 0x452   : > { %v4848_v19 = vadd.f32 %v4847_v33, %v4846_v4  ;;  %v3938_v60 = vadd.f32 %v4845_v5, %v3873_v36 }
 0x454   : > { %v3941_v34 = vadd.f32 %v4848_v19, %v3876_v13 }
 0x456   : > { %v4849_v21 = vpop.f32.mrb[88].mxu1 }
 0x457   : > { %v4850_v1 = vpop.f32.mrb[89].mxu1 }
 0x458   : > { %v4851_v37 = vadd.f32 %v4850_v1, %v4849_v21  ;;  %v4852_v30 = vpop.f32.mrb[90].mxu1 }
 0x459   : > { %v4853_v6 = vpop.f32.mrb[91].mxu1 }
 0x45a   : > { %v4854_v43 = vadd.f32 %v4853_v6, %v4852_v30  ;;  %v3946_v45 = vadd.f32 %v4851_v37, %v3881_v7 }
 0x45c   : > { %v3949_v47 = vadd.f32 %v4854_v43, %v3884_v44 }
 0x45e   : > { %v4855_v9 = vpop.f32.mrb[92].mxu1 }
 0x45f   : > { %v4856_v46 = vpop.f32.mrb[93].mxu1 }
 0x460   : > { %v4857_v56 = vadd.f32 %v4856_v46, %v4855_v9  ;;  %v4858_v42 = vpop.f32.mrb[94].mxu1 }
 0x461   : > { %v4859_v40 = vpop.f32.mrb[95].mxu1 }
 0x462   : > { %v4860_v51 = vadd.f32 %v4859_v40, %v4858_v42  ;;  %v3954_v32 = vadd.f32 %v4857_v56, %v3889_v57 }
 0x464   : > { %v3957_v53 = vadd.f32 %v4860_v51, %v3892_v49 }
 0x466   : > { %v4951_v22 = vpop.f32.mrb[96].mxu1 }
 0x467   : > { %v4003_v59 = vadd.f32 %v4951_v22, %v3938_v60  ;;  %v3994_v62 = vpop.f32.mrb[97].mxu1  ;;  %v4201_v22 = vld [vmem:[%s7084_s6 + $0x14] ss:$0 sm:$0xff] }
 0x468   : > { %v3995_v36 = vadd.f32 %v3994_v62, %v3930_v2  ;;  %v4952_v12 = vpop.f32.mrb[98].mxu1 }
 0x469   : > { %v4029_v13 = vmul.f32 %v4025_v52, %v4003_v59  ;;  %v4006_v24 = vadd.f32 %v4952_v12, %v3941_v34  ;;  %v3997_v54 = vpop.f32.mrb[99].mxu1  ;;  %v1983_v59 = vld [vmem:[%s7084_s6 + $0x4] ss:$0 sm:$0xff] }
 0x46a   : > { %v4027_v39 = vmul.f32 %v4025_v52, %v3995_v36  ;;  %v3998_v10 = vadd.f32 %v3997_v54, %v3933_v26  ;;  %v4202_v36 = vld [vmem:[%s7084_s6 + $0x15] ss:$0 sm:$0xff] }
 0x46b   : > { %v4037_v7 = vadd.f32 %v4029_v13, %v4026_v63  ;;  %v4030_v50 = vmul.f32 %v4025_v52, %v4006_v24 }
 0x46c   : > { %v4035_v44 = vadd.f32 %v4027_v39, %v4026_v63  ;;  %v4028_v11 = vmul.f32 %v4025_v52, %v3998_v10 }
 0x46d   : > { %vm4046_vm5 = vcmp.ge.f32.partialorder %v4037_v7, 0.0  ;;  %v4054_v0 = vmul.f32 %v4043_v55, %v4037_v7  ;;  %v4038_v31 = vadd.f32 %v4030_v50, %v4026_v63 }
 0x46e   : > { %v4052_v8 = vmul.f32 %v4043_v55, %v4035_v44  ;;  %v4036_v35 = vadd.f32 %v4028_v11, %v4026_v63  ;;  %v4955_v57 = vpop.f32.mrb[100].mxu1  ;;  %vm4044_vm6 = vcmp.ge.f32.partialorder %v4035_v44, 0.0 }
 0x46f   : > { %vm4047_vm7 = vcmp.ge.f32.partialorder %v4038_v31, 0.0  ;;  %v4055_v48 = vmul.f32 %v4043_v55, %v4038_v31  ;;  %v4019_v49 = vadd.f32 %v4955_v57, %v3954_v32  ;;  %v4010_v61 = vpop.f32.mrb[101].mxu1  ;;  %v4062_v27 = vsel %vm4046_vm5, %v4037_v7, %v4054_v0 }
 0x470   : > { %v4053_v14 = vmul.f32 %v4043_v55, %v4036_v35  ;;  %v4011_v29 = vadd.f32 %v4010_v61, %v3946_v45  ;;  %v4956_v38 = vpop.f32.mrb[102].mxu1  ;;  %vm4045_vm8 = vcmp.ge.f32.partialorder %v4036_v35, 0.0  ;;  %v4060_v41 = vsel %vm4044_vm6, %v4035_v44, %v4052_v8 }
 0x471   : > { %v4063_v58 = vsel %vm4047_vm7, %v4038_v31, %v4055_v48  ;;  %v4033_v2 = vmul.f32 %v4025_v52, %v4019_v49  ;;  %v4022_v26 = vadd.f32 %v4956_v38, %v3957_v53  ;;  %v4013_v3 = vpop.f32.mrb[103].mxu1  ;;  %v1982_v53 = vld [vmem:[%s7084_s6 + $0x3] ss:$0 sm:$0xff] }
 0x472   : > { %v4069_v5 = vpack.c.bf16 %v4063_v58, %v4062_v27  ;;  %v4031_v4 = vmul.f32 %v4025_v52, %v4011_v29  ;;  %v4014_v33 = vadd.f32 %v4013_v3, %v3949_v47  ;;  %v4061_v19 = vsel %vm4045_vm8, %v4036_v35, %v4053_v14 }
 0x473   : > { %v4041_v60 = vadd.f32 %v4033_v2, %v4026_v63  ;;  %v4034_v34 = vmul.f32 %v4025_v52, %v4022_v26  ;;  %v4068_v21 = vpack.c.bf16 %v4061_v19, %v4060_v41  ;;  %v1984_v62 = vmul.f32 %v1982_v53, %v6374_v20 }
 0x474   : > { %v4039_v1 = vadd.f32 %v4031_v4, %v4026_v63  ;;  %v4032_v37 = vmul.f32 %v4025_v52, %v4014_v33  ;;  %v1986_v52 = vmul.f32 %v6372_v15, %v1982_v53  ;;  %v1987_v12 = vmul.f32 %v6376_v16, %v1982_v53 }
 0x475   : > { %v4058_v30 = vmul.f32 %v4043_v55, %v4041_v60  ;;  %v4042_v6 = vadd.f32 %v4034_v34, %v4026_v63  ;;  %4973 = vmatprep.mubr.bf16.mxu0 %v4068_v21  ;;  %vm4050_vm9 = vcmp.ge.f32.partialorder %v4041_v60, 0.0  ;;  %v1985_v54 = vmul.f32 %v1982_v53, %v6378_v23 }
 0x476   : > { %v4056_v43 = vmul.f32 %v4043_v55, %v4039_v1  ;;  %v4040_v45 = vadd.f32 %v4032_v37, %v4026_v63  ;;  %4974 = vmatmul.mubr.bf16.vlgmr.msra.gmra.mrb[16].mxu0 %v4069_v5  ;;  %vm4048_vm11 = vcmp.ge.f32.partialorder %v4039_v1, 0.0  ;;  %v1994_v39 = vadd.f32 %v1986_v52, %v1983_v59 }
 0x477   : > { %vm4051_vm10 = vcmp.ge.f32.partialorder %v4042_v6, 0.0  ;;  %v4059_v9 = vmul.f32 %v4043_v55, %v4042_v6  ;;  %v4066_v47 = vsel %vm4050_vm9, %v4041_v60, %v4058_v30  ;;  %v1992_v20 = vadd.f32 %v1984_v62, %v1983_v59 }
 0x478   : > { %v4057_v46 = vmul.f32 %v4043_v55, %v4040_v45  ;;  %vm4049_vm12 = vcmp.ge.f32.partialorder %v4040_v45, 0.0  ;;  %v4064_v40 = vsel %vm4048_vm11, %v4039_v1, %v4056_v43  ;;  %v1995_v0 = vadd.f32 %v1987_v12, %v1983_v59 }
 0x479   : > { %v4067_v56 = vsel %vm4051_vm10, %v4042_v6, %v4059_v9  ;;  %v1993_v35 = vadd.f32 %v1985_v54, %v1983_v59  ;;  %v1990_v48 = vmul.f32 %v6380_v25, %v1982_v53  ;;  %v1988_v49 = vmul.f32 %v1982_v53, %v6382_v17 }
 0x47a   : > { %v4071_v42 = vpack.c.bf16 %v4067_v56, %v4066_v47  ;;  %v4065_v51 = vsel %vm4049_vm12, %v4040_v45, %v4057_v46  ;;  %v1991_v14 = vmul.f32 %v6384_v18, %v1982_v53  ;;  %v1989_v38 = vmul.f32 %v1982_v53, %v6386_v28 }
 0x47b   : > { %v4070_v32 = vpack.c.bf16 %v4065_v51, %v4064_v40  ;;  %v1998_v26 = vadd.f32 %v1990_v48, %v1983_v59  ;;  %v1996_v5 = vadd.f32 %v1988_v49, %v1983_v59 }
 0x47c   : > { %v1999_v18 = vadd.f32 %v1991_v14, %v1983_v59  ;;  %v1997_v60 = vadd.f32 %v1989_v38, %v1983_v59 }
 0x47d   : > { %4977 = vmatprep.mubr.bf16.mxu1 %v4070_v32 }
 0x47e   : > { %4978 = vmatmul.mubr.bf16.vlgmr.msra.gmra.mrb[104].mxu1 %v4071_v42 }
 0x549   : > { %v4975_v63 = vpop.f32.mrb[16].mxu0 }
 0x54a   : > { %v4205_v13 = vmul.f32 %v4975_v63, %v4201_v22  ;;  %v4170_v24 = vpop.f32.mrb[17].mxu0 }
 0x54b   : > { %v4203_v15 = vmul.f32 %v4201_v22, %v4170_v24  ;;  %v4976_v55 = vpop.f32.mrb[18].mxu0 }
 0x54c   : > { %v4213_v10 = vadd.f32 %v4205_v13, %v4202_v36  ;;  %v4206_v7 = vmul.f32 %v4976_v55, %v4201_v22  ;;  %v4173_v50 = vpop.f32.mrb[19].mxu0 }
 0x54d   : > { %v4211_v44 = vadd.f32 %v4203_v15, %v4202_v36  ;;  %v4204_v11 = vmul.f32 %v4201_v22, %v4173_v50 }
 0x54e   : > { %v4221_v31 = vadd.f32 %v4213_v10, %v1994_v39  ;;  %v4214_v8 = vadd.f32 %v4206_v7, %v4202_v36 }
 0x54f   : > { %v4219_v16 = vadd.f32 %v4211_v44, %v1992_v20  ;;  %v4212_v57 = vadd.f32 %v4204_v11, %v4202_v36 }
 0x550   : > { %4229 = vst [vmem:[%s7013_s13 + $0x10] sm:$0xff] %v4221_v31  ;;  %v4222_v23 = vadd.f32 %v4214_v8, %v1995_v0 }
 0x551   : > { %4227 = vst [vmem:[%s7013_s13] sm:$0xff] %v4219_v16  ;;  %v4220_v61 = vadd.f32 %v4212_v57, %v1993_v35  ;;  %v4979_v27 = vpop.f32.mrb[104].mxu1 }
 0x552   : > { %4230 = vst [vmem:[%s7013_s13 + $0x18] sm:$0xff] %v4222_v23  ;;  %v4209_v29 = vmul.f32 %v4979_v27, %v4201_v22  ;;  %v4186_v25 = vpop.f32.mrb[105].mxu1 }
 0x553   : > { %4228 = vst [vmem:[%s7013_s13 + $0x8] sm:$0xff] %v4220_v61  ;;  %v4207_v58 = vmul.f32 %v4201_v22, %v4186_v25  ;;  %v4980_v2 = vpop.f32.mrb[106].mxu1 }
 0x554   : > { %v4217_v3 = vadd.f32 %v4209_v29, %v4202_v36  ;;  %v4210_v41 = vmul.f32 %v4980_v2, %v4201_v22  ;;  %v4189_v17 = vpop.f32.mrb[107].mxu1 }
 0x555   : > { %v4215_v4 = vadd.f32 %v4207_v58, %v4202_v36  ;;  %v4208_v33 = vmul.f32 %v4201_v22, %v4189_v17 }
 0x556   : > { %v4225_v19 = vadd.f32 %v4217_v3, %v1998_v26  ;;  %v4218_v28 = vadd.f32 %v4210_v41, %v4202_v36 }
 0x557   : > { %v4223_v34 = vadd.f32 %v4215_v4, %v1996_v5  ;;  %v4216_v21 = vadd.f32 %v4208_v33, %v4202_v36 }
 0x558   : > { %4233 = vst [vmem:[%s7013_s13 + $0x30] sm:$0xff] %v4225_v19  ;;  %v4226_v1 = vadd.f32 %v4218_v28, %v1999_v18 }
 0x559   : > { %4231 = vst [vmem:[%s7013_s13 + $0x20] sm:$0xff] %v4223_v34  ;;  %v4224_v37 = vadd.f32 %v4216_v21, %v1997_v60 }
 0x55a   : > { %4234 = vst [vmem:[%s7013_s13 + $0x38] sm:$0xff] %v4226_v1 }
 0x55b   : > { %4232 = vst [vmem:[%s7013_s13 + $0x28] sm:$0xff] %v4224_v37 }
 0x55c   : > { %5493 = shalt.err (!%p5490_p3)
}
 0x55d   : > { %s5494_s20 = scalar_lea.hbm %s7028_s19, 1024  ;;  %s5498_s14 = scalar_lea.hbm %s7085_s7, 2048 }
 0x55e   : > { %p5495_p4 = scmp.ne.s32.totalorder %s7028_s19, %s5494_s20  ;;  %p5499_p9 = scmp.lt.u32.totalorder %s7028_s19, %s7085_s7 }
 0x55f   : > { %p5500_p10 = scmp.lt.u32.totalorder %s5498_s14, %s5494_s20  ;;  %p5502_p12 = scmp.lt.u32.totalorder %s5494_s20, %s7028_s19 }
 0x560   : > { %p5496_p7 = pnand %p5495_p4, %p5626_p5 }
 0x561   : > { %p5501_p11 = por %p5500_p10, %p5499_p9 }
 0x562   : > { %p5497_p8 = pneg %p5496_p7 }
 0x563   : > { %p5503_p13 = por %p5502_p12, %p5501_p11 }
 0x565   : > { %p5504_p0 = pnand %p5503_p13, %p5497_p8 }
 0x567   : > { %5507 = shalt.err (!%p5504_p0)
}
 0x568   : > { %s5546_s17 = smov 128   ;;  %s5547_s18 = smov 8  }
 0x569   : > { %5062 = dma.vmem_to_hbm [thread:$0]  (%p5626_p5), %s7030_s15, 1024, %s7028_s19, %s7037_s28, %s5546_s17, %s5546_s17, %s5547_s18  }
 0x56a PF: > { %p5068_p1 = scmp.ge.s32.totalorder %s5542_s27, 2  ;;  %s4264_s21 = sand.u32 1, %s5530_s24  }
 0x56b   : > { %s4265_s22 = scalar_lea.sflag [#allocation4], %s4264_s21 }
 0x56c   : > { %p5065_p2 = pnand %p5068_p1, %p5630_p6 }
 0x56e   : > { %5525 = dma.done.wait (!%p5065_p2), %s4265_s22, 1024  }
 0x56f   : > { %5527 = vsyncadd (!%p5065_p2), %s4265_s22, 4294966272  ;;  %p17_p3 = scmp.ge.s32.totalorder %s5613_s30, 4   ;;  %s7098_s24 = smov %s5534_s25 }
 0x570   : > { %s7099_s25 = smov %s5538_s26  ;;  %s7100_s26 = smov %s5624_s10 }
 0x571   : > { %s7101_s27 = smov %s5613_s30  ;;  %19 = sbr.rel (!%p17_p3) target bundleno = 3 (0x3), region = 88 }
 0x578   :  { %4270 = vsyncpa [#allocation4], 1 }
 0x579   :  { %4272 = vsyncpa [#allocation4 + $0x1], 1 }

</bundles_post_ra>
